<compile_context>
chip_gen: v7x
topology: tpu7x:2x2x1
jax: 0.10.0
libtpu: 0.0.40
codegen_flags: <defaults>
</compile_context>

<pallas_src>
import functools
import numpy as np
import jax
import jax.numpy as jnp
from jax import lax
from jax.experimental import pallas as pl
from jax.experimental.pallas import tpu as pltpu


def _full_spec(shape):
    # whole-array block, identical block every grid step (weights / constants)
    return pl.BlockSpec(shape, lambda i, _r=len(shape): (0,) * _r)


def res_attn_kernel(x_ref, w_all_ref, b_all_ref, wo_c_ref, bo_c_ref,
                    w_res_ref, masks_ref, gammas_ref, out_ref,
                    *, bt, n, w, cl, use_bf16, approx_recip):
    f32 = jnp.float32
    mxu = (lambda a: a.astype(jnp.bfloat16)) if use_bf16 else (lambda a: a)

    x = x_ref[...]                                    # (R, C) f32
    r, c = x.shape

    # ---------------- fused 1x1 projections: one lane-dense matmul -----------
    # column layout: [ v_fm(C) | q_fm(cl) | k_fm(cl) | q_c(cl) | k_c(cl) | v_c(cl) ]
    proj = jnp.dot(mxu(x), mxu(w_all_ref[...]),
                   preferred_element_type=f32) + b_all_ref[...]

    # ---------------- residual 3x3 zero-padded conv: ONE fused matmul --------
    # 9 sublane-rolled, edge-masked copies of x concatenated along lanes hit the
    # MXU once at K = 9*C instead of 9 shallow matmuls + 8 VPU accumulator adds.
    masks = masks_ref[...]                            # (R, 9) f32, 1 = valid tap
    taps = []
    for dy in (-1, 0, 1):
        for dx in (-1, 0, 1):
            k_idx = (dy + 1) * 3 + (dx + 1)
            s = dy * w + dx
            if s == 0:
                taps.append(x)                        # center tap: always valid
            else:
                shifted = pltpu.roll(x, shift=(-s) % r, axis=0)
                taps.append(shifted * masks[:, k_idx:k_idx + 1])
    tap_slab = jnp.concatenate(taps, axis=1)          # (R, 9C)
    conv = jnp.dot(mxu(tap_slab), mxu(w_res_ref[...]),
                   preferred_element_type=f32)        # (R, C)
    conv = jnp.where(conv > 0, conv, 0.2 * conv)      # LeakyReLU(0.2)

    def softmax_last(e):
        e = e - jnp.max(e, axis=-1, keepdims=True)
        p = jnp.exp(e)
        s = jnp.sum(p, axis=-1, keepdims=True)
        if approx_recip:
            return p * pl.reciprocal(s, approx=True)  # EUP slot, ~2e-3 rel err
        return p / s                                  # exact (validation path)

    # ---------------- Self_Attn_FM: batched over the Bt images in the block --
    # (bt, n, n) energy is ~N^2 f32 per image; flash-tile over keys before
    # scaling H*W on v7x's 64 MiB VMEM.
    pb = proj.reshape(bt, n, c + 5 * cl)              # free split of sublane dim
    v_fm = pb[:, :, 0:c]
    q_fm = pb[:, :, c:c + cl]
    k_fm = pb[:, :, c + cl:c + 2 * cl]
    energy = jnp.einsum('bqc,bkc->bqk', mxu(q_fm), mxu(k_fm),
                        preferred_element_type=f32)   # (bt, n, n)
    attn = softmax_last(energy)
    attn_fm = jnp.einsum('bqk,bkc->bqc', mxu(attn), mxu(v_fm),
                         preferred_element_type=f32)  # (bt, n, C)
    attn_fm = attn_fm.reshape(r, c)

    # ---------------- Self_Attn_C: tiny (cl x cl) channel attention ----------
    # out_conv is folded into the (cl, cl) map first (associativity), deleting
    # the (n, cl) intermediate and its K=cl matmul.  Kept f32 + per-image 2-D
    # dots: cl=4 matmuls are pure MXU pipeline latency regardless of dtype and
    # the unrolled tensors are a couple of vregs each.
    wo_c = wo_c_ref[...]                              # (cl, C)
    attn_c_rows = []
    for b in range(bt):
        q_c = pb[b, :, c + 2 * cl:c + 3 * cl]         # (n, cl)
        k_c = pb[b, :, c + 3 * cl:c + 4 * cl]
        v_c = pb[b, :, c + 4 * cl:c + 5 * cl]
        energy_c = lax.dot_general(k_c, q_c, (((0,), (0,)), ((), ())),
                                   preferred_element_type=f32)      # (cl, cl)
        attn_c_map = softmax_last(energy_c)
        m = jnp.dot(attn_c_map, wo_c, preferred_element_type=f32)   # (cl, C)
        attn_c_rows.append(jnp.dot(v_c, m, preferred_element_type=f32))
    attn_c = jnp.concatenate(attn_c_rows, axis=0) + bo_c_ref[...]   # (R, C)

    # ---------------- combine (each gamma scale applied exactly once) --------
    g_fm = gammas_ref[0]
    g_c = gammas_ref[1]
    g_res = gammas_ref[2]
    out_ref[...] = x + g_fm * attn_fm + g_c * attn_c + g_res * conv


def _pick_block_batch(batch):
    # v7x has 2 TensorCores/chip: keep the "parallel" grid axis even and >= 2 so
    # both cores get work.  v5e/v6e are single-TC: fewer, bigger steps only help,
    # and the one extra ~0.35us grid step a length-2 grid costs there is noise.
    if batch >= 2 and batch % 2 == 0:
        return batch // 2
    return batch


def res_attn_block(x_nchw, params, block_batch=None, use_bf16=True,
                   approx_recip=True):
    """ResAttnBlock forward.  use_bf16/approx_recip=False gives the exact-f32
    validation configuration; the defaults are the fast TPU configuration."""
    B, C, H, W = x_nchw.shape
    N = H * W
    Cl = params['wo_c'].shape[0]

    Bt = _pick_block_batch(B) if block_batch is None else block_batch
    assert B % Bt == 0
    R = Bt * N
    assert R % 8 == 0, "Bt*H*W must be a multiple of 8 for TPU sublane tiling"

    # NCHW -> (B*N, C): pure layout glue.
    # TODO(synk): feed NHWC activations from the surrounding model (or do the
    # transpose in-kernel on the XLU) to drop this extra HBM round-trip, and
    # present the output as a lane-dense (B*N/4, 4*C) slab so the epilogue
    # stores are unmasked 128-lane vst instead of 32-lane vst.msk.
    x_flat = jnp.transpose(x_nchw, (0, 2, 3, 1)).reshape(B * N, C)

    # Per-row validity of each of the 9 conv taps for ONE block of Bt images.
    # NOTE: the rolled conv relies on this being tiled exactly Bt times in
    # row-major (image, y, x) order with roll modulus R: every row whose rolled
    # source crosses an image (or block-wrap) boundary is exactly a row whose
    # tap falls outside the HxW image and is therefore masked to zero.
    yy, xx = np.meshgrid(np.arange(H), np.arange(W), indexing='ij')
    yy = yy.reshape(-1)
    xx = xx.reshape(-1)
    cols = []
    for dy in (-1, 0, 1):
        for dx in (-1, 0, 1):
            cols.append((yy + dy >= 0) & (yy + dy < H) &
                        (xx + dx >= 0) & (xx + dx < W))
    tap_masks = jnp.asarray(
        np.tile(np.stack(cols, axis=1).astype(np.float32), (Bt, 1)))   # (R, 9)

    kernel = functools.partial(res_attn_kernel, bt=Bt, n=N, w=W, cl=Cl,
                               use_bf16=use_bf16, approx_recip=approx_recip)

    in_specs = [
        pl.BlockSpec((R, C), lambda i: (i, 0)),
        _full_spec(params['w_all'].shape),
        _full_spec(params['b_all'].shape),
        _full_spec(params['wo_c'].shape),
        _full_spec(params['bo_c'].shape),
        _full_spec(params['w_res_mat'].shape),
        _full_spec(tap_masks.shape),
        pl.BlockSpec(memory_space=pltpu.MemorySpace.SMEM),
    ]

    out = pl.pallas_call(
        kernel,
        out_shape=jax.ShapeDtypeStruct((B * N, C), jnp.float32),
        grid_spec=pltpu.PrefetchScalarGridSpec(
            num_scalar_prefetch=0,
            grid=(B // Bt,),
            in_specs=in_specs,
            out_specs=pl.BlockSpec((R, C), lambda i: (i, 0)),
        ),
        compiler_params=pltpu.CompilerParams(
            dimension_semantics=("parallel",),
            vmem_limit_bytes=32 * 1024 * 1024),
    )(x_flat, params['w_all'], params['b_all'], params['wo_c'],
      params['bo_c'], params['w_res_mat'], tap_masks, params['gammas'])

    return jnp.transpose(out.reshape(B, H, W, C), (0, 3, 1, 2))


def make_params(key, C, latent_dim=8):
    Cl = C // latent_dim
    keys = jax.random.split(key, 16)

    def conv_w(k, cin, cout, ksz):
        bound = 1.0 / np.sqrt(cin * ksz * ksz)
        return jax.random.uniform(k, (cout, cin, ksz, ksz), jnp.float32, -bound, bound)

    def conv_b(k, cin, cout, ksz):
        bound = 1.0 / np.sqrt(cin * ksz * ksz)
        return jax.random.uniform(k, (cout,), jnp.float32, -bound, bound)

    # Self_Attn_FM: query/key (C->C/8), value (C->C), all 1x1 with bias
    wq_fm = conv_w(keys[0], C, Cl, 1); bq_fm = conv_b(keys[1], C, Cl, 1)
    wk_fm = conv_w(keys[2], C, Cl, 1); bk_fm = conv_b(keys[3], C, Cl, 1)
    wv_fm = conv_w(keys[4], C, C, 1);  bv_fm = conv_b(keys[5], C, C, 1)
    # Self_Attn_C: query/key/value (C->C/8), out (C/8->C), all 1x1 with bias
    wq_c = conv_w(keys[6], C, Cl, 1);  bq_c = conv_b(keys[7], C, Cl, 1)
    wk_c = conv_w(keys[8], C, Cl, 1);  bk_c = conv_b(keys[9], C, Cl, 1)
    wv_c = conv_w(keys[10], C, Cl, 1); bv_c = conv_b(keys[11], C, Cl, 1)
    wo_c = conv_w(keys[12], Cl, C, 1); bo_c = conv_b(keys[13], Cl, C, 1)

    # Residual 3x3 conv (bias=False) wrapped in SpectralNorm (1 power iteration).
    # The power iteration is a host-side parameter update; it is folded into the
    # weights here, not re-run inside the kernel.
    w_res = conv_w(keys[14], C, C, 3)                  # (Cout, Cin, 3, 3)
    u0 = jax.random.normal(keys[15], (C,), jnp.float32)
    u0 = u0 / (jnp.linalg.norm(u0) + 1e-12)
    w_mat = w_res.reshape(C, -1)
    v = w_mat.T @ u0
    v = v / (jnp.linalg.norm(v) + 1e-12)
    u = w_mat @ v
    u = u / (jnp.linalg.norm(u) + 1e-12)
    sigma = u @ (w_mat @ v)
    w_res_sn = w_res / sigma

    # NOTE: the PyTorch module initializes gamma_fm / gamma_c / res_gamma to 0;
    # we use nonzero deterministic values so every branch is exercised.
    gammas = jnp.array([0.5, 0.75, 1.25], jnp.float32)

    to_mat = lambda wt: jnp.transpose(wt[:, :, 0, 0], (1, 0))   # (Cin, Cout)
    row = lambda b: b.reshape(1, -1)

    params = dict(
        wq_fm=to_mat(wq_fm), bq_fm=row(bq_fm),
        wk_fm=to_mat(wk_fm), bk_fm=row(bk_fm),
        wv_fm=to_mat(wv_fm), bv_fm=row(bv_fm),
        wq_c=to_mat(wq_c), bq_c=row(bq_c),
        wk_c=to_mat(wk_c), bk_c=row(bk_c),
        wv_c=to_mat(wv_c), bv_c=row(bv_c),
        wo_c=to_mat(wo_c), bo_c=row(bo_c),
        w_res_oihw=w_res_sn,
        gammas=gammas,
    )
    # Fused projection weight/bias for the kernel:
    # columns = [ v_fm (C) | q_fm | k_fm | q_c | k_c | v_c ] (each Cl wide).
    params['w_all'] = jnp.concatenate(
        [params['wv_fm'], params['wq_fm'], params['wk_fm'],
         params['wq_c'], params['wk_c'], params['wv_c']], axis=1)
    params['b_all'] = jnp.concatenate(
        [params['bv_fm'], params['bq_fm'], params['bk_fm'],
         params['bq_c'], params['bk_c'], params['bv_c']], axis=1)
    # 3x3 conv weight as 9 stacked (Cin, Cout) taps; tap index k = ky*3 + kx,
    # stacked along rows -> (9*C, C) for the single fused conv matmul.
    w_res_taps = jnp.transpose(w_res_sn, (2, 3, 1, 0)).reshape(9, C, C)
    params['w_res_mat'] = w_res_taps.reshape(9 * C, C)
    return params


def ref_forward(x_nchw, params):
    # Pure-JAX reference mirroring the PyTorch forward (for correctness check);
    # HIGHEST precision so the reference itself is true f32 on the MXU.
    B, C, H, W = x_nchw.shape
    N = H * W
    hp = lax.Precision.HIGHEST
    x_nc = jnp.transpose(x_nchw, (0, 2, 3, 1)).reshape(B, N, C)

    conv1x1 = lambda x, w, b: jnp.einsum('bnc,cd->bnd', x, w, precision=hp) + b

    q = conv1x1(x_nc, params['wq_fm'], params['bq_fm'])
    k = conv1x1(x_nc, params['wk_fm'], params['bk_fm'])
    v = conv1x1(x_nc, params['wv_fm'], params['bv_fm'])
    attn = jax.nn.softmax(jnp.einsum('bic,bjc->bij', q, k, precision=hp), axis=-1)
    attn_fm = jnp.einsum('bij,bjc->bic', attn, v, precision=hp)

    qc = conv1x1(x_nc, params['wq_c'], params['bq_c'])
    kc = conv1x1(x_nc, params['wk_c'], params['bk_c'])
    vc = conv1x1(x_nc, params['wv_c'], params['bv_c'])
    attn_c_map = jax.nn.softmax(
        jnp.einsum('bni,bnj->bij', kc, qc, precision=hp), axis=-1)
    out_lat = jnp.einsum('bni,bij->bnj', vc, attn_c_map, precision=hp)
    attn_c = conv1x1(out_lat, params['wo_c'], params['bo_c'])

    conv = lax.conv_general_dilated(
        x_nchw, params['w_res_oihw'], (1, 1), ((1, 1), (1, 1)),
        dimension_numbers=('NCHW', 'OIHW', 'NCHW'), precision=hp)
    conv = jnp.where(conv > 0, conv, 0.2 * conv)

    g_fm, g_c, g_res = params['gammas']
    to_nchw = lambda t: jnp.transpose(t.reshape(B, H, W, C), (0, 3, 1, 2))
    return x_nchw + g_fm * to_nchw(attn_fm) + g_c * to_nchw(attn_c) + g_res * conv


if __name__ == "__main__":
    # in_dim=32, latent_dim=8 -> Cl=4; 4 images, 2 per grid step (even grid so
    # v7x's two TensorCores both get work; on v5e/v6e the extra step is noise).
    B, C, H, W = 4, 32, 8, 8
    key = jax.random.PRNGKey(0)
    kx, kp = jax.random.split(key)
    x = jax.random.normal(kx, (B, C, H, W), jnp.float32)
    params = make_params(kp, C, latent_dim=8)

    ref = jax.block_until_ready(ref_forward(x, params))

    # (1) Validation config: exact softmax reciprocal + f32 MXU operands.
    out_precise = jax.block_until_ready(
        res_attn_block(x, params, use_bf16=False, approx_recip=False))
    assert out_precise.shape == x.shape
    np.testing.assert_allclose(np.asarray(out_precise), np.asarray(ref),
                               rtol=3e-3, atol=3e-3)

    # (2) Fast config (default): bf16 MXU operands + EUP approx reciprocal.
    #     bf16 rounding of the projections/energies gives ~1e-2-level absolute
    #     deviations, so only sanity-bound it here.
    out_fast = jax.block_until_ready(res_attn_block(x, params))
    assert out_fast.shape == x.shape
    max_err = float(np.max(np.abs(np.asarray(out_fast) - np.asarray(ref))))
    assert max_err < 0.25, f"bf16 fast path diverged: max abs err {max_err}"

    print("KERNEL_OK")
</pallas_src>

<mosaic_0001>
module attributes {stable_mosaic.version = 11 : i64} {
  func.func @res_attn_kernel(%arg0: i32, %arg1: memref<128x32xf32, #tpu.memory_space<vmem>>, %arg2: memref<32x52xf32, #tpu.memory_space<vmem>>, %arg3: memref<1x52xf32, #tpu.memory_space<vmem>>, %arg4: memref<4x32xf32, #tpu.memory_space<vmem>>, %arg5: memref<1x32xf32, #tpu.memory_space<vmem>>, %arg6: memref<288x32xf32, #tpu.memory_space<vmem>>, %arg7: memref<128x9xf32, #tpu.memory_space<vmem>>, %arg8: memref<3xf32, #tpu.memory_space<smem>>, %arg9: memref<128x32xf32, #tpu.memory_space<vmem>>) attributes {dimension_semantics = [#tpu.dimension_semantics<parallel>], iteration_bounds = array<i64: 2>, scalar_prefetch = 0 : i64, scratch_operands = 0 : i64, tpu.core_type = #tpu.core_type<tc>, window_params = [{transform_indices = @transform_0, window_bounds = array<i64: 128, 32>}, {pipeline_mode = #tpu.pipeline_mode<synchronous>, transform_indices = @transform_1, window_bounds = array<i64: 32, 52>}, {pipeline_mode = #tpu.pipeline_mode<synchronous>, transform_indices = @transform_2, window_bounds = array<i64: 1, 52>}, {pipeline_mode = #tpu.pipeline_mode<synchronous>, transform_indices = @transform_3, window_bounds = array<i64: 4, 32>}, {pipeline_mode = #tpu.pipeline_mode<synchronous>, transform_indices = @transform_4, window_bounds = array<i64: 1, 32>}, {pipeline_mode = #tpu.pipeline_mode<synchronous>, transform_indices = @transform_5, window_bounds = array<i64: 288, 32>}, {pipeline_mode = #tpu.pipeline_mode<synchronous>, transform_indices = @transform_6, window_bounds = array<i64: 128, 9>}, {transform_indices = @transform_7, window_bounds = array<i64: 3>}, {transform_indices = @transform_8, window_bounds = array<i64: 128, 32>}]} {
    %c0 = arith.constant 0 : index
    %c0_0 = arith.constant 0 : index
    %0 = vector.load %arg1[%c0, %c0_0] : memref<128x32xf32, #tpu.memory_space<vmem>>, vector<128x32xf32>
    %c0_1 = arith.constant 0 : index
    %c0_2 = arith.constant 0 : index
    %1 = vector.load %arg2[%c0_1, %c0_2] : memref<32x52xf32, #tpu.memory_space<vmem>>, vector<32x52xf32>
    %cst = arith.constant dense<0.000000e+00> : vector<128x52xf32>
    %2 = tpu.matmul %0, %1, %cst {dimension_numbers = #tpu.dot_dimension_numbers<[1], [0], [0], [1], [0, 0, 1, 1], [], []>} : vector<128x32xf32>, vector<32x52xf32>, vector<128x52xf32> -> vector<128x52xf32>
    %c0_3 = arith.constant 0 : index
    %c0_4 = arith.constant 0 : index
    %3 = vector.load %arg3[%c0_3, %c0_4] : memref<1x52xf32, #tpu.memory_space<vmem>>, vector<1x52xf32>
    %4 = vector.broadcast %3 : vector<1x52xf32> to vector<128x52xf32>
    %5 = arith.addf %2, %4 : vector<128x52xf32>
    %c0_5 = arith.constant 0 : index
    %c0_6 = arith.constant 0 : index
    %6 = vector.load %arg7[%c0_5, %c0_6] : memref<128x9xf32, #tpu.memory_space<vmem>>, vector<128x9xf32>
    %c9_i32 = arith.constant 9 : i32
    %7 = tpu.dynamic_rotate %0 by %c9_i32 dim 0 : vector<128x32xf32>, i32 -> vector<128x32xf32>
    %8 = vector.extract_strided_slice %6 {offsets = [0, 0], sizes = [128, 1], strides = [1, 1]} : vector<128x9xf32> to vector<128x1xf32>
    %9 = vector.broadcast %8 : vector<128x1xf32> to vector<128x32xf32>
    %10 = arith.mulf %7, %9 : vector<128x32xf32>
    %c8_i32 = arith.constant 8 : i32
    %11 = tpu.dynamic_rotate %0 by %c8_i32 dim 0 : vector<128x32xf32>, i32 -> vector<128x32xf32>
    %12 = vector.extract_strided_slice %6 {offsets = [0, 1], sizes = [128, 1], strides = [1, 1]} : vector<128x9xf32> to vector<128x1xf32>
    %13 = vector.broadcast %12 : vector<128x1xf32> to vector<128x32xf32>
    %14 = arith.mulf %11, %13 : vector<128x32xf32>
    %c7_i32 = arith.constant 7 : i32
    %15 = tpu.dynamic_rotate %0 by %c7_i32 dim 0 : vector<128x32xf32>, i32 -> vector<128x32xf32>
    %16 = vector.extract_strided_slice %6 {offsets = [0, 2], sizes = [128, 1], strides = [1, 1]} : vector<128x9xf32> to vector<128x1xf32>
    %17 = vector.broadcast %16 : vector<128x1xf32> to vector<128x32xf32>
    %18 = arith.mulf %15, %17 : vector<128x32xf32>
    %c1_i32 = arith.constant 1 : i32
    %19 = tpu.dynamic_rotate %0 by %c1_i32 dim 0 : vector<128x32xf32>, i32 -> vector<128x32xf32>
    %20 = vector.extract_strided_slice %6 {offsets = [0, 3], sizes = [128, 1], strides = [1, 1]} : vector<128x9xf32> to vector<128x1xf32>
    %21 = vector.broadcast %20 : vector<128x1xf32> to vector<128x32xf32>
    %22 = arith.mulf %19, %21 : vector<128x32xf32>
    %c127_i32 = arith.constant 127 : i32
    %23 = tpu.dynamic_rotate %0 by %c127_i32 dim 0 : vector<128x32xf32>, i32 -> vector<128x32xf32>
    %24 = vector.extract_strided_slice %6 {offsets = [0, 5], sizes = [128, 1], strides = [1, 1]} : vector<128x9xf32> to vector<128x1xf32>
    %25 = vector.broadcast %24 : vector<128x1xf32> to vector<128x32xf32>
    %26 = arith.mulf %23, %25 : vector<128x32xf32>
    %c121_i32 = arith.constant 121 : i32
    %27 = tpu.dynamic_rotate %0 by %c121_i32 dim 0 : vector<128x32xf32>, i32 -> vector<128x32xf32>
    %28 = vector.extract_strided_slice %6 {offsets = [0, 6], sizes = [128, 1], strides = [1, 1]} : vector<128x9xf32> to vector<128x1xf32>
    %29 = vector.broadcast %28 : vector<128x1xf32> to vector<128x32xf32>
    %30 = arith.mulf %27, %29 : vector<128x32xf32>
    %c120_i32 = arith.constant 120 : i32
    %31 = tpu.dynamic_rotate %0 by %c120_i32 dim 0 : vector<128x32xf32>, i32 -> vector<128x32xf32>
    %32 = vector.extract_strided_slice %6 {offsets = [0, 7], sizes = [128, 1], strides = [1, 1]} : vector<128x9xf32> to vector<128x1xf32>
    %33 = vector.broadcast %32 : vector<128x1xf32> to vector<128x32xf32>
    %34 = arith.mulf %31, %33 : vector<128x32xf32>
    %c119_i32 = arith.constant 119 : i32
    %35 = tpu.dynamic_rotate %0 by %c119_i32 dim 0 : vector<128x32xf32>, i32 -> vector<128x32xf32>
    %36 = vector.extract_strided_slice %6 {offsets = [0, 8], sizes = [128, 1], strides = [1, 1]} : vector<128x9xf32> to vector<128x1xf32>
    %37 = vector.broadcast %36 : vector<128x1xf32> to vector<128x32xf32>
    %38 = arith.mulf %35, %37 : vector<128x32xf32>
    %39 = tpu.concatenate %10, %14, %18, %22, %0, %26, %30, %34, %38 in 1 : vector<128x32xf32>, vector<128x32xf32>, vector<128x32xf32>, vector<128x32xf32>, vector<128x32xf32>, vector<128x32xf32>, vector<128x32xf32>, vector<128x32xf32>, vector<128x32xf32> -> vector<128x288xf32>
    %c0_7 = arith.constant 0 : index
    %c0_8 = arith.constant 0 : index
    %40 = vector.load %arg6[%c0_7, %c0_8] : memref<288x32xf32, #tpu.memory_space<vmem>>, vector<288x32xf32>
    %cst_9 = arith.constant dense<0.000000e+00> : vector<128x32xf32>
    %41 = tpu.matmul %39, %40, %cst_9 {dimension_numbers = #tpu.dot_dimension_numbers<[1], [0], [0], [1], [0, 0, 1, 1], [], []>} : vector<128x288xf32>, vector<288x32xf32>, vector<128x32xf32> -> vector<128x32xf32>
    %cst_10 = arith.constant 0.000000e+00 : f32
    %42 = vector.broadcast %cst_10 : f32 to vector<128x32xf32>
    %43 = arith.cmpf ogt, %41, %42 : vector<128x32xf32>
    %cst_11 = arith.constant 2.000000e-01 : f32
    %44 = vector.broadcast %cst_11 : f32 to vector<128x32xf32>
    %45 = arith.mulf %44, %41 : vector<128x32xf32>
    %46 = arith.select %43, %41, %45 : vector<128x32xi1>, vector<128x32xf32>
    %47 = vector.shape_cast %5 : vector<128x52xf32> to vector<2x64x52xf32>
    %48 = vector.extract_strided_slice %47 {offsets = [0, 0, 0], sizes = [2, 64, 32], strides = [1, 1, 1]} : vector<2x64x52xf32> to vector<2x64x32xf32>
    %49 = vector.extract_strided_slice %47 {offsets = [0, 0, 32], sizes = [2, 64, 4], strides = [1, 1, 1]} : vector<2x64x52xf32> to vector<2x64x4xf32>
    %50 = vector.extract_strided_slice %47 {offsets = [0, 0, 36], sizes = [2, 64, 4], strides = [1, 1, 1]} : vector<2x64x52xf32> to vector<2x64x4xf32>
    "tpu.trace_start"() <{level = 10 : i32, message = "bqc,bkc->bqk"}> : () -> ()
    %cst_12 = arith.constant dense<0.000000e+00> : vector<2x64x64xf32>
    %51 = tpu.matmul %49, %50, %cst_12 {dimension_numbers = #tpu.dot_dimension_numbers<[2], [2], [1], [1], [0, 0, 0, 1, 1, 1], [0], [0]>} : vector<2x64x4xf32>, vector<2x64x4xf32>, vector<2x64x64xf32> -> vector<2x64x64xf32>
    "tpu.trace_stop"() : () -> ()
    %cst_13 = arith.constant dense<0xFF800000> : vector<2x64xf32>
    %52 = vector.multi_reduction <maximumf>, %51, %cst_13 [2] : vector<2x64x64xf32> to vector<2x64xf32>
    %53 = vector.shape_cast %52 : vector<2x64xf32> to vector<2x64x1xf32>
    %54 = vector.broadcast %53 : vector<2x64x1xf32> to vector<2x64x64xf32>
    %55 = arith.subf %51, %54 : vector<2x64x64xf32>
    %56 = math.exp %55 : vector<2x64x64xf32>
    %cst_14 = arith.constant dense<0.000000e+00> : vector<2x64xf32>
    %57 = vector.multi_reduction <add>, %56, %cst_14 [2] : vector<2x64x64xf32> to vector<2x64xf32>
    %58 = vector.shape_cast %57 : vector<2x64xf32> to vector<2x64x1xf32>
    %59 = vector.broadcast %58 : vector<2x64x1xf32> to vector<2x64x64xf32>
    %60 = arith.divf %56, %59 : vector<2x64x64xf32>
    "tpu.trace_start"() <{level = 10 : i32, message = "bqk,bkc->bqc"}> : () -> ()
    %cst_15 = arith.constant dense<0.000000e+00> : vector<2x64x32xf32>
    %61 = tpu.matmul %60, %48, %cst_15 {dimension_numbers = #tpu.dot_dimension_numbers<[2], [1], [1], [2], [0, 0, 0, 1, 1, 2], [0], [0]>} : vector<2x64x64xf32>, vector<2x64x32xf32>, vector<2x64x32xf32> -> vector<2x64x32xf32>
    "tpu.trace_stop"() : () -> ()
    %62 = vector.shape_cast %61 : vector<2x64x32xf32> to vector<128x32xf32>
    %c0_16 = arith.constant 0 : index
    %c0_17 = arith.constant 0 : index
    %63 = vector.load %arg4[%c0_16, %c0_17] : memref<4x32xf32, #tpu.memory_space<vmem>>, vector<4x32xf32>
    %64 = vector.extract_strided_slice %47 {offsets = [0, 0, 40], sizes = [1, 64, 4], strides = [1, 1, 1]} : vector<2x64x52xf32> to vector<1x64x4xf32>
    %65 = vector.shape_cast %64 : vector<1x64x4xf32> to vector<64x4xf32>
    %66 = vector.extract_strided_slice %47 {offsets = [0, 0, 44], sizes = [1, 64, 4], strides = [1, 1, 1]} : vector<2x64x52xf32> to vector<1x64x4xf32>
    %67 = vector.shape_cast %66 : vector<1x64x4xf32> to vector<64x4xf32>
    %68 = vector.extract_strided_slice %47 {offsets = [0, 0, 48], sizes = [1, 64, 4], strides = [1, 1, 1]} : vector<2x64x52xf32> to vector<1x64x4xf32>
    %69 = vector.shape_cast %68 : vector<1x64x4xf32> to vector<64x4xf32>
    %cst_18 = arith.constant dense<0.000000e+00> : vector<4x4xf32>
    %70 = tpu.matmul %67, %65, %cst_18 {dimension_numbers = #tpu.dot_dimension_numbers<[0], [0], [1], [1], [0, 1, 1, 1], [], []>} : vector<64x4xf32>, vector<64x4xf32>, vector<4x4xf32> -> vector<4x4xf32>
    %cst_19 = arith.constant dense<0xFF800000> : vector<4xf32>
    %71 = vector.multi_reduction <maximumf>, %70, %cst_19 [1] : vector<4x4xf32> to vector<4xf32>
    %72 = vector.shape_cast %71 : vector<4xf32> to vector<4x1xf32>
    %73 = vector.broadcast %72 : vector<4x1xf32> to vector<4x4xf32>
    %74 = arith.subf %70, %73 : vector<4x4xf32>
    %75 = math.exp %74 : vector<4x4xf32>
    %cst_20 = arith.constant dense<0.000000e+00> : vector<4xf32>
    %76 = vector.multi_reduction <add>, %75, %cst_20 [1] : vector<4x4xf32> to vector<4xf32>
    %77 = vector.shape_cast %76 : vector<4xf32> to vector<4x1xf32>
    %78 = vector.broadcast %77 : vector<4x1xf32> to vector<4x4xf32>
    %79 = arith.divf %75, %78 : vector<4x4xf32>
    %cst_21 = arith.constant dense<0.000000e+00> : vector<4x32xf32>
    %80 = tpu.matmul %79, %63, %cst_21 {dimension_numbers = #tpu.dot_dimension_numbers<[1], [0], [0], [1], [0, 0, 1, 1], [], []>} : vector<4x4xf32>, vector<4x32xf32>, vector<4x32xf32> -> vector<4x32xf32>
    %cst_22 = arith.constant dense<0.000000e+00> : vector<64x32xf32>
    %81 = tpu.matmul %69, %80, %cst_22 {dimension_numbers = #tpu.dot_dimension_numbers<[1], [0], [0], [1], [0, 0, 1, 1], [], []>} : vector<64x4xf32>, vector<4x32xf32>, vector<64x32xf32> -> vector<64x32xf32>
    %82 = vector.extract_strided_slice %47 {offsets = [1, 0, 40], sizes = [1, 64, 4], strides = [1, 1, 1]} : vector<2x64x52xf32> to vector<1x64x4xf32>
    %83 = vector.shape_cast %82 : vector<1x64x4xf32> to vector<64x4xf32>
    %84 = vector.extract_strided_slice %47 {offsets = [1, 0, 44], sizes = [1, 64, 4], strides = [1, 1, 1]} : vector<2x64x52xf32> to vector<1x64x4xf32>
    %85 = vector.shape_cast %84 : vector<1x64x4xf32> to vector<64x4xf32>
    %86 = vector.extract_strided_slice %47 {offsets = [1, 0, 48], sizes = [1, 64, 4], strides = [1, 1, 1]} : vector<2x64x52xf32> to vector<1x64x4xf32>
    %87 = vector.shape_cast %86 : vector<1x64x4xf32> to vector<64x4xf32>
    %cst_23 = arith.constant dense<0.000000e+00> : vector<4x4xf32>
    %88 = tpu.matmul %85, %83, %cst_23 {dimension_numbers = #tpu.dot_dimension_numbers<[0], [0], [1], [1], [0, 1, 1, 1], [], []>} : vector<64x4xf32>, vector<64x4xf32>, vector<4x4xf32> -> vector<4x4xf32>
    %cst_24 = arith.constant dense<0xFF800000> : vector<4xf32>
    %89 = vector.multi_reduction <maximumf>, %88, %cst_24 [1] : vector<4x4xf32> to vector<4xf32>
    %90 = vector.shape_cast %89 : vector<4xf32> to vector<4x1xf32>
    %91 = vector.broadcast %90 : vector<4x1xf32> to vector<4x4xf32>
    %92 = arith.subf %88, %91 : vector<4x4xf32>
    %93 = math.exp %92 : vector<4x4xf32>
    %cst_25 = arith.constant dense<0.000000e+00> : vector<4xf32>
    %94 = vector.multi_reduction <add>, %93, %cst_25 [1] : vector<4x4xf32> to vector<4xf32>
    %95 = vector.shape_cast %94 : vector<4xf32> to vector<4x1xf32>
    %96 = vector.broadcast %95 : vector<4x1xf32> to vector<4x4xf32>
    %97 = arith.divf %93, %96 : vector<4x4xf32>
    %cst_26 = arith.constant dense<0.000000e+00> : vector<4x32xf32>
    %98 = tpu.matmul %97, %63, %cst_26 {dimension_numbers = #tpu.dot_dimension_numbers<[1], [0], [0], [1], [0, 0, 1, 1], [], []>} : vector<4x4xf32>, vector<4x32xf32>, vector<4x32xf32> -> vector<4x32xf32>
    %cst_27 = arith.constant dense<0.000000e+00> : vector<64x32xf32>
    %99 = tpu.matmul %87, %98, %cst_27 {dimension_numbers = #tpu.dot_dimension_numbers<[1], [0], [0], [1], [0, 0, 1, 1], [], []>} : vector<64x4xf32>, vector<4x32xf32>, vector<64x32xf32> -> vector<64x32xf32>
    %100 = tpu.concatenate %81, %99 in 0 : vector<64x32xf32>, vector<64x32xf32> -> vector<128x32xf32>
    %c0_28 = arith.constant 0 : index
    %c0_29 = arith.constant 0 : index
    %101 = vector.load %arg5[%c0_28, %c0_29] : memref<1x32xf32, #tpu.memory_space<vmem>>, vector<1x32xf32>
    %102 = vector.broadcast %101 : vector<1x32xf32> to vector<128x32xf32>
    %103 = arith.addf %100, %102 : vector<128x32xf32>
    %c0_30 = arith.constant 0 : index
    %104 = memref.load %arg8[%c0_30] : memref<3xf32, #tpu.memory_space<smem>>
    %c1 = arith.constant 1 : index
    %105 = memref.load %arg8[%c1] : memref<3xf32, #tpu.memory_space<smem>>
    %c2 = arith.constant 2 : index
    %106 = memref.load %arg8[%c2] : memref<3xf32, #tpu.memory_space<smem>>
    %107 = vector.broadcast %104 : f32 to vector<128x32xf32>
    %108 = arith.mulf %107, %62 : vector<128x32xf32>
    %109 = arith.addf %0, %108 : vector<128x32xf32>
    %110 = vector.broadcast %105 : f32 to vector<128x32xf32>
    %111 = arith.mulf %110, %103 : vector<128x32xf32>
    %112 = arith.addf %109, %111 : vector<128x32xf32>
    %113 = vector.broadcast %106 : f32 to vector<128x32xf32>
    %114 = arith.mulf %113, %46 : vector<128x32xf32>
    %115 = arith.addf %112, %114 : vector<128x32xf32>
    %c0_31 = arith.constant 0 : index
    %c0_32 = arith.constant 0 : index
    %116 = vector.load %arg9[%c0_31, %c0_32] : memref<128x32xf32, #tpu.memory_space<vmem>>, vector<128x32xf32>
    tpu.vector_store %arg9[%c0_31, %c0_32], %115 {strides = array<i32>} : memref<128x32xf32, #tpu.memory_space<vmem>>, vector<128x32xf32>,
    return
  }
  func.func @transform_0(%arg0: i32) -> (i32, i32) {
    %c0_i32 = arith.constant 0 : i32
    %c0_i32_0 = arith.constant 0 : i32
    return %arg0, %c0_i32 : i32, i32
  }
  func.func @transform_1(%arg0: i32) -> (i32, i32) {
    %c0_i32 = arith.constant 0 : i32
    %c0_i32_0 = arith.constant 0 : i32
    %c0_i32_1 = arith.constant 0 : i32
    return %c0_i32, %c0_i32_0 : i32, i32
  }
  func.func @transform_2(%arg0: i32) -> (i32, i32) {
    %c0_i32 = arith.constant 0 : i32
    %c0_i32_0 = arith.constant 0 : i32
    %c0_i32_1 = arith.constant 0 : i32
    return %c0_i32, %c0_i32_0 : i32, i32
  }
  func.func @transform_3(%arg0: i32) -> (i32, i32) {
    %c0_i32 = arith.constant 0 : i32
    %c0_i32_0 = arith.constant 0 : i32
    %c0_i32_1 = arith.constant 0 : i32
    return %c0_i32, %c0_i32_0 : i32, i32
  }
  func.func @transform_4(%arg0: i32) -> (i32, i32) {
    %c0_i32 = arith.constant 0 : i32
    %c0_i32_0 = arith.constant 0 : i32
    %c0_i32_1 = arith.constant 0 : i32
    return %c0_i32, %c0_i32_0 : i32, i32
  }
  func.func @transform_5(%arg0: i32) -> (i32, i32) {
    %c0_i32 = arith.constant 0 : i32
    %c0_i32_0 = arith.constant 0 : i32
    %c0_i32_1 = arith.constant 0 : i32
    return %c0_i32, %c0_i32_0 : i32, i32
  }
  func.func @transform_6(%arg0: i32) -> (i32, i32) {
    %c0_i32 = arith.constant 0 : i32
    %c0_i32_0 = arith.constant 0 : i32
    %c0_i32_1 = arith.constant 0 : i32
    return %c0_i32, %c0_i32_0 : i32, i32
  }
  func.func @transform_7(%arg0: i32) -> i32 {
    %c0_i32 = arith.constant 0 : i32
    %c0_i32_0 = arith.constant 0 : i32
    return %c0_i32 : i32
  }
  func.func @transform_8(%arg0: i32) -> (i32, i32) {
    %c0_i32 = arith.constant 0 : i32
    %c0_i32_0 = arith.constant 0 : i32
    return %arg0, %c0_i32 : i32, i32
  }
}

</mosaic_0001>

<bundles_post_ra>
// kernel: tpu_custom_call.1
= control target key start
LH: loop header
LB: loop body
LE: loop exit
PB: predicated region body
PF: predicated region fallthrough
CT: control target
= control target key end

     0   :  { %13 = vsyncpa [#allocation3], 0  ;;  %s5337_s27 = smov 0   ;;  %s7580_s0 = inlined_call_operand.vmem [shape: f32[256,32], index: 0, kind: input, shape index: {}]   ;;  %s7581_s1 = inlined_call_operand.vmem [shape: f32[32,52], index: 1, kind: input, shape index: {}]   ;;  %s7582_s2 = inlined_call_operand.vmem [shape: f32[1,52], index: 2, kind: input, shape index: {}]   ;;  %s7583_s3 = inlined_call_operand.vmem [shape: f32[4,32], index: 3, kind: input, shape index: {}]   ;;  %s7584_s4 = inlined_call_operand.vmem [shape: f32[1,32], index: 4, kind: input, shape index: {}]   ;;  %s7585_s5 = inlined_call_operand.vmem [shape: f32[288,32], index: 5, kind: input, shape index: {}]   ;;  %s7586_s6 = inlined_call_operand.vmem [shape: f32[128,9], index: 6, kind: input, shape index: {}]   ;;  %s7587_s7 = inlined_call_operand.vmem [shape: f32[3], index: 7, kind: input, shape index: {}]   ;;  %s7588_s8 = inlined_call_operand.vmem [shape: f32[256,32], index: 8, kind: output, shape index: {}]  }
   0x1 LB: > { %s3946_s28 = sadd.s32 4294967295, %s5271_s27   ;;  %p3948_p0 = scmp.ge.s32.totalorder %s5271_s27, 1  ;;  %s5271_s27 = sphi %s5337_s27, %s19_s27  }
   0x2   : > { %p223_p1 = scmp.lt.s32.totalorder %s5271_s27, 3  ;;  %s254_s9 = sshll.u32 %s7587_s7, 4  ;;  %s255_s9 = int_to_ptr.vmem [resolvable:$true] %s254_s9 }
   0x3   : > { %p5352_p3 = scmp.eq.s32.totalorder %s3946_s28, 0  ;;  %s5246_s12 = scalar_lea.vmem %s255_s9, 16 }
   0x4   : > { %p5348_p2 = pnand %p3948_p0, %p223_p1  ;;  %p5247_p6 = scmp.ne.s32.totalorder %s255_s9, %s5246_s12 }
   0x5   : > { %p5254_p10 = scmp.lt.s32.totalorder %s255_s9, %s255_s9  ;;  %p5255_p11 = scmp.lt.s32.totalorder %s5246_s12, %s5246_s12 }
   0x6   : > { %p4699_p4 = pneg %p5348_p2 }
   0x7   : > { %p5256_p12 = por %p5255_p11, %p5254_p10 }
   0x8   : > { %p4700_p5 = pnand %p5352_p3, %p4699_p4 }
   0xa   : > { %p5248_p7 = pneg %p4700_p5 }
   0xc   : > { %p5249_p8 = pnand %p5248_p7, %p5247_p6 }
   0xe   : > { %p5250_p9 = pneg %p5249_p8 }
  0x10   : > { %p5257_p13 = pnand %p5256_p12, %p5250_p9 }
  0x12   : > { %5260 = shalt.err (!%p5257_p13)
}
  0x13   : > { %s5273_s13 = smov [#allocation2]   ;;  %276 = sbr.rel (%p5348_p2) target bundleno = 2519 (0x9d7), region = 52 }
  0x14   : > { %4702 = dma.vmem_to_smem (!%p4700_p5), %s255_s9, 16, %s5273_s13, [#allocation3]  }
  0x1a   : > { %5266 = dma.done.wait (%p5352_p3), [#allocation3], 16  }
  0x1b   : > { %5268 = vsyncadd (%p5352_p3), [#allocation3], 4294967280 }
  0x1c   : > { %282 = sfence }
  0x1d   : > { %v5369_v0 = vld [vmem:[%s7586_s6] sm:$0xff]  ;;  %v7593_v1 = vmov 6   ;;  %v7600_v2 = vmov 5   ;;  %s3953_s16 = sshll.u32 %s3946_s28, 4  ;;  %v340_v4 = vld [vmem:[%s7581_s1 + $0x8] sm:$0xff]  ;;  %v341_v5 = vld [vmem:[%s7581_s1 + $0x10] sm:$0xff]  ;;  %v576_v44 = vlaneseq }
  0x1e   : > { %4733 = vset.pattern.permute.xlu1 %v7593_v1  ;;  %4732 = vset.pattern.permute.xlu0 %v7600_v2  ;;  %p312_p0 = scmp.lt.s32.totalorder %s3953_s16, 31  ;;  %v339_v3 = vld [vmem:[%s7581_s1] sm:$0xff]  ;;  %v7598_v6 = vmov 2   ;;  %v7594_v7 = vmov 3   ;;  %v342_v9 = vld [vmem:[%s7581_s1 + $0x18] sm:$0xff]  ;;  %vm350_vm0 = vcmask 261120  }
  0x1f   : > { %1045 = vperm.xlu1 %4733, %v5369_v0   ;;  %965 = vperm.xlu0 %4732, %v5369_v0   ;;  %v4543_v8 = vpack.c.bf16 %v340_v4, %v339_v3  ;;  %v4547_v10 = vpack.c.bf16 %v342_v9, %v341_v5  ;;  %v5404_v11 = vld [vmem:[%s7586_s6 + $0x8] sm:$0xff]  ;;  %v7604_v13 = vmov 7   ;;  %v5417_v14 = vld [vmem:[%s7586_s6 + $0x10] sm:$0xff]  ;;  %v5430_v17 = vld [vmem:[%s7586_s6 + $0x18] sm:$0xff]  ;;  %v7596_v21 = vmov 1   ;;  %s5281_s21 = smov 96  }
  0x20   : > { %s7837_s16 = smov (!%p312_p0, %s3953_s16), 31  ;;  %v5447_v20 = vld [vmem:[%s7586_s6 + $0x20] sm:$0xff]  ;;  %v5465_v24 = vld [vmem:[%s7586_s6 + $0x28] sm:$0xff]  ;;  %v5483_v27 = vld [vmem:[%s7586_s6 + $0x30] sm:$0xff]  ;;  %v5638_v46 = vshrl.u32 %v576_v44, 7  ;;  %v7591_v51 = vmov 0  }
  0x21   : > { %s3954_s25 = sshll.u32 %s7837_s16, 3  ;;  %4544 = vmatprep.subr.bf16.mxu0 %v4543_v8  ;;  %v5501_v30 = vld [vmem:[%s7586_s6 + $0x38] sm:$0xff]  ;;  %v5515_v32 = vld [vmem:[%s7586_s6 + $0x40] sm:$0xff]  ;;  %v5524_v33 = vld [vmem:[%s7586_s6 + $0x48] sm:$0xff]  ;;  %s5282_s22 = smov 32   ;;  %vm1684_vm3 = vcmask 523264  }
  0x22   : > { %s5399_s29 = scalar_lea.vmem %s7580_s0, %s3954_s25  ;;  %4546 = vmatpush3.bf16.msra.mxu0 %v4543_v8  ;;  %v5532_v34 = vld [vmem:[%s7586_s6 + $0x50] sm:$0xff]  ;;  %v5540_v35 = vld [vmem:[%s7586_s6 + $0x58] sm:$0xff]  ;;  %v5548_v36 = vld [vmem:[%s7586_s6 + $0x60] sm:$0xff]  ;;  %vm578_vm1 = vcmp.lt.s32.totalorder %v5638_v46, 1  ;;  %vm787_vm2 = vcmp.lt.s32.totalorder %v5638_v46, 7  ;;  %s5283_s26 = smov 84  }
  0x23   : > { %4734 = vset.pattern.permute.xlu1 %v7598_v6  ;;  %4736 = vset.pattern.permute.xlu0 %v7594_v7  ;;  %v5407_v12 = vld [vmem:[%s5399_s29] sm:$0xff]  ;;  %v5420_v15 = vld [vmem:[%s5399_s29 + $0x8] sm:$0xff]  ;;  %v5423_v16 = vld [vmem:[%s5399_s29 + $0x10] sm:$0xff]  ;;  %s5284_s10 = smov 64   ;;  %s5285_s11 = smov 92   ;;  %vm1701_vm4 = vcmask 785408  }
  0x24   : > { %805 = vperm.xlu1 %4734, %v5369_v0   ;;  %885 = vperm.xlu0 %4736, %v5369_v0   ;;  %v5438_v18 = vld [vmem:[%s5399_s29 + $0x18] sm:$0xff]  ;;  %v5441_v19 = vld [vmem:[%s5399_s29 + $0x20] sm:$0xff]  ;;  %v5455_v22 = vld [vmem:[%s5399_s29 + $0x28] sm:$0xff]  ;;  %v560_v49 = vrot.slane %v5407_v12, 7  ;;  %v7590_v58 = vrot.slane %v5420_v15, 1  ;;  %v773_v59 = vrot.slane %v5423_v16, 1  ;;  %s7409_s17 = scalar_lea.vmem %s7588_s8, %s3954_s25 }
  0x25   : > { %4299 = vmatprep.mubr.msk.f32.mxu0 %vm350_vm0, %v5407_v12  ;;  %4548 = vmatprep.subr.bf16.mxu0 %v4547_v10  ;;  %v5459_v23 = vld [vmem:[%s5399_s29 + $0x30] sm:$0xff]  ;;  %v5472_v25 = vld [vmem:[%s5399_s29 + $0x38] sm:$0xff]  ;;  %v5476_v26 = vld [vmem:[%s5399_s29 + $0x40] sm:$0xff]  ;;  %v561_v4 = vrot.slane %v5420_v15, 7  ;;  %vm2228_vm5 = vcmask 31744   ;;  %vm5289_vm7 = vmmov 0  }
  0x26   : > { %4550 = vmatpush3.bf16.msra.mxu0 %v4547_v10  ;;  %v5490_v28 = vld [vmem:[%s5399_s29 + $0x48] sm:$0xff]  ;;  %v5493_v29 = vld [vmem:[%s5399_s29 + $0x50] sm:$0xff]  ;;  %v5508_v31 = vld [vmem:[%s5399_s29 + $0x58] sm:$0xff]  ;;  %v5674_v61 = vsel %vm787_vm2, %v7590_v58, %v773_v59  ;;  %vm3131_vm8 = vcmask 27648   ;;  %vm3146_vm9 = vcmask 1043456   ;;  %s5291_s9 = smov 80  }
  0x27   : > { %v5551_v37 = vld [vmem:[%s5399_s29 + $0x60] sm:$0xff]  ;;  %v5560_v38 = vld [vmem:[%s7586_s6 + $0x68] sm:$0xff]  ;;  %v5608_v40 = vld [vmem:[%s7586_s6 + $0x70] sm:$0xff]  ;;  %7675 = vst [vmem:[#allocation8_spill] sm:$0xff] %v5674_v61  ;;  %v5688_v9 = vsel %vm578_vm1, %v560_v49, %v561_v4 }
  0x28   : > { %4735 = vset.pattern.permute.xlu1 %v7604_v13  ;;  %889 = vperm.xlu0 %4736, %v5404_v11   ;;  %v5565_v39 = vld [vmem:[%s5399_s29 + $0x68] sm:$0xff]  ;;  %v5611_v41 = vld [vmem:[%s5399_s29 + $0x70] sm:$0xff]  ;;  %v5618_v42 = vld [vmem:[%s5399_s29 + $0x78] sm:$0xff] }
  0x29   : > { %1125 = vperm.xlu1 %4735, %v5369_v0   ;;  %4300 = vmatmul.mubr.msk.f32.vlgmr.msra.gmra.mrb[0].mxu0 %vm350_vm0, %v5420_v15  ;;  %7672 = vst [vmem:[#allocation5_spill] sm:$0xff] %v5565_v39  ;;  %7673 = vst [vmem:[#allocation6_spill] sm:$0xff] %v5611_v41  ;;  %v5630_v43 = vld [vmem:[%s7586_s6 + $0x78] sm:$0xff]  ;;  %v7589_v48 = vrot.slane %v5618_v42, 7 }
  0x2a   : > { %4302 = vmatprep.mubr.msk.f32.mxu0 %vm350_vm0, %v5423_v16  ;;  %vm6769_vm6 = vmpackc.low %vm2228_vm5, %vm2228_vm5 }
  0x2b   : > { %v5656_v52 = vsel %vm578_vm1, %v7589_v48, %v560_v49 }
  0x2c   : > { %893 = vperm.xlu0 %4736, %v5417_v14   ;;  %7674 = vst [vmem:[#allocation7_spill] sm:$0xff] %v5656_v52 }
  0x2d   : > { %4737 = vset.pattern.permute.xlu1 %v7600_v2  ;;  %4303 = vmatmul.mubr.msk.f32.gmra.mrb[2].mxu0 %vm350_vm0, %v5438_v18 }
  0x2e   : > { %969 = vperm.xlu1 %4737, %v5404_v11   ;;  %4305 = vmatprep.mubr.msk.f32.mxu0 %vm350_vm0, %v5441_v19 }
  0x30   : > { %897 = vperm.xlu0 %4736, %v5430_v17  }
  0x31   : > { %4306 = vmatmul.mubr.msk.f32.gmra.mrb[4].mxu0 %vm350_vm0, %v5455_v22 }
  0x32   : > { %4738 = vset.pattern.permute.xlu1 %v7596_v21  ;;  %4308 = vmatprep.mubr.msk.f32.mxu0 %vm350_vm0, %v5459_v23 }
  0x33   : > { %696 = vperm.xlu1 %4738, %v5404_v11  }
  0x34   : > { %901 = vperm.xlu0 %4736, %v5447_v20  }
  0x35   : > { %4309 = vmatmul.mubr.msk.f32.gmra.mrb[6].mxu0 %vm350_vm0, %v5472_v25 }
  0x36   : > { %4311 = vmatprep.mubr.msk.f32.mxu0 %vm350_vm0, %v5476_v26 }
  0x37   : > { %4739 = vset.pattern.permute.xlu1 %v7598_v6 }
  0x38   : > { %809 = vperm.xlu1 %4739, %v5404_v11   ;;  %905 = vperm.xlu0 %4736, %v5465_v24  }
  0x39   : > { %4312 = vmatmul.mubr.msk.f32.gmra.mrb[8].mxu0 %vm350_vm0, %v5490_v28 }
  0x3a   : > { %4314 = vmatprep.mubr.msk.f32.mxu0 %vm350_vm0, %v5493_v29 }
  0x3c   : > { %4740 = vset.pattern.permute.xlu1 %v7604_v13  ;;  %909 = vperm.xlu0 %4736, %v5483_v27  }
  0x3d   : > { %1129 = vperm.xlu1 %4740, %v5404_v11   ;;  %4315 = vmatmul.mubr.msk.f32.gmra.mrb[10].mxu0 %vm350_vm0, %v5508_v31 }
  0x3e   : > { %4317 = vmatprep.mubr.msk.f32.mxu0 %vm350_vm0, %v5551_v37 }
  0x40   : > { %913 = vperm.xlu0 %4736, %v5501_v30  }
  0x41   : > { %4741 = vset.pattern.permute.xlu1 %v7600_v2  ;;  %4318 = vmatmul.mubr.msk.f32.gmra.mrb[12].mxu0 %vm350_vm0, %v5565_v39  ;;  %v7695_v39 = vmov 7  }
  0x42   : > { %973 = vperm.xlu1 %4741, %v5417_v14   ;;  %4320 = vmatprep.mubr.msk.f32.mxu0 %vm350_vm0, %v5611_v41 }
  0x44   : > { %917 = vperm.xlu0 %4736, %v5515_v32  }
  0x45   : > { %4321 = vmatmul.mubr.msk.f32.gmra.mrb[14].mxu0 %vm350_vm0, %v5618_v42 }
  0x46   : > { %4742 = vset.pattern.permute.xlu1 %v7596_v21 }
  0x47   : > { %700 = vperm.xlu1 %4742, %v5417_v14  }
  0x48   : > { %921 = vperm.xlu0 %4736, %v5524_v33  }
  0x4b   : > { %4743 = vset.pattern.permute.xlu1 %v7598_v6 }
  0x4c   : > { %813 = vperm.xlu1 %4743, %v5417_v14   ;;  %925 = vperm.xlu0 %4736, %v5532_v34  }
  0x50   : > { %4744 = vset.pattern.permute.xlu1 %v7604_v13  ;;  %929 = vperm.xlu0 %4736, %v5540_v35  }
  0x51   : > { %1133 = vperm.xlu1 %4744, %v5417_v14  }
  0x54   : > { %933 = vperm.xlu0 %4736, %v5548_v36  }
  0x55   : > { %4745 = vset.pattern.permute.xlu1 %v7600_v2 }
  0x56   : > { %977 = vperm.xlu1 %4745, %v5430_v17  }
  0x58   : > { %937 = vperm.xlu0 %4736, %v5560_v38  }
  0x5a   : > { %4746 = vset.pattern.permute.xlu1 %v7596_v21 }
  0x5b   : > { %704 = vperm.xlu1 %4746, %v5430_v17  }
  0x5c   : > { %4789 = vset.pattern.permute.xlu0 %v7593_v1 }
  0x5d   : > { %1049 = vperm.xlu0 %4789, %v5404_v11  }
  0x5f   : > { %4747 = vset.pattern.permute.xlu1 %v7598_v6 }
  0x60   : > { %817 = vperm.xlu1 %4747, %v5430_v17  }
  0x61   : > { %1053 = vperm.xlu0 %4789, %v5417_v14  }
  0x64   : > { %4748 = vset.pattern.permute.xlu1 %v7604_v13 }
  0x65   : > { %1137 = vperm.xlu1 %4748, %v5430_v17   ;;  %1057 = vperm.xlu0 %4789, %v5430_v17  }
  0x69   : > { %4749 = vset.pattern.permute.xlu1 %v7600_v2  ;;  %1061 = vperm.xlu0 %4789, %v5447_v20  }
  0x6a   : > { %981 = vperm.xlu1 %4749, %v5447_v20  }
  0x6d   : > { %1065 = vperm.xlu0 %4789, %v5465_v24  }
  0x6e   : > { %4750 = vset.pattern.permute.xlu1 %v7596_v21 }
  0x6f   : > { %708 = vperm.xlu1 %4750, %v5447_v20  }
  0x71   : > { %1069 = vperm.xlu0 %4789, %v5483_v27  }
  0x73   : > { %4751 = vset.pattern.permute.xlu1 %v7598_v6 }
  0x74   : > { %821 = vperm.xlu1 %4751, %v5447_v20  }
  0x75   : > { %1073 = vperm.xlu0 %4789, %v5501_v30  }
  0x78   : > { %4752 = vset.pattern.permute.xlu1 %v7604_v13 }
  0x79   : > { %1141 = vperm.xlu1 %4752, %v5447_v20   ;;  %1077 = vperm.xlu0 %4789, %v5515_v32  }
  0x7d   : > { %4753 = vset.pattern.permute.xlu1 %v7600_v2  ;;  %1081 = vperm.xlu0 %4789, %v5524_v33  }
  0x7e   : > { %985 = vperm.xlu1 %4753, %v5465_v24  }
  0x81   : > { %1085 = vperm.xlu0 %4789, %v5532_v34  }
  0x82   : > { %4754 = vset.pattern.permute.xlu1 %v7596_v21 }
  0x83   : > { %712 = vperm.xlu1 %4754, %v5465_v24  }
  0x85   : > { %1089 = vperm.xlu0 %4789, %v5540_v35  }
  0x87   : > { %4755 = vset.pattern.permute.xlu1 %v7598_v6 }
  0x88   : > { %825 = vperm.xlu1 %4755, %v5465_v24  }
  0x89   : > { %1093 = vperm.xlu0 %4789, %v5548_v36  }
  0x8c   : > { %4756 = vset.pattern.permute.xlu1 %v7604_v13 }
  0x8d   : > { %1145 = vperm.xlu1 %4756, %v5465_v24   ;;  %1097 = vperm.xlu0 %4789, %v5560_v38  }
  0x91   : > { %4757 = vset.pattern.permute.xlu1 %v7600_v2  ;;  %1101 = vperm.xlu0 %4789, %v5608_v40  }
  0x92   : > { %989 = vperm.xlu1 %4757, %v5483_v27  }
  0x95   : > { %4792 = vset.pattern.permute.xlu0 %v7596_v21 }
  0x96   : > { %4758 = vset.pattern.permute.xlu1 %v7596_v21  ;;  %692 = vperm.xlu0 %4792, %v5369_v0  }
  0x97   : > { %716 = vperm.xlu1 %4758, %v5483_v27  }
  0x9a   : > { %752 = vperm.xlu0 %4792, %v5630_v43  }
  0x9b   : > { %4759 = vset.pattern.permute.xlu1 %v7598_v6 }
  0x9c   : > { %829 = vperm.xlu1 %4759, %v5483_v27  }
  0x9e   : > { %v5635_v45 = vpop.permute.xlu1 %1045  ;;  %4799 = vset.pattern.permute.xlu0 %v7604_v13  ;;  %v5642_v47 = vpop.permute.xlu0 %965 }
  0x9f   : > { %1185 = vperm.xlu0 %4799, %v5630_v43  }
  0xa0   : > { %4760 = vset.pattern.permute.xlu1 %v7604_v13 }
  0xa1   : > { %1149 = vperm.xlu1 %4760, %v5483_v27  }
  0xa3   : > { %v5648_v50 = vpop.permute.xlu1 %805  ;;  %4800 = vset.pattern.permute.xlu0 %v7591_v51  ;;  %v886_v53 = vpop.permute.xlu0 %885 }
  0xa4   : > { %597 = vperm.xlu0 %4800, %v5369_v0   ;;  %v948_v54 = vmul.f32 %v886_v53, %v5656_v52 }
  0xa5   : > { %4761 = vset.pattern.permute.xlu1 %v7600_v2 }
  0xa6   : > { %993 = vperm.xlu1 %4761, %v5501_v30  }
  0xa7   : > { %v890_v8 = vpop.permute.xlu0 %889 }
  0xa8   : > { %v1126_v55 = vpop.permute.xlu1 %1125  ;;  %607 = vperm.xlu0 %4800, %v5417_v14   ;;  %v949_v10 = vmul.f32 %v890_v8, %v5688_v9 }
  0xa9   : > { %v1188_v56 = vmul.f32 %v1126_v55, %v5420_v15 }
  0xaa   : > { %4762 = vset.pattern.permute.xlu1 %v7596_v21 }
  0xab   : > { %v4813_v57 = vpack.i.bf16 %v948_v54, %v1188_v56  ;;  %720 = vperm.xlu1 %4762, %v5501_v30   ;;  %v894_v44 = vpop.permute.xlu0 %893  ;;  %v774_v54 = vrot.slane %v5438_v18, 1 }
  0xad   : > { %v970_v60 = vpop.permute.xlu1 %969  ;;  %4814 = vrot.lane.b32.xlu0 %v4813_v57, %s5281_s21  ;;  %v5700_v56 = vsel %vm787_vm2, %v773_v59, %v774_v54 }
  0xae   : > { %v1029_v63 = vmul.f32 %v970_v60, %v5674_v61  ;;  %7676 = vst [vmem:[#allocation9_spill] sm:$0xff] %v5700_v56 }
  0xaf   : > { %4763 = vset.pattern.permute.xlu1 %v7598_v6  ;;  %v898_v49 = vpop.permute.xlu0 %897 }
  0xb0   : > { %833 = vperm.xlu1 %4763, %v5501_v30  }
  0xb2   : > { %v697_v62 = vpop.permute.xlu1 %696 }
  0xb3   : > { %v756_v0 = vmul.f32 %v697_v62, %v5407_v12 }
  0xb4   : > { %4764 = vset.pattern.permute.xlu1 %v7604_v13 }
  0xb5   : > { %v4819_v3 = vpack.i.bf16 %v756_v0, %v1029_v63  ;;  %1153 = vperm.xlu1 %4764, %v5501_v30   ;;  %v562_v63 = vrot.slane %v5423_v16, 7 }
  0xb7   : > { %v5682_v5 = vpop.permute.xlu1 %809  ;;  %4820 = vrot.lane.b32.xlu0 %v4819_v3, %s5282_s22  ;;  %v902_v3 = vpop.permute.xlu0 %901  ;;  %v5713_v59 = vsel %vm578_vm1, %v561_v4, %v562_v63 }
  0xb9   : > { %4765 = vset.pattern.permute.xlu1 %v7600_v2 }
  0xba   : > { %997 = vperm.xlu1 %4765, %v5515_v32  }
  0xbc   : > { %v1130_v14 = vpop.permute.xlu1 %1129 }
  0xbd   : > { %v1189_v30 = vmul.f32 %v1130_v14, %v5423_v16  ;;  %v5718_v14 = vpop.permute.xlu0 %905 }
  0xbe   : > { %4766 = vset.pattern.permute.xlu1 %v7596_v21 }
  0xbf   : > { %v4829_v53 = vpack.i.bf16 %v949_v10, %v1189_v30  ;;  %724 = vperm.xlu1 %4766, %v5515_v32   ;;  %v950_v10 = vmul.f32 %v894_v44, %v5713_v59 }
  0xc1   : > { %v974_v55 = vpop.permute.xlu1 %973  ;;  %4830 = vrot.lane.b32.xlu0 %v4829_v53, %s5281_s21 }
  0xc2   : > { %v1030_v60 = vmul.f32 %v974_v55, %v5700_v56  ;;  %v775_v55 = vrot.slane %v5441_v19, 1 }
  0xc3   : > { %4767 = vset.pattern.permute.xlu1 %v7598_v6 }
  0xc4   : > { %837 = vperm.xlu1 %4767, %v5515_v32   ;;  %v5730_v44 = vsel %vm787_vm2, %v774_v54, %v775_v55 }
  0xc5   : > { %7677 = vst [vmem:[#allocation10_spill] sm:$0xff] %v5730_v44 }
  0xc6   : > { %v701_v57 = vpop.permute.xlu1 %700 }
  0xc7   : > { %v757_v62 = vmul.f32 %v701_v57, %v5420_v15  ;;  %v5725_v57 = vpop.permute.xlu0 %909 }
  0xc8   : > { %4768 = vset.pattern.permute.xlu1 %v7604_v13 }
  0xc9   : > { %v4834_v0 = vpack.i.bf16 %v757_v62, %v1030_v60  ;;  %1157 = vperm.xlu1 %4768, %v5515_v32  }
  0xcb   : > { %v5708_v8 = vpop.permute.xlu1 %813  ;;  %4835 = vrot.lane.b32.xlu0 %v4834_v0, %s5282_s22 }
  0xcd   : > { %4769 = vset.pattern.permute.xlu1 %v7600_v2 }
  0xce   : > { %1001 = vperm.xlu1 %4769, %v5524_v33  }
  0xd0   : > { %v1134_v30 = vpop.permute.xlu1 %1133 }
  0xd1   : > { %v1190_v32 = vmul.f32 %v1134_v30, %v5438_v18 }
  0xd2   : > { %4770 = vset.pattern.permute.xlu1 %v7596_v21 }
  0xd3   : > { %v4844_v53 = vpack.i.bf16 %v950_v10, %v1190_v32  ;;  %728 = vperm.xlu1 %4770, %v5524_v33   ;;  %v5735_v10 = vpop.permute.xlu0 %913  ;;  %v563_v32 = vrot.slane %v5438_v18, 7 }
  0xd5   : > { %v978_v4 = vpop.permute.xlu1 %977  ;;  %4845 = vrot.lane.b32.xlu0 %v4844_v53, %s5281_s21  ;;  %v5746_v54 = vsel %vm578_vm1, %v562_v63, %v563_v32 }
  0xd6   : > { %v1031_v62 = vmul.f32 %v978_v4, %v5730_v44  ;;  %v951_v4 = vmul.f32 %v898_v49, %v5746_v54 }
  0xd7   : > { %4771 = vset.pattern.permute.xlu1 %v7598_v6 }
  0xd8   : > { %841 = vperm.xlu1 %4771, %v5524_v33  }
  0xda   : > { %v705_v60 = vpop.permute.xlu1 %704 }
  0xdb   : > { %v758_v0 = vmul.f32 %v705_v60, %v5423_v16  ;;  %v5748_v16 = vpop.permute.xlu0 %917 }
  0xdc   : > { %4772 = vset.pattern.permute.xlu1 %v7604_v13 }
  0xdd   : > { %v4849_v30 = vpack.i.bf16 %v758_v0, %v1031_v62  ;;  %1161 = vperm.xlu1 %4772, %v5524_v33  }
  0xdf   : > { %v5740_v53 = vpop.permute.xlu1 %817  ;;  %4850 = vrot.lane.b32.xlu0 %v4849_v30, %s5282_s22  ;;  %v5755_v0 = vpop.permute.xlu0 %921  ;;  %v776_v30 = vrot.slane %v5455_v22, 1 }
  0xe0   : > { %7678 = vst [vmem:[#allocation11_spill] sm:$0xff] %v5755_v0 }
  0xe1   : > { %4773 = vset.pattern.permute.xlu1 %v7600_v2  ;;  %v5762_v49 = vsel %vm787_vm2, %v775_v55, %v776_v30  ;;  %v564_v55 = vrot.slane %v5441_v19, 7 }
  0xe2   : > { %1005 = vperm.xlu1 %4773, %v5532_v34   ;;  %7679 = vst [vmem:[#allocation12_spill] sm:$0xff] %v5762_v49 }
  0xe4   : > { %v1138_v60 = vpop.permute.xlu1 %1137 }
  0xe5   : > { %v1191_v33 = vmul.f32 %v1138_v60, %v5441_v19  ;;  %v5765_v60 = vpop.permute.xlu0 %925 }
  0xe6   : > { %4774 = vset.pattern.permute.xlu1 %v7596_v21  ;;  %7680 = vst [vmem:[#allocation13_spill] sm:$0xff] %v5765_v60 }
  0xe7   : > { %v4859_v62 = vpack.i.bf16 %v951_v4, %v1191_v33  ;;  %732 = vperm.xlu1 %4774, %v5532_v34  }
  0xe9   : > { %v982_v63 = vpop.permute.xlu1 %981  ;;  %4860 = vrot.lane.b32.xlu0 %v4859_v62, %s5281_s21  ;;  %v5775_v51 = vpop.permute.xlu0 %929 }
  0xea   : > { %v1032_v33 = vmul.f32 %v982_v63, %v5762_v49 }
  0xeb   : > { %4775 = vset.pattern.permute.xlu1 %v7598_v6 }
  0xec   : > { %845 = vperm.xlu1 %4775, %v5532_v34  }
  0xee   : > { %v709_v4 = vpop.permute.xlu1 %708 }
  0xef   : > { %v759_v48 = vmul.f32 %v709_v4, %v5438_v18  ;;  %v5781_v18 = vsel %vm578_vm1, %v563_v32, %v564_v55  ;;  %v5785_v4 = vpop.permute.xlu0 %933 }
  0xf0   : > { %4776 = vset.pattern.permute.xlu1 %v7604_v13  ;;  %7681 = vst [vmem:[#allocation14_spill] sm:$0xff] %v5785_v4 }
  0xf1   : > { %v4864_v58 = vpack.i.bf16 %v759_v48, %v1032_v33  ;;  %1165 = vperm.xlu1 %4776, %v5532_v34   ;;  %v952_v48 = vmul.f32 %v902_v3, %v5781_v18  ;;  %v777_v33 = vrot.slane %v5459_v23, 1 }
  0xf3   : > { %v5771_v62 = vpop.permute.xlu1 %821  ;;  %4865 = vrot.lane.b32.xlu0 %v4864_v58, %s5282_s22  ;;  %v5792_v32 = vpop.permute.xlu0 %937  ;;  %v5796_v3 = vsel %vm787_vm2, %v776_v30, %v777_v33 }
  0xf4   : > { %7682 = vst [vmem:[#allocation15_spill] sm:$0xff] %v5792_v32  ;;  %7683 = vst [vmem:[#allocation16_spill] sm:$0xff] %v5796_v3 }
  0xf5   : > { %4777 = vset.pattern.permute.xlu1 %v7600_v2  ;;  %v565_v2 = vrot.slane %v5455_v22, 7 }
  0xf6   : > { %1009 = vperm.xlu1 %4777, %v5540_v35  }
  0xf7   : > { %v5812_v52 = vpop.permute.xlu0 %1049 }
  0xf8   : > { %v1142_v63 = vpop.permute.xlu1 %1141 }
  0xf9   : > { %v1192_v34 = vmul.f32 %v1142_v63, %v5455_v22 }
  0xfa   : > { %4778 = vset.pattern.permute.xlu1 %v7596_v21 }
  0xfb   : > { %v4874_v58 = vpack.i.bf16 %v952_v48, %v1192_v34  ;;  %736 = vperm.xlu1 %4778, %v5540_v35  }
  0xfc   : > { %v5799_v63 = vpop.f32.mrb[0].mxu0 }
  0xfd   : > { %v986_v1 = vpop.permute.xlu1 %985  ;;  %4875 = vrot.lane.b32.xlu0 %v4874_v58, %s5281_s21  ;;  %v5801_v48 = vpop.f32.mrb[1].mxu0 }
  0xfe   : > { %v1033_v7 = vmul.f32 %v986_v1, %v5796_v3 }
  0xff   : > { %4779 = vset.pattern.permute.xlu1 %v7598_v6 }
 0x100   : > { %849 = vperm.xlu1 %4779, %v5540_v35   ;;  %v5806_v58 = vpop.f32.mrb[2].mxu0 }
 0x101   : > { %v5809_v30 = vpop.f32.mrb[3].mxu0 }
 0x102   : > { %v713_v34 = vpop.permute.xlu1 %712 }
 0x103   : > { %v760_v21 = vmul.f32 %v713_v34, %v5441_v19  ;;  %v7686_v19 = vmov 5  }
 0x104   : > { %4780 = vset.pattern.permute.xlu1 %v7604_v13  ;;  %v5817_v1 = vpop.f32.mrb[4].mxu0 }
 0x105   : > { %v4879_v6 = vpack.i.bf16 %v760_v21, %v1033_v7  ;;  %1169 = vperm.xlu1 %4780, %v5540_v35   ;;  %7685 = vst [vmem:[#allocation18_spill] sm:$0xff] %v5817_v1  ;;  %v5820_v34 = vpop.f32.mrb[5].mxu0  ;;  %v5824_v7 = vsel %vm578_vm1, %v564_v55, %v565_v2  ;;  %v5827_v21 = vpop.permute.xlu0 %1053  ;;  %v7689_v1 = vmov 1   ;;  %v778_v55 = vrot.slane %v5472_v25, 1 }
 0x106   : > { %7687 = vst [vmem:[#allocation19_spill] sm:$0xff] %v5820_v34  ;;  %v953_v13 = vmul.f32 %v5718_v14, %v5824_v7 }
 0x107   : > { %v5814_v32 = vpop.permute.xlu1 %825  ;;  %4880 = vrot.lane.b32.xlu0 %v4879_v6, %s5282_s22 }
 0x108   : > { %7684 = vst [vmem:[#allocation17_spill] sm:$0xff] %v5814_v32  ;;  %v5832_v60 = vpop.f32.mrb[6].mxu0 }
 0x109   : > { %4781 = vset.pattern.permute.xlu1 %v7686_v19  ;;  %7688 = vst [vmem:[#allocation20_spill] sm:$0xff] %v5832_v60  ;;  %v5835_v0 = vpop.f32.mrb[7].mxu0  ;;  %v5844_v14 = vpop.permute.xlu0 %1057  ;;  %v5849_v60 = vsel %vm787_vm2, %v777_v33, %v778_v55  ;;  %v566_v33 = vrot.slane %v5459_v23, 7 }
 0x10a   : > { %1013 = vperm.xlu1 %4781, %v5548_v36   ;;  %7690 = vst [vmem:[#allocation21_spill] sm:$0xff] %v5835_v0  ;;  %7694 = vst [vmem:[#allocation24_spill] sm:$0xff] %v5849_v60 }
 0x10c   : > { %v1146_v35 = vpop.permute.xlu1 %1145  ;;  %v5839_v41 = vpop.f32.mrb[8].mxu0 }
 0x10d   : > { %v1193_v6 = vmul.f32 %v1146_v35, %v5459_v23  ;;  %7691 = vst [vmem:[#allocation22_spill] sm:$0xff] %v5839_v41  ;;  %v5842_v3 = vpop.f32.mrb[9].mxu0  ;;  %v7693_v35 = vmov 2  }
 0x10e   : > { %4782 = vset.pattern.permute.xlu1 %v7689_v1  ;;  %7692 = vst [vmem:[#allocation23_spill] sm:$0xff] %v5842_v3  ;;  %v5858_v3 = vpop.permute.xlu0 %1061 }
 0x10f   : > { %v4889_v34 = vpack.i.bf16 %v953_v13, %v1193_v6  ;;  %740 = vperm.xlu1 %4782, %v5548_v36  }
 0x110   : > { %v5852_v13 = vpop.f32.mrb[10].mxu0 }
 0x111   : > { %v990_v4 = vpop.permute.xlu1 %989  ;;  %4890 = vrot.lane.b32.xlu0 %v4889_v34, %s5281_s21  ;;  %v5854_v6 = vpop.f32.mrb[11].mxu0 }
 0x112   : > { %v1034_v41 = vmul.f32 %v990_v4, %v5849_v60  ;;  %v5869_v4 = vsel %vm578_vm1, %v565_v2, %v566_v33  ;;  %v779_v2 = vrot.slane %v5476_v26, 1 }
 0x113   : > { %4783 = vset.pattern.permute.xlu1 %v7693_v35 }
 0x114   : > { %853 = vperm.xlu1 %4783, %v5548_v36  }
 0x116   : > { %v717_v0 = vpop.permute.xlu1 %716 }
 0x117   : > { %v761_v34 = vmul.f32 %v717_v0, %v5455_v22  ;;  %v5871_v22 = vpop.permute.xlu0 %1065 }
 0x118   : > { %4784 = vset.pattern.permute.xlu1 %v7695_v39  ;;  %7697 = vst [vmem:[#allocation26_spill] sm:$0xff] %v5871_v22 }
 0x119   : > { %v4894_v32 = vpack.i.bf16 %v761_v34, %v1034_v41  ;;  %1173 = vperm.xlu1 %4784, %v5548_v36   ;;  %v954_v36 = vmul.f32 %v5725_v57, %v5869_v4 }
 0x11b   : > { %v5863_v49 = vpop.permute.xlu1 %829  ;;  %4895 = vrot.lane.b32.xlu0 %v4894_v32, %s5282_s22  ;;  %v5879_v32 = vpop.permute.xlu0 %1069 }
 0x11c   : > { %7696 = vst [vmem:[#allocation25_spill] sm:$0xff] %v5863_v49  ;;  %7698 = vst [vmem:[#allocation27_spill] sm:$0xff] %v5879_v32  ;;  %v5886_v49 = vsel %vm787_vm2, %v778_v55, %v779_v2 }
 0x11d   : > { %4785 = vset.pattern.permute.xlu1 %v7686_v19  ;;  %7699 = vst [vmem:[#allocation28_spill] sm:$0xff] %v5886_v49 }
 0x11e   : > { %1017 = vperm.xlu1 %4785, %v5560_v38  }
 0x11f   : > { %v5889_v57 = vpop.permute.xlu0 %1073 }
 0x120   : > { %v1150_v0 = vpop.permute.xlu1 %1149  ;;  %7700 = vst [vmem:[#allocation29_spill] sm:$0xff] %v5889_v57 }
 0x121   : > { %v1194_v41 = vmul.f32 %v1150_v0, %v5472_v25 }
 0x122   : > { %4786 = vset.pattern.permute.xlu1 %v7689_v1 }
 0x123   : > { %v4904_v34 = vpack.i.bf16 %v954_v36, %v1194_v41  ;;  %744 = vperm.xlu1 %4786, %v5560_v38   ;;  %v5899_v55 = vpop.permute.xlu0 %1077 }
 0x124   : > { %7701 = vst [vmem:[#allocation30_spill] sm:$0xff] %v5899_v55  ;;  %v780_v55 = vrot.slane %v5490_v28, 1 }
 0x125   : > { %v994_v60 = vpop.permute.xlu1 %993  ;;  %4905 = vrot.lane.b32.xlu0 %v4904_v34, %s5281_s21  ;;  %v567_v34 = vrot.slane %v5472_v25, 7 }
 0x126   : > { %v1035_v36 = vmul.f32 %v994_v60, %v5886_v49 }
 0x127   : > { %4787 = vset.pattern.permute.xlu1 %v7693_v35  ;;  %v5904_v60 = vsel %vm578_vm1, %v566_v33, %v567_v34 }
 0x128   : > { %857 = vperm.xlu1 %4787, %v5560_v38  }
 0x12a   : > { %v721_v0 = vpop.permute.xlu1 %720 }
 0x12b   : > { %v762_v41 = vmul.f32 %v721_v0, %v5459_v23  ;;  %v955_v0 = vmul.f32 %v5735_v10, %v5904_v60  ;;  %v5921_v10 = vsel %vm787_vm2, %v779_v2, %v780_v55  ;;  %v7706_v2 = vmov 3  }
 0x12c   : > { %4788 = vset.pattern.permute.xlu1 %v7695_v39  ;;  %7704 = vst [vmem:[#allocation33_spill] sm:$0xff] %v5921_v10 }
 0x12d   : > { %v4909_v32 = vpack.i.bf16 %v762_v41, %v1035_v36  ;;  %1177 = vperm.xlu1 %4788, %v5560_v38   ;;  %v5910_v41 = vpop.permute.xlu0 %1081 }
 0x12e   : > { %7702 = vst [vmem:[#allocation31_spill] sm:$0xff] %v5910_v41 }
 0x12f   : > { %v5896_v22 = vpop.permute.xlu1 %833  ;;  %4910 = vrot.lane.b32.xlu0 %v4909_v32, %s5282_s22 }
 0x131   : > { %4790 = vset.pattern.permute.xlu1 %v7686_v19  ;;  %v5917_v33 = vpop.permute.xlu0 %1085 }
 0x132   : > { %1021 = vperm.xlu1 %4790, %v5608_v40   ;;  %7703 = vst [vmem:[#allocation32_spill] sm:$0xff] %v5917_v33 }
 0x134   : > { %v1154_v23 = vpop.permute.xlu1 %1153 }
 0x135   : > { %v1195_v36 = vmul.f32 %v1154_v23, %v5476_v26  ;;  %v5929_v41 = vpop.permute.xlu0 %1089 }
 0x136   : > { %4791 = vset.pattern.permute.xlu1 %v7689_v1 }
 0x137   : > { %v4919_v32 = vpack.i.bf16 %v955_v0, %v1195_v36  ;;  %748 = vperm.xlu1 %4791, %v5608_v40  }
 0x139   : > { %v998_v49 = vpop.permute.xlu1 %997  ;;  %4920 = vrot.lane.b32.xlu0 %v4919_v32, %s5281_s21  ;;  %v7618_v32 = vrot.slane %v5476_v26, 7 }
 0x13a   : > { %v1036_v1 = vmul.f32 %v998_v49, %v5921_v10 }
 0x13b   : > { %4793 = vset.pattern.permute.xlu1 %v7693_v35 }
 0x13c   : > { %861 = vperm.xlu1 %4793, %v5608_v40  }
 0x13e   : > { %v725_v23 = vpop.permute.xlu1 %724 }
 0x13f   : > { %v763_v0 = vmul.f32 %v725_v23, %v5472_v25  ;;  %v5939_v25 = vsel %vm578_vm1, %v567_v34, %v7618_v32  ;;  %v5957_v34 = vld [vmem:[%s7582_s2] ss:$0 sm:$0xff] }
 0x140   : > { %4794 = vset.pattern.permute.xlu1 %v7695_v39  ;;  %7707 = vst [vmem:[#allocation35_spill] sm:$0xff] %v5939_v25  ;;  %v5942_v39 = vpop.permute.xlu0 %1093  ;;  %v956_v23 = vmul.f32 %v5748_v16, %v5939_v25  ;;  %v1766_v16 = vld [vmem:[%s7585_s5] sm:$0xff] }
 0x141   : > { %v4924_v36 = vpack.i.bf16 %v763_v0, %v1036_v1  ;;  %1181 = vperm.xlu1 %4794, %v5608_v40   ;;  %v1782_v0 = vld [vmem:[%s7585_s5 + $0x80] sm:$0xff] }
 0x143   : > { %v5931_v33 = vpop.permute.xlu1 %837  ;;  %4925 = vrot.lane.b32.xlu0 %v4924_v36, %s5282_s22  ;;  %v1783_v36 = vld [vmem:[%s7585_s5 + $0x88] sm:$0xff] }
 0x144   : > { %7705 = vst [vmem:[#allocation34_spill] sm:$0xff] %v5931_v33  ;;  %v4551_v32 = vpack.c.bf16 %v1783_v36, %v1782_v0  ;;  %v5970_v0 = vadd.f32 %v5957_v34, %v5801_v48  ;;  %v1784_v36 = vld [vmem:[%s7585_s5 + $0x90] sm:$0xff]  ;;  %v1769_v48 = vld [vmem:[%s7585_s5 + $0x18] sm:$0xff] }
 0x145   : > { %4795 = vset.pattern.permute.xlu1 %v7706_v2 }
 0x146   : > { %941 = vperm.xlu1 %4795, %v5608_v40   ;;  %4552 = vmatprep.subr.bf16.mxu1 %v4551_v32  ;;  %7708 = vst [vmem:[#allocation36_spill] sm:$0xff] %v5970_v0 }
 0x148   : > { %v1158_v49 = vpop.permute.xlu1 %1157 }
 0x149   : > { %v1196_v1 = vmul.f32 %v1158_v49, %v5490_v28  ;;  %v1767_v49 = vld [vmem:[%s7585_s5 + $0x8] sm:$0xff] }
 0x14a   : > { %4796 = vset.pattern.permute.xlu1 %v7686_v19  ;;  %v4553_v33 = vpack.c.bf16 %v1767_v49, %v1766_v16  ;;  %v7621_v19 = vrot.slane %v5493_v29, 1 }
 0x14b   : > { %v4934_v10 = vpack.i.bf16 %v956_v23, %v1196_v1  ;;  %1025 = vperm.xlu1 %4796, %v5630_v43   ;;  %v1785_v23 = vld [vmem:[%s7585_s5 + $0x98] sm:$0xff]  ;;  %v5978_v1 = vpop.permute.xlu0 %1097 }
 0x14c   : > { %4554 = vmatpush3.bf16.msra.mxu1 %v4553_v33  ;;  %7709 = vst [vmem:[#allocation37_spill] sm:$0xff] %v5978_v1  ;;  %v4555_v16 = vpack.c.bf16 %v1785_v23, %v1784_v36  ;;  %v7710_v33 = vmov 6   ;;  %v5991_v49 = vsel %vm787_vm2, %v780_v55, %v7621_v19  ;;  %v1786_v36 = vld [vmem:[%s7585_s5 + $0xa0] sm:$0xff]  ;;  %v1787_v23 = vld [vmem:[%s7585_s5 + $0xa8] sm:$0xff] }
 0x14d   : > { %v1002_v57 = vpop.permute.xlu1 %1001  ;;  %4935 = vrot.lane.b32.xlu0 %v4934_v10, %s5281_s21  ;;  %v1768_v10 = vld [vmem:[%s7585_s5 + $0x10] sm:$0xff]  ;;  %7711 = vst [vmem:[#allocation38_spill] sm:$0xff] %v5991_v49  ;;  %v1770_v55 = vld [vmem:[%s7585_s5 + $0x20] sm:$0xff] }
 0x14e   : > { %v4557_v32 = vpack.c.bf16 %v1769_v48, %v1768_v10  ;;  %4556 = vmatprep.subr.bf16.mxu1 %v4555_v16  ;;  %v4559_v48 = vpack.c.bf16 %v1787_v23, %v1786_v36  ;;  %v1771_v16 = vld [vmem:[%s7585_s5 + $0x28] sm:$0xff]  ;;  %v1788_v36 = vld [vmem:[%s7585_s5 + $0xb0] sm:$0xff] }
 0x14f   : > { %4797 = vset.pattern.permute.xlu1 %v7710_v33  ;;  %v1037_v33 = vmul.f32 %v1002_v57, %v5991_v49  ;;  %v4561_v19 = vpack.c.bf16 %v1771_v16, %v1770_v55  ;;  %v1789_v57 = vld [vmem:[%s7585_s5 + $0xb8] sm:$0xff]  ;;  %v7714_v16 = vmov 0  }
 0x150   : > { %1105 = vperm.xlu1 %4797, %v5630_v43   ;;  %4558 = vmatpush3.bf16.msra.mxu1 %v4557_v32  ;;  %v4563_v23 = vpack.c.bf16 %v1789_v57, %v1788_v36  ;;  %v771_v36 = vrot.slane %v5407_v12, 1  ;;  %v6057_v12 = vadd.f32 %v5957_v34, %v5809_v30 }
 0x151   : > { %2978 = vrot.lane.b32.xlu0 %v5970_v0, %s5283_s26  ;;  %v6010_v0 = vpop.permute.xlu0 %1101  ;;  %4560 = vmatprep.subr.bf16.mxu1 %v4559_v48 }
 0x152   : > { %v729_v10 = vpop.permute.xlu1 %728  ;;  %7712 = vst [vmem:[#allocation39_spill] sm:$0xff] %v6010_v0  ;;  %v1793_v0 = vld [vmem:[%s7585_s5 + $0xd8] sm:$0xff] }
 0x153   : > { %v764_v32 = vmul.f32 %v729_v10, %v5476_v26  ;;  %v1772_v10 = vld [vmem:[%s7585_s5 + $0x30] sm:$0xff] }
 0x154   : > { %4798 = vset.pattern.permute.xlu1 %v7693_v35  ;;  %4562 = vmatpush3.bf16.msra.mxu1 %v4561_v19  ;;  %v1773_v35 = vld [vmem:[%s7585_s5 + $0x38] sm:$0xff]  ;;  %v6028_v19 = vadd.f32 %v5799_v63, %v5957_v34  ;;  %v1791_v63 = vld [vmem:[%s7585_s5 + $0xc8] sm:$0xff] }
 0x155   : > { %v4944_v1 = vpack.i.bf16 %v764_v32, %v1037_v33  ;;  %865 = vperm.xlu1 %4798, %v5630_v43   ;;  %v4565_v55 = vpack.c.bf16 %v1773_v35, %v1772_v10  ;;  %4564 = vmatprep.subr.bf16.mxu1 %v4563_v23  ;;  %v6034_v33 = vpop.f32.mrb[12].mxu0  ;;  %v1790_v32 = vld [vmem:[%s7585_s5 + $0xc0] sm:$0xff] }
 0x156   : > { %7713 = vst [vmem:[#allocation40_spill] sm:$0xff] %v6028_v19  ;;  %v6045_v23 = vpop.f32.mrb[13].mxu0  ;;  %v4567_v10 = vpack.c.bf16 %v1791_v63, %v1790_v32  ;;  %v1774_v35 = vld [vmem:[%s7585_s5 + $0x40] sm:$0xff]  ;;  %v1792_v63 = vld [vmem:[%s7585_s5 + $0xd0] sm:$0xff] }
 0x157   : > { %v6030_v48 = vpop.permute.xlu1 %841  ;;  %4945 = vrot.lane.b32.xlu0 %v4944_v1, %s5282_s22  ;;  %v693_v1 = vpop.permute.xlu0 %692  ;;  %7715 = vst [vmem:[#allocation41_spill] sm:$0xff] %v6045_v23 }
 0x158   : > { %4566 = vmatpush3.bf16.msra.mxu1 %v4565_v55  ;;  %v1775_v55 = vld [vmem:[%s7585_s5 + $0x48] sm:$0xff]  ;;  %v755_v32 = vmul.f32 %v693_v1, %v5618_v42 }
 0x159   : > { %4801 = vset.pattern.permute.xlu1 %v7714_v16  ;;  %v4569_v57 = vpack.c.bf16 %v1775_v55, %v1774_v35  ;;  %4568 = vmatprep.subr.bf16.mxu1 %v4567_v10  ;;  %v7718_v35 = vrot.slane %v5618_v42, 1  ;;  %v1776_v10 = vld [vmem:[%s7585_s5 + $0x50] sm:$0xff] }
 0x15a   : > { %602 = vperm.xlu1 %4801, %v5404_v11  }
 0x15b   : > { %2980 = vrot.lane.b32.xlu0 %v6028_v19, %s5283_s26  ;;  %v7716_v19 = vrot.slane %v5420_v15, 1  ;;  %v6078_v1 = vsel %vm787_vm2, %v7718_v35, %v771_v36  ;;  %v1777_v15 = vld [vmem:[%s7585_s5 + $0x58] sm:$0xff]  ;;  %v1794_v35 = vld [vmem:[%s7585_s5 + $0xe0] sm:$0xff] }
 0x15c   : > { %v6059_v11 = vpop.permute.xlu1 %1161  ;;  %4570 = vmatpush3.bf16.msra.mxu1 %v4569_v57  ;;  %7719 = vst [vmem:[#allocation43_spill] sm:$0xff] %v6078_v1  ;;  %v4571_v57 = vpack.c.bf16 %v1793_v0, %v1792_v63  ;;  %v868_v0 = vmul.f32 %v5648_v50, %v6078_v1  ;;  %v1779_v50 = vld [vmem:[%s7585_s5 + $0x68] sm:$0xff] }
 0x15d   : > { %v6072_v30 = vsel %vm787_vm2, %v771_v36, %v7716_v19  ;;  %v4573_v36 = vpack.c.bf16 %v1777_v15, %v1776_v10  ;;  %v1778_v10 = vld [vmem:[%s7585_s5 + $0x60] sm:$0xff]  ;;  %v7720_v15 = vrot.slane %v5493_v29, 1 }
 0x15e   : > { %7717 = vst [vmem:[#allocation42_spill] sm:$0xff] %v6072_v30  ;;  %4802 = vset.pattern.permute.xlu1 %v7706_v2  ;;  %v1028_v19 = vmul.f32 %v5642_v47, %v6072_v30  ;;  %v782_v2 = vrot.slane %v5508_v31, 1  ;;  %4572 = vmatprep.subr.bf16.mxu1 %v4571_v57  ;;  %v1795_v47 = vld [vmem:[%s7585_s5 + $0xe8] sm:$0xff]  ;;  %v4577_v57 = vpack.c.bf16 %v1779_v50, %v1778_v10  ;;  %v1780_v10 = vld [vmem:[%s7585_s5 + $0x70] sm:$0xff]  ;;  %v6134_v50 = vpop.f32.mrb[14].mxu0 }
 0x15f   : > { %945 = vperm.xlu1 %4802, %v5630_v43   ;;  %2982 = vrot.lane.b32.xlu0 %v6057_v12, %s5283_s26  ;;  %v4575_v23 = vpack.c.bf16 %v1795_v47, %v1794_v35 }
 0x160   : > { %v4803_v55 = vpack.i.bf16 %v755_v32, %v1028_v19  ;;  %4574 = vmatpush3.bf16.msra.mxu1 %v4573_v36  ;;  %v1108_v32 = vmul.f32 %v5635_v45, %v5688_v9  ;;  %v6116_v19 = vsel %vm787_vm2, %v7720_v15, %v782_v2  ;;  %v1796_v45 = vld [vmem:[%s7585_s5 + $0xf0] sm:$0xff] }
 0x161   : > { %v1006_v63 = vpop.permute.xlu1 %1005  ;;  %7721 = vst [vmem:[#allocation44_spill] sm:$0xff] %v6116_v19  ;;  %4576 = vmatprep.subr.bf16.mxu1 %v4575_v23 }
 0x162   : > { %v4808_v36 = vpack.i.bf16 %v868_v0, %v1108_v32  ;;  %v1038_v23 = vmul.f32 %v1006_v63, %v6116_v19 }
 0x163   : > { %4804 = vrot.lane.b32.xlu1 %v4803_v55, %s5282_s22  ;;  %v1797_v55 = vld [vmem:[%s7585_s5 + $0xf8] sm:$0xff] }
 0x164   : > { %4818 = vset.pattern.permute.xlu1 %v7714_v16  ;;  %4578 = vmatpush3.bf16.msra.mxu1 %v4577_v57  ;;  %v4579_v47 = vpack.c.bf16 %v1797_v55, %v1796_v45  ;;  %v1781_v16 = vld [vmem:[%s7585_s5 + $0x78] sm:$0xff]  ;;  %v1109_v57 = vmul.f32 %v5812_v52, %v5713_v59  ;;  %v869_v45 = vmul.f32 %v5682_v5, %v6072_v30  ;;  %v6140_v55 = vpop.f32.mrb[15].mxu0 }
 0x165   : > { %v4581_v32 = vpack.c.bf16 %v1781_v16, %v1780_v10  ;;  %v6152_v52 = vadd.f32 %v5852_v13, %v5957_v34  ;;  %v1110_v13 = vmul.f32 %v5827_v21, %v5746_v54  ;;  %v1111_v10 = vmul.f32 %v5844_v14, %v5781_v18 }
 0x166   : > { %v733_v35 = vpop.permute.xlu1 %732  ;;  %4580 = vmatprep.subr.bf16.mxu1 %v4579_v47  ;;  %v4824_v5 = vpack.i.bf16 %v869_v45, %v1109_v57  ;;  %v871_v16 = vmul.f32 %v5740_v53, %v5700_v56  ;;  %v1112_v53 = vmul.f32 %v5858_v3, %v5824_v7  ;;  %v7760_v56 = vrot.slane %v5618_v42, 1 }
 0x167   : > { %v765_v0 = vmul.f32 %v733_v35, %v5490_v28  ;;  %4809 = vrot.lane.b32.xlu1 %v4808_v36, %s5284_s10  ;;  %v6144_v28 = vadd.f32 %v5806_v58, %v5957_v34  ;;  %v6156_v36 = vadd.f32 %v5957_v34, %v5854_v6  ;;  %v870_v35 = vmul.f32 %v5708_v8, %v5674_v61 }
 0x168   : > { %4582 = vmatpush3.bf16.msra.mxu1 %v4581_v32  ;;  %v571_v8 = vrot.slane %v5508_v31, 7 }
 0x169   : > { %v4959_v15 = vpack.i.bf16 %v765_v0, %v1038_v23  ;;  %v6163_v58 = vpack.i.bf16 %v6152_v52, %v6156_v36  ;;  %v4839_v6 = vpack.i.bf16 %v870_v35, %v1110_v13  ;;  %v4854_v23 = vpack.i.bf16 %v871_v16, %v1111_v10  ;;  %v7726_v10 = vld [vmem:[#allocation12_spill] sm:$0xff] }
 0x16a   : > { %v7626_v0 = vrot.slane %v5493_v29, 7 }
 0x16b   : > { %v6146_v63 = vpop.permute.xlu1 %845  ;;  %612 = vperm.xlu1 %4818, %v5430_v17   ;;  %4960 = vrot.lane.b32.xlu0 %v4959_v15, %s5282_s22  ;;  %7722 = vst [vmem:[#allocation45_spill] sm:$0xff] %v6163_v58 }
 0x16c   : > { %v6204_v15 = vsel %vm578_vm1, %v7626_v0, %v571_v8  ;;  %v7743_v0 = vld [vmem:[#allocation30_spill] sm:$0xff] }
 0x16d   : > { %7724 = vst [vmem:[#allocation47_spill] sm:$0xff] %v6204_v15 }
 0x16f   : > { %4825 = vrot.lane.b32.xlu1 %v4824_v5, %s5284_s10  ;;  %2984 = vrot.lane.b32.xlu0 %v6144_v28, %s5283_s26 }
 0x170   : > { %v6165_v17 = vpop.permute.xlu1 %1165 }
 0x173   : > { %617 = vperm.xlu1 %4818, %v5447_v20   ;;  %4975 = vrot.lane.b32.xlu0 %v6163_v58, %s5285_s11  ;;  %v572_v20 = vrot.slane %v5551_v37, 7 }
 0x175   : > { %v6174_v47 = vpop.permute.xlu1 %1009 }
 0x177   : > { %4840 = vrot.lane.b32.xlu1 %v4839_v6, %s5284_s10  ;;  %662 = vperm.xlu0 %4800, %v5560_v38   ;;  %v6190_v38 = vsel %vm578_vm1, %v571_v8, %v572_v20  ;;  %v7727_v8 = vld [vmem:[#allocation17_spill] sm:$0xff] }
 0x178   : > { %7723 = vst [vmem:[#allocation46_spill] sm:$0xff] %v6190_v38  ;;  %v1119_v14 = vmul.f32 %v5929_v41, %v6190_v38  ;;  %v959_v41 = vmul.f32 %v5775_v51, %v6204_v15  ;;  %v873_v16 = vmul.f32 %v7727_v8, %v7726_v10  ;;  %v7733_v8 = vld [vmem:[#allocation14_spill] sm:$0xff] }
 0x17a   : > { %v6180_v21 = vpop.permute.xlu1 %736 }
 0x17b   : > { %622 = vperm.xlu1 %4818, %v5465_v24   ;;  %v872_v24 = vmul.f32 %v5771_v62, %v5730_v44  ;;  %v7725_v62 = vld [vmem:[#allocation26_spill] sm:$0xff]  ;;  %v7754_v44 = vrot.slane %v5493_v29, 7 }
 0x17c   : > { %v1113_v6 = vmul.f32 %v7725_v62, %v5869_v4 }
 0x17d   : > { %v4869_v13 = vpack.i.bf16 %v872_v24, %v1112_v53  ;;  %v783_v53 = vrot.slane %v5551_v37, 1  ;;  %v7729_v24 = vld [vmem:[#allocation27_spill] sm:$0xff] }
 0x17e   : > { %v4884_v51 = vpack.i.bf16 %v873_v16, %v1113_v6  ;;  %v960_v16 = vmul.f32 %v7733_v8, %v6190_v38  ;;  %v7745_v8 = vld [vmem:[#allocation23_spill] sm:$0xff] }
 0x17f   : > { %v850_v32 = vpop.permute.xlu1 %849  ;;  %4855 = vrot.lane.b32.xlu1 %v4854_v23, %s5284_s10 }
 0x180   : > { %v879_v57 = vmul.f32 %v850_v32, %v6116_v19 }
 0x182   : > { %v4984_v45 = vpack.i.bf16 %v879_v57, %v1119_v14  ;;  %v7728_v14 = vld [vmem:[#allocation5_spill] sm:$0xff] }
 0x183   : > { %627 = vperm.xlu1 %4818, %v5483_v27   ;;  %v6222_v27 = vld [vmem:[%s7586_s6 + $0x38] sm:$0xff]  ;;  %v573_v57 = vrot.slane %v7728_v14, 7 }
 0x184   : > { %v1170_v5 = vpop.permute.xlu1 %1169  ;;  %4985 = vrot.lane.b32.xlu0 %v4984_v45, %s5284_s10  ;;  %v1114_v45 = vmul.f32 %v7729_v24, %v5904_v60  ;;  %v7734_v24 = vld [vmem:[#allocation24_spill] sm:$0xff] }
 0x185   : > { %v1199_v3 = vmul.f32 %v1170_v5, %v5551_v37  ;;  %v7730_v5 = vld [vmem:[#allocation16_spill] sm:$0xff]  ;;  %v6248_v37 = vld [vmem:[%s7586_s6 + $0x40] sm:$0xff] }
 0x187   : > { %v4989_v35 = vpack.i.bf16 %v959_v41, %v1199_v3  ;;  %4870 = vrot.lane.b32.xlu1 %v4869_v13, %s5284_s10  ;;  %v7731_v41 = vld [vmem:[#allocation25_spill] sm:$0xff]  ;;  %v6237_v3 = vsel %vm578_vm1, %v572_v20, %v573_v57 }
 0x188   : > { %v874_v13 = vmul.f32 %v7731_v41, %v7730_v5  ;;  %v1120_v62 = vmul.f32 %v5942_v39, %v6237_v3  ;;  %v875_v41 = vmul.f32 %v5896_v22, %v7734_v24  ;;  %v6275_v22 = vld [vmem:[%s5399_s29 + $0x48] sm:$0xff] }
 0x189   : > { %v6216_v23 = vpop.permute.xlu1 %1013  ;;  %4990 = vrot.lane.b32.xlu0 %v4989_v35, %s5281_s21  ;;  %7737 = vst [vmem:[#allocation5_spill] sm:$0xff] %v6275_v22 }
 0x18a   : > { %v4899_v6 = vpack.i.bf16 %v874_v13, %v1114_v45 }
 0x18b   : > { %632 = vperm.xlu1 %4818, %v6222_v27  }
 0x18d   : > { %667 = vperm.xlu0 %4800, %v5608_v40   ;;  %v6243_v40 = vsel %vm787_vm2, %v782_v2, %v783_v53 }
 0x18e   : > { %v6226_v32 = vpop.permute.xlu1 %740  ;;  %7732 = vst [vmem:[#allocation26_spill] sm:$0xff] %v6243_v40 }
 0x18f   : > { %4885 = vrot.lane.b32.xlu1 %v4884_v51, %s5284_s10  ;;  %v6258_v51 = vpop.permute.xlu0 %752 }
 0x193   : > { %v854_v35 = vpop.permute.xlu1 %853  ;;  %637 = vperm.xlu1 %4818, %v6248_v37  }
 0x194   : > { %v880_v20 = vmul.f32 %v854_v35, %v6243_v40  ;;  %v7735_v35 = vld [vmem:[#allocation29_spill] sm:$0xff] }
 0x195   : > { %v1115_v45 = vmul.f32 %v7735_v35, %v5939_v25 }
 0x196   : > { %v4999_v31 = vpack.i.bf16 %v880_v20, %v1120_v62  ;;  %v6268_v62 = vld [vmem:[%s7586_s6 + $0x48] sm:$0xff] }
 0x197   : > { %4900 = vrot.lane.b32.xlu1 %v4899_v6, %s5284_s10  ;;  %7736 = vst [vmem:[#allocation17_spill] sm:$0xff] %v6268_v62  ;;  %v4914_v20 = vpack.i.bf16 %v875_v41, %v1115_v45  ;;  %v7741_v41 = vrot.slane %v5476_v26, 7 }
 0x198   : > { %v1174_v2 = vpop.permute.xlu1 %1173  ;;  %5000 = vrot.lane.b32.xlu0 %v4999_v31, %s5284_s10  ;;  %v6278_v31 = vpop.permute.xlu0 %1185 }
 0x199   : > { %v1200_v39 = vmul.f32 %v1174_v2, %v7728_v14  ;;  %v569_v14 = vrot.slane %v6275_v22, 7  ;;  %v7738_v2 = vld [vmem:[#allocation6_spill] sm:$0xff] }
 0x19a   : > { %v7778_v25 = vrot.slane %v7738_v2, 7 }
 0x19b   : > { %v5004_v13 = vpack.i.bf16 %v960_v16, %v1200_v39  ;;  %642 = vperm.xlu1 %4818, %v6268_v62   ;;  %v7739_v16 = vld [vmem:[#allocation28_spill] sm:$0xff]  ;;  %v7740_v39 = vld [vmem:[#allocation34_spill] sm:$0xff]  ;;  %v6289_v45 = vsel %vm578_vm1, %v7741_v41, %v569_v14  ;;  %v6310_v41 = vld [vmem:[%s7586_s6 + $0x50] sm:$0xff] }
 0x19c   : > { %v876_v35 = vmul.f32 %v7740_v39, %v7739_v16  ;;  %7742 = vst [vmem:[#allocation27_spill] sm:$0xff] %v6289_v45  ;;  %v1116_v58 = vmul.f32 %v7743_v0, %v6289_v45  ;;  %v6301_v39 = vadd.f32 %v5957_v34, %v7745_v8  ;;  %7747 = vst [vmem:[#allocation14_spill] sm:$0xff] %v6310_v41  ;;  %v7748_v0 = vrot.slane %v7738_v2, 7  ;;  %v6319_v19 = vpop.permute.xlu0 %597 }
 0x19d   : > { %v6271_v6 = vpop.permute.xlu1 %1017  ;;  %5005 = vrot.lane.b32.xlu0 %v5004_v13, %s5281_s21  ;;  %v7630_v16 = vmov 8  }
 0x19e   : > { %v4929_v8 = vpack.i.bf16 %v876_v35, %v1116_v58 }
 0x19f   : > { %4915 = vrot.lane.b32.xlu1 %v4914_v20, %s5284_s10  ;;  %v7744_v20 = vld [vmem:[#allocation22_spill] sm:$0xff] }
 0x1a0   : > { %v6297_v30 = vadd.f32 %v7744_v20, %v5957_v34  ;;  %v6317_v20 = vsel %vm578_vm1, %v573_v57, %v7748_v0  ;;  %v7752_v0 = vld [vmem:[#allocation37_spill] sm:$0xff]  ;;  %v6336_v10 = vpop.permute.xlu0 %607 }
 0x1a1   : > { %672 = vperm.xlu0 %4800, %v5630_v43   ;;  %v6304_v43 = vld [vmem:[%s5399_s29 + $0x68] sm:$0xff]  ;;  %7749 = vst [vmem:[#allocation29_spill] sm:$0xff] %v6317_v20  ;;  %v1121_v58 = vmul.f32 %v7752_v0, %v6317_v20  ;;  %v6349_v0 = vsel %vm578_vm1, %v569_v14, %v7754_v44  ;;  %v7640_v14 = vrot.slane %v7738_v2, 1 }
 0x1a2   : > { %v6291_v13 = vpop.permute.xlu1 %744  ;;  %7746 = vst [vmem:[#allocation25_spill] sm:$0xff] %v6304_v43  ;;  %v7631_v26 = vrot.slane %v6304_v43, 1  ;;  %v6331_v57 = vpack.i.bf16 %v6297_v30, %v6301_v39  ;;  %7755 = vst [vmem:[#allocation30_spill] sm:$0xff] %v6349_v0 }
 0x1a3   : > { %647 = vperm.xlu1 %4818, %v6310_v41  }
 0x1a4   : > { %v6326_v24 = vsel %vm787_vm2, %v783_v53, %v7631_v26  ;;  %7751 = vst [vmem:[#allocation34_spill] sm:$0xff] %v6331_v57 }
 0x1a5   : > { %5084 = vset.pattern.permute.xlu0 %v7630_v16  ;;  %7750 = vst [vmem:[#allocation6_spill] sm:$0xff] %v6326_v24 }
 0x1a7   : > { %v858_v5 = vpop.permute.xlu1 %857  ;;  %4930 = vrot.lane.b32.xlu1 %v4929_v8, %s5284_s10  ;;  %v7753_v8 = vld [vmem:[#allocation33_spill] sm:$0xff] }
 0x1a8   : > { %v881_v35 = vmul.f32 %v858_v5, %v6326_v24  ;;  %v877_v26 = vmul.f32 %v6030_v48, %v7753_v8  ;;  %v7756_v5 = vld [vmem:[#allocation31_spill] sm:$0xff] }
 0x1a9   : > { %v6362_v48 = vld [vmem:[%s5399_s29 + $0x50] sm:$0xff] }
 0x1aa   : > { %v5019_v16 = vpack.i.bf16 %v881_v35, %v1121_v58  ;;  %v1117_v58 = vmul.f32 %v7756_v5, %v6349_v0  ;;  %v6356_v35 = vld [vmem:[%s7586_s6 + $0x58] sm:$0xff]  ;;  %7758 = vst [vmem:[#allocation23_spill] sm:$0xff] %v6362_v48  ;;  %v1197_v29 = vmul.f32 %v6362_v48, %v6059_v11  ;;  %v7759_v5 = vld [vmem:[#allocation11_spill] sm:$0xff] }
 0x1ab   : > { %4940 = vrot.lane.b32.xlu1 %v6331_v57, %s5285_s11  ;;  %7757 = vst [vmem:[#allocation22_spill] sm:$0xff] %v6356_v35  ;;  %v957_v8 = vmul.f32 %v7759_v5, %v6289_v45  ;;  %v7761_v45 = vld [vmem:[#allocation32_spill] sm:$0xff] }
 0x1ac   : > { %v6340_v53 = vpop.permute.xlu1 %1177  ;;  %5020 = vrot.lane.b32.xlu0 %v5019_v16, %s5284_s10  ;;  %v6359_v16 = vpop.permute.xlu0 %4814  ;;  %v4949_v57 = vpack.i.bf16 %v877_v26, %v1117_v58  ;;  %v6376_v26 = vsel %vm787_vm2, %v7640_v14, %v7760_v56 }
 0x1ad   : > { %v4954_v58 = vpack.i.bf16 %v957_v8, %v1197_v29  ;;  %v6392_v8 = vld [vmem:[%s7586_s6 + $0x60] sm:$0xff] }
 0x1ae   : > { %7762 = vst [vmem:[#allocation37_spill] sm:$0xff] %v6392_v8 }
 0x1af   : > { %652 = vperm.xlu1 %4818, %v6356_v35   ;;  %v1118_v35 = vmul.f32 %v7761_v45, %v6204_v15 }
 0x1b0   : > { %v6378_v11 = vpop.permute.xlu0 %4820 }
 0x1b1   : > { %v1022_v44 = vpop.permute.xlu1 %1021 }
 0x1b2   : > { %v1042_v38 = vmul.f32 %v1022_v44, %v6376_v26 }
 0x1b3   : > { %4950 = vrot.lane.b32.xlu1 %v4949_v57, %s5284_s10  ;;  %v878_v57 = vmul.f32 %v6146_v63, %v5991_v49  ;;  %v6399_v63 = vld [vmem:[%s5399_s29 + $0x58] sm:$0xff] }
 0x1b4   : > { %7763 = vst [vmem:[#allocation31_spill] sm:$0xff] %v6399_v63 }
 0x1b5   : > { %v4964_v29 = vpack.i.bf16 %v878_v57, %v1118_v35  ;;  %v7765_v35 = vld [vmem:[#allocation19_spill] sm:$0xff] }
 0x1b6   : > { %v749_v61 = vpop.permute.xlu1 %748  ;;  %v6413_v57 = vadd.f32 %v5957_v34, %v7765_v35 }
 0x1b7   : > { %v769_v22 = vmul.f32 %v6304_v43, %v749_v61  ;;  %4955 = vrot.lane.b32.xlu1 %v4954_v58, %s5281_s21  ;;  %v6396_v61 = vpop.permute.xlu0 %4830 }
 0x1b9   : > { %v5029_v5 = vpack.i.bf16 %v769_v22, %v1042_v38  ;;  %v1198_v38 = vmul.f32 %v6399_v63, %v6165_v17  ;;  %v7764_v22 = vld [vmem:[#allocation13_spill] sm:$0xff]  ;;  %v766_v17 = vmul.f32 %v6362_v48, %v6180_v21  ;;  %v6430_v21 = vld [vmem:[%s5399_s29 + $0x70] sm:$0xff] }
 0x1ba   : > { %v958_v45 = vmul.f32 %v7764_v22, %v6349_v0  ;;  %v6418_v22 = vld [vmem:[%s5399_s29 + $0x78] sm:$0xff]  ;;  %7767 = vst [vmem:[#allocation32_spill] sm:$0xff] %v6430_v21 }
 0x1bb   : > { %v6387_v56 = vpop.permute.xlu1 %861  ;;  %657 = vperm.xlu1 %4818, %v6392_v8   ;;  %5030 = vrot.lane.b32.xlu0 %v5029_v5, %s5282_s22  ;;  %v6406_v58 = vpop.permute.xlu0 %4835  ;;  %7766 = vst [vmem:[#allocation11_spill] sm:$0xff] %v6418_v22  ;;  %v7777_v8 = vrot.slane %v5618_v42, 7 }
 0x1bc   : > { %v4969_v14 = vpack.i.bf16 %v958_v45, %v1198_v38  ;;  %v1039_v38 = vmul.f32 %v6174_v47, %v6243_v40  ;;  %v7768_v40 = vld [vmem:[#allocation18_spill] sm:$0xff] }
 0x1be   : > { %v4979_v35 = vpack.i.bf16 %v766_v17, %v1039_v38 }
 0x1bf   : > { %4965 = vrot.lane.b32.xlu1 %v4964_v29, %s5284_s10  ;;  %v6409_v5 = vpop.permute.xlu0 %4845 }
 0x1c0   : > { %v1182_v44 = vpop.permute.xlu1 %1181 }
 0x1c1   : > { %v1202_v29 = vmul.f32 %v6418_v22, %v1182_v44  ;;  %v770_v44 = vmul.f32 %v6430_v21, %v6258_v51  ;;  %v7769_v51 = vld [vmem:[#allocation21_spill] sm:$0xff] }
 0x1c3   : > { %4970 = vrot.lane.b32.xlu1 %v4969_v14, %s5281_s21  ;;  %v6426_v45 = vpop.permute.xlu0 %4850 }
 0x1c5   : > { %v942_v49 = vpop.permute.xlu1 %941 }
 0x1c6   : > { %v962_v15 = vmul.f32 %v942_v49, %v6317_v20 }
 0x1c7   : > { %2986 = vrot.lane.b32.xlu1 %v6413_v57, %s5283_s26  ;;  %v6436_v47 = vpop.permute.xlu0 %4860 }
 0x1c8   : > { %v5039_v14 = vpack.i.bf16 %v962_v15, %v1202_v29  ;;  %v6440_v15 = vadd.f32 %v7768_v40, %v5957_v34  ;;  %v1040_v40 = vmul.f32 %v6216_v23, %v6326_v24  ;;  %v7771_v23 = vld [vmem:[#allocation20_spill] sm:$0xff] }
 0x1ca   : > { %v1026_v0 = vpop.permute.xlu1 %1025  ;;  %5040 = vrot.lane.b32.xlu0 %v5039_v14, %s5281_s21  ;;  %v767_v14 = vmul.f32 %v6399_v63, %v6226_v32  ;;  %v6497_v63 = vld [vmem:[%s5399_s29 + $0x60] sm:$0xff] }
 0x1cb   : > { %v1043_v49 = vmul.f32 %v1026_v0, %v6078_v1  ;;  %4980 = vrot.lane.b32.xlu1 %v4979_v35, %s5282_s22  ;;  %v6447_v38 = vpop.permute.xlu0 %4865  ;;  %v6451_v0 = vadd.f32 %v5957_v34, %v7769_v51  ;;  %v7770_v51 = vld [vmem:[#allocation41_spill] sm:$0xff]  ;;  %v6474_v1 = vadd.f32 %v7771_v23, %v5957_v34  ;;  %7776 = vst [vmem:[#allocation18_spill] sm:$0xff] %v6497_v63 }
 0x1cc   : > { %v6470_v32 = vadd.f32 %v5957_v34, %v7770_v51  ;;  %v5210_v51 = vld [vmem:[%s5399_s29] sm:$0xff]  ;;  %v768_v48 = vmul.f32 %v6497_v63, %v6291_v13  ;;  %v1201_v13 = vmul.f32 %v6430_v21, %v6340_v53  ;;  %v7780_v53 = vld [vmem:[#allocation36_spill] sm:$0xff] }
 0x1cd   : > { %v5049_v29 = vpack.i.bf16 %v770_v44, %v1043_v49  ;;  %v4994_v49 = vpack.i.bf16 %v767_v14, %v1040_v40  ;;  %v7774_v40 = vrot.slane %v6304_v43, 1  ;;  %v1203_v23 = vmul.f32 %v5210_v51, %v6278_v31 }
 0x1ce   : > { %v579_v43 = vsel %vm578_vm1, %v7778_v25, %v7777_v8 }
 0x1cf   : > { %v6442_v17 = vpop.permute.xlu1 %1105  ;;  %2988 = vrot.lane.b32.xlu1 %v6440_v15, %s5283_s26  ;;  %5050 = vrot.lane.b32.xlu0 %v5049_v29, %s5282_s22  ;;  %v6461_v44 = vpop.permute.xlu0 %4875  ;;  %v6466_v29 = vadd.f32 %v6034_v33, %v5957_v34  ;;  %v7773_v33 = vrot.slane %v7738_v2, 1  ;;  %v7779_v2 = vld [vmem:[#allocation15_spill] sm:$0xff]  ;;  %v675_v25 = vmul.f32 %v6319_v19, %v579_v43 }
 0x1d0   : > { %v961_v46 = vmul.f32 %v7779_v2, %v6237_v3 }
 0x1d1   : > { %v6482_v14 = vpack.i.bf16 %v6466_v29, %v6470_v32 }
 0x1d3   : > { %2990 = vrot.lane.b32.xlu1 %v6451_v0, %s5283_s26  ;;  %v6476_v24 = vpop.permute.xlu0 %4880  ;;  %7772 = vst [vmem:[#allocation13_spill] sm:$0xff] %v6482_v14 }
 0x1d4   : > { %v6459_v35 = vpop.permute.xlu1 %865 }
 0x1d7   : > { %4995 = vrot.lane.b32.xlu1 %v4994_v49, %s5282_s22  ;;  %v6490_v49 = vsel %vm787_vm2, %v7774_v40, %v7773_v33  ;;  %v6494_v20 = vpop.permute.xlu0 %4890 }
 0x1d8   : > { %7775 = vst [vmem:[#allocation19_spill] sm:$0xff] %v6490_v49  ;;  %v1041_v33 = vmul.f32 %v6271_v6, %v6490_v49 }
 0x1d9   : > { %v603_v22 = vpop.permute.xlu1 %602 }
 0x1da   : > { %v5014_v62 = vpack.i.bf16 %v768_v48, %v1041_v33  ;;  %v882_v48 = vmul.f32 %v6387_v56, %v6490_v49  ;;  %v6538_v56 = vadd.f32 %v5957_v34, %v6140_v55 }
 0x1db   : > { %2992 = vrot.lane.b32.xlu1 %v6474_v1, %s5283_s26  ;;  %v6511_v31 = vpop.permute.xlu0 %4895 }
 0x1de   : > { %v946_v41 = vpop.permute.xlu1 %945 }
 0x1df   : > { %v963_v40 = vmul.f32 %v946_v41, %v579_v43  ;;  %5010 = vrot.lane.b32.xlu1 %v6482_v14, %s5285_s11  ;;  %v6520_v8 = vpop.permute.xlu0 %4905  ;;  %v5024_v14 = vpack.i.bf16 %v961_v46, %v1201_v13  ;;  %v4816_v13 = vunpack.i.l.bf16 %v6359_v16 }
 0x1e1   : > { %v5059_v42 = vpack.i.bf16 %v963_v40, %v1203_v23  ;;  %v7781_v23 = vld [vmem:[#allocation40_spill] sm:$0xff]  ;;  %v7782_v40 = vld [vmem:[#allocation39_spill] sm:$0xff] }
 0x1e2   : > { %v4805_v63 = vpop.permute.xlu1 %4804  ;;  %v6526_v33 = vpack.i.bf16 %v7781_v23, %v7780_v53  ;;  %v1122_v2 = vmul.f32 %v7782_v40, %v579_v43  ;;  %v4817_v43 = vunpack.i.h.bf16 %v6359_v16 }
 0x1e3   : > { %5015 = vrot.lane.b32.xlu1 %v5014_v62, %s5282_s22  ;;  %5060 = vrot.lane.b32.xlu0 %v5059_v42, %s5281_s21  ;;  %v4807_v6 = vunpack.i.h.bf16 %v4805_v63  ;;  %v4806_v41 = vunpack.i.l.bf16 %v4805_v63  ;;  %v6531_v62 = vadd.f32 %v6134_v50, %v5957_v34  ;;  %s5287_s22 = smov 88  }
 0x1e5   : > { %v1718_v50 = vsel %vm350_vm0, %v5210_v51, %v4806_v41  ;;  %v1668_v42 = vsel %vm350_vm0, %v675_v25, %v4807_v6  ;;  %v6553_v16 = vpack.i.bf16 %v6531_v62, %v6538_v56  ;;  %v4822_v51 = vunpack.i.l.bf16 %v6378_v11  ;;  %v7783_v25 = vld [vmem:[#allocation7_spill] sm:$0xff] }
 0x1e6   : > { %v4810_v21 = vpop.permute.xlu1 %4809  ;;  %v676_v6 = vmul.f32 %v603_v22, %v7783_v25  ;;  %v4833_v22 = vunpack.i.h.bf16 %v6396_v61 }
 0x1e7   : > { %v4812_v19 = vunpack.i.h.bf16 %v4810_v21  ;;  %v4811_v63 = vunpack.i.l.bf16 %v4810_v21  ;;  %5025 = vrot.lane.b32.xlu1 %v5024_v14, %s5281_s21  ;;  %5065 = vrot.lane.b32.xlu0 %v6526_v33, %s5287_s22  ;;  %v6544_v21 = vpop.permute.xlu0 %4910  ;;  %v5034_v14 = vpack.i.bf16 %v882_v48, %v1122_v2  ;;  %v883_v48 = vmul.f32 %v6459_v35, %v6376_v26 }
 0x1e8   : > { %v4823_v2 = vunpack.i.h.bf16 %v6378_v11 }
 0x1e9   : > { %v1734_v46 = vsel %vm1684_vm3, %v1718_v50, %v4811_v63  ;;  %v1685_v40 = vsel %vm1684_vm3, %v1668_v42, %v4812_v19  ;;  %v1123_v63 = vmul.f32 %v6442_v17, %v7783_v25  ;;  %v4832_v50 = vunpack.i.l.bf16 %v6396_v61  ;;  %v5212_v42 = vld [vmem:[%s5399_s29 + $0x8] sm:$0xff] }
 0x1ea   : > { %v613_v49 = vpop.permute.xlu1 %612  ;;  %v1750_v34 = vsel %vm1701_vm4, %v1734_v46, %v4816_v13  ;;  %v1702_v55 = vsel %vm1701_vm4, %v1685_v40, %v4817_v43  ;;  %v1719_v35 = vsel %vm350_vm0, %v5212_v42, %v4822_v51  ;;  %v1669_v11 = vsel %vm350_vm0, %v676_v6, %v4823_v2 }
 0x1eb   : > { %1914 = vmatprep.mubr.f32.mxu1 %v1750_v34  ;;  %5035 = vrot.lane.b32.xlu1 %v5034_v14, %s5284_s10  ;;  %v6559_v41 = vpop.permute.xlu0 %4920  ;;  %v5054_v17 = vpack.i.bf16 %v883_v48, %v1123_v63  ;;  %v6584_v61 = vpack.i.bf16 %v6440_v15, %v6413_v57  ;;  %v677_v51 = vmul.f32 %v6336_v10, %v5688_v9  ;;  %v4838_v6 = vunpack.i.h.bf16 %v6406_v58  ;;  %v5213_v10 = vld [vmem:[%s5399_s29 + $0x10] sm:$0xff] }
 0x1ec   : > { %2378 = vrot.lane.b32.xlu0 %v6156_v36, %s5281_s21  ;;  %1915 = vmatmul.mubr.f32.vlgmr.msra.gmra.mrb[0].mxu1 %v1702_v55  ;;  %v4837_v48 = vunpack.i.l.bf16 %v6406_v58  ;;  %v4847_v9 = vunpack.i.l.bf16 %v6409_v5 }
 0x1ee   : > { %v4826_v19 = vpop.permute.xlu1 %4825  ;;  %v1720_v58 = vsel %vm350_vm0, %v5213_v10, %v4837_v48  ;;  %v4853_v48 = vunpack.i.h.bf16 %v6426_v45  ;;  %v4863_v10 = vunpack.i.h.bf16 %v6436_v47 }
 0x1ef   : > { %v4828_v43 = vunpack.i.h.bf16 %v4826_v19  ;;  %v4827_v13 = vunpack.i.l.bf16 %v4826_v19  ;;  %5045 = vrot.lane.b32.xlu1 %v6553_v16, %s5285_s11  ;;  %v6575_v14 = vpop.permute.xlu0 %4925 }
 0x1f0   : > { %2380 = vrot.lane.b32.xlu0 %v6152_v52, %s5281_s21 }
 0x1f1   : > { %v1735_v46 = vsel %vm1684_vm3, %v1719_v35, %v4827_v13  ;;  %v1686_v40 = vsel %vm1684_vm3, %v1669_v11, %v4828_v43  ;;  %v4848_v13 = vunpack.i.h.bf16 %v6409_v5 }
 0x1f2   : > { %v6579_v34 = vpop.permute.xlu1 %617  ;;  %v1751_v55 = vsel %vm1701_vm4, %v1735_v46, %v4832_v50  ;;  %v1703_v25 = vsel %vm1701_vm4, %v1686_v40, %v4833_v22  ;;  %v1670_v22 = vsel %vm350_vm0, %v677_v51, %v4838_v6  ;;  %v4852_v46 = vunpack.i.l.bf16 %v6426_v45  ;;  %v1798_v40 = vld [vmem:[%s7585_s5 + $0x100] sm:$0xff]  ;;  %v1801_v45 = vld [vmem:[%s7585_s5 + $0x118] sm:$0xff] }
 0x1f3   : > { %1919 = vmatprep.mubr.f32.mxu1 %v1751_v55  ;;  %5055 = vrot.lane.b32.xlu1 %v5054_v17, %s5284_s10  ;;  %v6594_v2 = vpop.permute.xlu0 %4935  ;;  %v1799_v55 = vld [vmem:[%s7585_s5 + $0x108] sm:$0xff]  ;;  %v6627_v6 = vpack.i.bf16 %v6144_v28, %v6057_v12  ;;  %s4063_s10 = sld [smem:[#allocation2 + $0x1]] }
 0x1f4   : > { %5075 = vrot.lane.b32.xlu0 %v6584_v61, %s5287_s22  ;;  %1920 = vmatmul.mubr.f32.gmra.mrb[2].mxu1 %v1703_v25  ;;  %v678_v25 = vmul.f32 %v613_v49, %v5713_v59  ;;  %v4583_v51 = vpack.c.bf16 %v1799_v55, %v1798_v40  ;;  %v5214_v59 = vld [vmem:[%s5399_s29 + $0x18] sm:$0xff] }
 0x1f5   : > { %v1721_v49 = vsel %vm350_vm0, %v5214_v59, %v4852_v46 }
 0x1f6   : > { %v4841_v19 = vpop.permute.xlu1 %4840  ;;  %4584 = vmatprep.subr.bf16.mxu0 %v4583_v51 }
 0x1f7   : > { %v4843_v63 = vunpack.i.h.bf16 %v4841_v19  ;;  %v4842_v43 = vunpack.i.l.bf16 %v4841_v19  ;;  %2374 = vrot.lane.b32.xlu1 %v6301_v39, %s5281_s21  ;;  %v6605_v50 = vpop.permute.xlu0 %2978  ;;  %4586 = vmatpush3.bf16.msra.mxu0 %v4583_v51 }
 0x1f8   : > { %2386 = vrot.lane.b32.xlu0 %v6538_v56, %s5281_s21 }
 0x1f9   : > { %v1736_v42 = vsel %vm1684_vm3, %v1720_v58, %v4842_v43  ;;  %v1687_v35 = vsel %vm1684_vm3, %v1670_v22, %v4843_v63  ;;  %v4862_v58 = vunpack.i.l.bf16 %v6436_v47  ;;  %v5215_v22 = vld [vmem:[%s7586_s6] sm:$0xff]  ;;  %v4867_v47 = vunpack.i.l.bf16 %v6447_v38 }
 0x1fa   : > { %v6609_v11 = vpop.permute.xlu1 %622  ;;  %v1752_v17 = vsel %vm1701_vm4, %v1736_v42, %v4847_v9  ;;  %v1704_v5 = vsel %vm1701_vm4, %v1687_v35, %v4848_v13  ;;  %v1800_v9 = vld [vmem:[%s7585_s5 + $0x110] sm:$0xff]  ;;  %v1671_v42 = vsel %vm350_vm0, %v678_v25, %v4853_v48  ;;  %v679_v25 = vmul.f32 %v6579_v34, %v5746_v54  ;;  %v5216_v48 = vld [vmem:[%s7586_s6 + $0x8] sm:$0xff]  ;;  %v5218_v34 = vld [vmem:[%s5399_s29 + $0x20] sm:$0xff] }
 0x1fb   : > { %1924 = vmatprep.mubr.f32.mxu1 %v1752_v17  ;;  %2376 = vrot.lane.b32.xlu1 %v6297_v30, %s5281_s21  ;;  %v6630_v63 = vpop.permute.xlu0 %4945  ;;  %v4587_v35 = vpack.c.bf16 %v1801_v45, %v1800_v9  ;;  %v4877_v9 = vunpack.i.l.bf16 %v6461_v44  ;;  %v5217_v54 = vld [vmem:[%s7586_s6 + $0x10] sm:$0xff]  ;;  %v1722_v45 = vsel %vm350_vm0, %v5218_v34, %v4867_v47  ;;  %v4883_v47 = vunpack.i.h.bf16 %v6476_v24 }
 0x1fc   : > { %2388 = vrot.lane.b32.xlu0 %v6531_v62, %s5281_s21  ;;  %1925 = vmatmul.mubr.f32.gmra.mrb[4].mxu1 %v1704_v5 }
 0x1fd   : > { %4588 = vmatprep.subr.bf16.mxu0 %v4587_v35 }
 0x1fe   : > { %v4856_v19 = vpop.permute.xlu1 %4855  ;;  %4590 = vmatpush3.bf16.msra.mxu0 %v4587_v35 }
 0x1ff   : > { %v4858_v43 = vunpack.i.h.bf16 %v4856_v19  ;;  %v4857_v13 = vunpack.i.l.bf16 %v4856_v19  ;;  %5070 = vrot.lane.b32.xlu1 %v6627_v6, %s5287_s22  ;;  %v6652_v51 = vpop.permute.xlu0 %2980  ;;  %v4868_v19 = vunpack.i.h.bf16 %v6447_v38 }
 0x200   : > { %1205 = vperm.xlu0 %5084, %v5215_v22   ;;  %v6678_v22 = vpack.i.bf16 %v6474_v1, %v6451_v0 }
 0x201   : > { %v1737_v17 = vsel %vm1684_vm3, %v1721_v49, %v4857_v13  ;;  %v1688_v5 = vsel %vm1684_vm3, %v1671_v42, %v4858_v43  ;;  %v4878_v49 = vunpack.i.h.bf16 %v6461_v44  ;;  %v1672_v38 = vsel %vm350_vm0, %v679_v25, %v4868_v19 }
 0x202   : > { %v628_v46 = vpop.permute.xlu1 %627  ;;  %v1753_v40 = vsel %vm1701_vm4, %v1737_v17, %v4862_v58  ;;  %v1705_v55 = vsel %vm1701_vm4, %v1688_v5, %v4863_v10  ;;  %v4882_v5 = vunpack.i.l.bf16 %v6476_v24 }
 0x203   : > { %1929 = vmatprep.mubr.f32.mxu1 %v1753_v40  ;;  %2382 = vrot.lane.b32.xlu1 %v6470_v32, %s5281_s21  ;;  %v6673_v10 = vpop.permute.xlu0 %2982  ;;  %v680_v40 = vmul.f32 %v6609_v11, %v5781_v18  ;;  %v5220_v18 = vld [vmem:[%s7586_s6 + $0x20] sm:$0xff]  ;;  %v5221_v11 = vld [vmem:[%s5399_s29 + $0x28] sm:$0xff] }
 0x204   : > { %1209 = vperm.xlu0 %5084, %v5216_v48   ;;  %1930 = vmatmul.mubr.f32.gmra.mrb[6].mxu1 %v1705_v55  ;;  %v5219_v55 = vld [vmem:[%s7586_s6 + $0x18] sm:$0xff] }
 0x206   : > { %v4871_v43 = vpop.permute.xlu1 %4870 }
 0x207   : > { %v4873_v13 = vunpack.i.h.bf16 %v4871_v43  ;;  %v4872_v59 = vunpack.i.l.bf16 %v4871_v43  ;;  %2384 = vrot.lane.b32.xlu1 %v6466_v29, %s5281_s21  ;;  %v6692_v48 = vpop.permute.xlu0 %4960 }
 0x208   : > { %1213 = vperm.xlu0 %5084, %v5217_v54  }
 0x209   : > { %v1738_v58 = vsel %vm1684_vm3, %v1722_v45, %v4872_v59  ;;  %v1689_v44 = vsel %vm1684_vm3, %v1672_v38, %v4873_v13  ;;  %v4893_v13 = vunpack.i.h.bf16 %v6494_v20  ;;  %v4892_v59 = vunpack.i.l.bf16 %v6494_v20 }
 0x20a   : > { %v633_v42 = vpop.permute.xlu1 %632  ;;  %v1754_v35 = vsel %vm1701_vm4, %v1738_v58, %v4877_v9  ;;  %v1706_v17 = vsel %vm1701_vm4, %v1689_v44, %v4878_v49  ;;  %v1723_v49 = vsel %vm350_vm0, %v5221_v11, %v4882_v5  ;;  %v1673_v9 = vsel %vm350_vm0, %v680_v40, %v4883_v47 }
 0x20b   : > { %1934 = vmatprep.mubr.f32.mxu1 %v1754_v35  ;;  %5080 = vrot.lane.b32.xlu1 %v6678_v22, %s5287_s22  ;;  %v6706_v38 = vpop.permute.xlu0 %2984  ;;  %v4897_v58 = vunpack.i.l.bf16 %v6511_v31  ;;  %v681_v44 = vmul.f32 %v628_v46, %v5824_v7  ;;  %v4898_v35 = vunpack.i.h.bf16 %v6511_v31  ;;  %v4907_v47 = vunpack.i.l.bf16 %v6520_v8 }
 0x20c   : > { %1217 = vperm.xlu0 %5084, %v5219_v55   ;;  %1935 = vmatmul.mubr.f32.gmra.mrb[8].mxu1 %v1706_v17  ;;  %v4908_v55 = vunpack.i.h.bf16 %v6520_v8  ;;  %v682_v11 = vmul.f32 %v633_v42, %v5869_v4  ;;  %v5225_v4 = vld [vmem:[%s5399_s29 + $0x38] sm:$0xff] }
 0x20e   : > { %v4886_v25 = vpop.permute.xlu1 %4885 }
 0x20f   : > { %v4888_v19 = vunpack.i.h.bf16 %v4886_v25  ;;  %v4887_v43 = vunpack.i.l.bf16 %v4886_v25  ;;  %v5222_v25 = vld [vmem:[%s7586_s6 + $0x28] sm:$0xff]  ;;  %v4976_v46 = vpop.permute.xlu0 %4975 }
 0x210   : > { %1221 = vperm.xlu0 %5084, %v5220_v18   ;;  %v4912_v18 = vunpack.i.l.bf16 %v6544_v21 }
 0x211   : > { %v1739_v24 = vsel %vm1684_vm3, %v1723_v49, %v4887_v43  ;;  %v1690_v54 = vsel %vm1684_vm3, %v1673_v9, %v4888_v19  ;;  %v5223_v19 = vld [vmem:[%s5399_s29 + $0x30] sm:$0xff]  ;;  %v4913_v9 = vunpack.i.h.bf16 %v6544_v21 }
 0x212   : > { %v638_v34 = vpop.permute.xlu1 %637  ;;  %v1755_v45 = vsel %vm1701_vm4, %v1739_v24, %v4892_v59  ;;  %v1707_v20 = vsel %vm1701_vm4, %v1690_v54, %v4893_v13  ;;  %v1724_v7 = vsel %vm350_vm0, %v5223_v19, %v4897_v58  ;;  %v5224_v49 = vld [vmem:[%s7586_s6 + $0x30] sm:$0xff]  ;;  %v4923_v58 = vunpack.i.h.bf16 %v6559_v41 }
 0x213   : > { %1939 = vmatprep.mubr.f32.mxu1 %v1755_v45  ;;  %v6733_v54 = vpop.permute.xlu0 %662  ;;  %v1725_v42 = vsel %vm350_vm0, %v5225_v4, %v4912_v18 }
 0x214   : > { %5086 = vrot.lane.b32.xlu0 %v6526_v33, %s5285_s11  ;;  %1940 = vmatmul.mubr.f32.gmra.mrb[10].mxu1 %v1707_v20  ;;  %v1674_v33 = vsel %vm350_vm0, %v681_v44, %v4898_v35  ;;  %v4922_v44 = vunpack.i.l.bf16 %v6559_v41  ;;  %v1675_v35 = vsel %vm350_vm0, %v682_v11, %v4913_v9  ;;  %v4927_v41 = vunpack.i.l.bf16 %v6575_v14 }
 0x216   : > { %v4901_v17 = vpop.permute.xlu1 %4900 }
 0x217   : > { %v4903_v5 = vunpack.i.h.bf16 %v4901_v17  ;;  %v4902_v40 = vunpack.i.l.bf16 %v4901_v17 }
 0x218   : > { %1225 = vperm.xlu0 %5084, %v5222_v25   ;;  %v4928_v25 = vunpack.i.h.bf16 %v6575_v14 }
 0x219   : > { %v1740_v31 = vsel %vm1684_vm3, %v1724_v7, %v4902_v40  ;;  %v1691_v43 = vsel %vm1684_vm3, %v1674_v33, %v4903_v5 }
 0x21a   : > { %v6723_v13 = vpop.permute.xlu1 %642  ;;  %v1756_v59 = vsel %vm1701_vm4, %v1740_v31, %v4907_v47  ;;  %v1708_v8 = vsel %vm1701_vm4, %v1691_v43, %v4908_v55  ;;  %v6750_v47 = vpop.permute.xlu0 %4985  ;;  %v4938_v31 = vunpack.i.h.bf16 %v6594_v2  ;;  %v4937_v43 = vunpack.i.l.bf16 %v6594_v2 }
 0x21b   : > { %1944 = vmatprep.mubr.f32.mxu1 %v1756_v59  ;;  %v5226_v59 = vld [vmem:[%s5399_s29 + $0x40] sm:$0xff] }
 0x21c   : > { %1229 = vperm.xlu0 %5084, %v5224_v49   ;;  %1945 = vmatmul.mubr.f32.gmra.mrb[12].mxu1 %v1708_v8  ;;  %v4977_v8 = vunpack.i.l.bf16 %v4976_v46 }
 0x21e   : > { %v4916_v24 = vpop.permute.xlu1 %4915  ;;  %v6764_v2 = vpop.permute.xlu0 %4990 }
 0x21f   : > { %v4918_v45 = vunpack.i.h.bf16 %v4916_v24  ;;  %v4917_v20 = vunpack.i.l.bf16 %v4916_v24 }
 0x220   : > { %1233 = vperm.xlu0 %5084, %v6222_v27   ;;  %v683_v27 = vmul.f32 %v638_v34, %v5904_v60  ;;  %v1726_v60 = vsel %vm350_vm0, %v5226_v59, %v4927_v41  ;;  %v4978_v34 = vunpack.i.h.bf16 %v4976_v46 }
 0x221   : > { %v1741_v17 = vsel %vm1684_vm3, %v1725_v42, %v4917_v20  ;;  %v1692_v21 = vsel %vm1684_vm3, %v1675_v35, %v4918_v45  ;;  %v7784_v45 = vld [vmem:[#allocation17_spill] sm:$0xff]  ;;  %v7787_v42 = vld [vmem:[#allocation14_spill] sm:$0xff] }
 0x222   : > { %v6743_v5 = vpop.permute.xlu1 %647  ;;  %v1757_v40 = vsel %vm1701_vm4, %v1741_v17, %v4922_v44  ;;  %v1709_v55 = vsel %vm1701_vm4, %v1692_v21, %v4923_v58  ;;  %v4621_v20 = vpack.c.bf16 %v4978_v34, %v4977_v8  ;;  %v6773_v4 = vpop.permute.xlu0 %667  ;;  %v4947_v17 = vunpack.i.l.bf16 %v6630_v63  ;;  %v7788_v21 = vld [vmem:[#allocation35_spill] sm:$0xff] }
 0x223   : > { %1949 = vmatprep.mubr.f32.mxu1 %v1757_v40  ;;  %v684_v40 = vmul.f32 %v6723_v13, %v7788_v21 }
 0x224   : > { %1237 = vperm.xlu0 %5084, %v6248_v37   ;;  %1950 = vmatmul.mubr.f32.gmra.mrb[14].mxu1 %v1709_v55  ;;  %v1676_v37 = vsel %vm350_vm0, %v683_v27, %v4928_v25  ;;  %v7789_v27 = vld [vmem:[#allocation22_spill] sm:$0xff]  ;;  %v4948_v25 = vunpack.i.h.bf16 %v6630_v63 }
 0x226   : > { %v4931_v19 = vpop.permute.xlu1 %4930 }
 0x227   : > { %v4933_v7 = vunpack.i.h.bf16 %v4931_v19  ;;  %v4932_v33 = vunpack.i.l.bf16 %v4931_v19  ;;  %v6788_v19 = vpop.permute.xlu0 %5000 }
 0x228   : > { %5091 = vrot.lane.b32.xlu0 %v6627_v6, %s5285_s11 }
 0x229   : > { %v1742_v14 = vsel %vm1684_vm3, %v1726_v60, %v4932_v33  ;;  %v1693_v18 = vsel %vm1684_vm3, %v1676_v37, %v4933_v7  ;;  %v1677_v60 = vsel %vm350_vm0, %v684_v40, %v4948_v25  ;;  %v7791_v37 = vld [vmem:[#allocation37_spill] sm:$0xff] }
 0x22a   : > { %v4941_v11 = vpop.permute.xlu1 %4940  ;;  %v1758_v49 = vsel %vm1701_vm4, %v1742_v14, %v4937_v43  ;;  %v1710_v9 = vsel %vm1701_vm4, %v1693_v18, %v4938_v31  ;;  %v7790_v43 = vld [vmem:[#allocation5_spill] sm:$0xff]  ;;  %v4962_v18 = vunpack.i.l.bf16 %v6692_v48 }
 0x22b   : > { %v4943_v24 = vunpack.i.h.bf16 %v4941_v11  ;;  %v4942_v6 = vunpack.i.l.bf16 %v4941_v11  ;;  %1954 = vmatprep.mubr.f32.mxu1 %v1758_v49  ;;  %v1727_v59 = vsel %vm350_vm0, %v7790_v43, %v4947_v17  ;;  %v6801_v14 = vpop.permute.xlu0 %5005  ;;  %v7792_v49 = vld [vmem:[#allocation27_spill] sm:$0xff] }
 0x22c   : > { %1241 = vperm.xlu0 %5084, %v7784_v45   ;;  %1955 = vmatmul.mubr.f32.gmra.mrb[16].mxu1 %v1710_v9  ;;  %v685_v9 = vmul.f32 %v6743_v5, %v7792_v49  ;;  %v5227_v45 = vld [vmem:[%s7586_s6 + $0x70] sm:$0xff]  ;;  %v5228_v5 = vld [vmem:[%s7586_s6 + $0x78] sm:$0xff] }
 0x22d   : > { %v4615_v58 = vpack.c.bf16 %v4943_v24, %v4942_v6 }
 0x22e   : > { %v653_v44 = vpop.permute.xlu1 %652 }
 0x22f   : > { %4617 = vmatprep.subr.msk.bf16.mxu1 %vm6769_vm6, %v4615_v58  ;;  %v6807_v11 = vpop.permute.xlu0 %672 }
 0x230   : > { %1245 = vperm.xlu0 %5084, %v7787_v42   ;;  %4620 = vmatpush3.bf16.xpose.msk.msra.mxu1 %vm6769_vm6, %v4615_v58  ;;  %v7793_v42 = vld [vmem:[#allocation23_spill] sm:$0xff] }
 0x231   : > { %4623 = vmatprep.subr.msk.bf16.mxu1 %vm6769_vm6, %v4621_v20 }
 0x232   : > { %v4951_v35 = vpop.permute.xlu1 %4950 }
 0x233   : > { %v4953_v55 = vunpack.i.h.bf16 %v4951_v35  ;;  %v4952_v41 = vunpack.i.l.bf16 %v4951_v35  ;;  %v1728_v35 = vsel %vm350_vm0, %v7793_v42, %v4962_v18  ;;  %v5002_v42 = vunpack.i.l.bf16 %v6788_v19 }
 0x234   : > { %1249 = vperm.xlu0 %5084, %v7789_v27   ;;  %3002 = vxpose.xlu1.b32.start [1/8] (short) (narrow) %v6605_v50, 8 }
 0x235   : > { %v1743_v13 = vsel %vm1684_vm3, %v1727_v59, %v4952_v41  ;;  %v1694_v50 = vsel %vm1684_vm3, %v1677_v60, %v4953_v55  ;;  %v4988_v59 = vunpack.i.h.bf16 %v6750_v47  ;;  %v4987_v60 = vunpack.i.l.bf16 %v6750_v47 }
 0x236   : > { %v4956_v7 = vpop.permute.xlu1 %4955 }
 0x237   : > { %v4958_v33 = vunpack.i.h.bf16 %v4956_v7  ;;  %v4957_v31 = vunpack.i.l.bf16 %v4956_v7  ;;  %v7794_v7 = vld [vmem:[#allocation30_spill] sm:$0xff] }
 0x238   : > { %1253 = vperm.xlu0 %5084, %v7791_v37   ;;  %3003 = vxpose.xlu1.b32.cont [2/8] (short) (narrow) %v6652_v51, 8  ;;  %v4993_v37 = vunpack.i.h.bf16 %v6764_v2 }
 0x239   : > { %v1759_v63 = vsel %vm1701_vm4, %v1743_v13, %v4957_v31  ;;  %v1711_v34 = vsel %vm1701_vm4, %v1694_v50, %v4958_v33  ;;  %4626 = vmatpush3.bf16.xpose.msk.msra.mxu1 %vm6769_vm6, %v4621_v20  ;;  %v686_v33 = vmul.f32 %v653_v44, %v7794_v7  ;;  %v4992_v13 = vunpack.i.l.bf16 %v6764_v2 }
 0x23a   : > { %v658_v8 = vpop.permute.xlu1 %657  ;;  %1959 = vmatprep.mubr.f32.mxu1 %v1759_v63 }
 0x23b   : > { %1960 = vmatmul.mubr.f32.gmra.mrb[18].mxu1 %v1711_v34 }
 0x23c   : > { %5096 = vrot.lane.b32.xlu0 %v6584_v61, %s5285_s11  ;;  %3004 = vxpose.xlu1.b32.cont [3/8] (short) (narrow) %v6673_v10, 8  ;;  %v4963_v61 = vunpack.i.h.bf16 %v6692_v48 }
 0x23e   : > { %v4966_v51 = vpop.permute.xlu1 %4965  ;;  %v1678_v17 = vsel %vm350_vm0, %v685_v9, %v4963_v61 }
 0x23f   : > { %v4968_v24 = vunpack.i.h.bf16 %v4966_v51  ;;  %v4967_v6 = vunpack.i.l.bf16 %v4966_v51 }
 0x240   : > { %1261 = vperm.xlu0 %5084, %v5227_v45   ;;  %3005 = vxpose.xlu1.b32.cont [4/8] (short) (narrow) %v6706_v38, 8  ;;  %v6824_v38 = vpop.permute.xlu0 %5020 }
 0x241   : > { %v1744_v21 = vsel %vm1684_vm3, %v1728_v35, %v4967_v6  ;;  %v1695_v40 = vsel %vm1684_vm3, %v1678_v17, %v4968_v24  ;;  %v7796_v6 = vld [vmem:[#allocation47_spill] sm:$0xff]  ;;  %v5008_v35 = vunpack.i.h.bf16 %v6801_v14  ;;  %v5007_v17 = vunpack.i.l.bf16 %v6801_v14 }
 0x242   : > { %v4971_v10 = vpop.permute.xlu1 %4970  ;;  %v687_v45 = vmul.f32 %v658_v8, %v7796_v6 }
 0x243   : > { %v4973_v20 = vunpack.i.h.bf16 %v4971_v10  ;;  %v4972_v58 = vunpack.i.l.bf16 %v4971_v10 }
 0x244   : > { %1265 = vperm.xlu0 %5084, %v5228_v5   ;;  %v6830_v27 = vpop.permute.xlu0 %5030  ;;  %v7797_v5 = vld [vmem:[#allocation18_spill] sm:$0xff] }
 0x245   : > { %v1760_v48 = vsel %vm1701_vm4, %v1744_v21, %v4972_v58  ;;  %v1712_v55 = vsel %vm1701_vm4, %v1695_v40, %v4973_v20  ;;  %v5003_v58 = vunpack.i.h.bf16 %v6788_v19 }
 0x246   : > { %v2987_v41 = vpop.permute.xlu1 %2986  ;;  %1964 = vmatprep.mubr.f32.mxu1 %v1760_v48 }
 0x247   : > { %3006 = vxpose.xlu1.b32.cont [5/8] (short) (narrow) %v2987_v41, 8  ;;  %1965 = vmatmul.mubr.f32.gmra.mrb[20].mxu1 %v1712_v55 }
 0x248   : > { %5102 = vrot.lane.b32.xlu0 %v6678_v22, %s5285_s11  ;;  %v6839_v50 = vpop.permute.xlu0 %5040  ;;  %v7795_v22 = vld [vmem:[#allocation31_spill] sm:$0xff] }
 0x24a   : > { %v4981_v25 = vpop.permute.xlu1 %4980 }
 0x24b   : > { %v4983_v31 = vunpack.i.h.bf16 %v4981_v25  ;;  %v4982_v43 = vunpack.i.l.bf16 %v4981_v25 }
 0x24c   : > { %2196 = vrot.lane.b32.xlu0 %v7780_v53, %s5281_s21  ;;  %v6850_v9 = vpop.permute.xlu0 %5050 }
 0x24d   : > { %v1729_v63 = vsel %vm350_vm0, %v7795_v22, %v4982_v43  ;;  %v1679_v44 = vsel %vm350_vm0, %v686_v33, %v4983_v31 }
 0x24e   : > { %v2989_v34 = vpop.permute.xlu1 %2988  ;;  %v1745_v51 = vsel %vm1684_vm3, %v1729_v63, %v4987_v60  ;;  %v1696_v18 = vsel %vm1684_vm3, %v1679_v44, %v4988_v59  ;;  %v7798_v59 = vld [vmem:[#allocation46_spill] sm:$0xff]  ;;  %v7799_v63 = vld [vmem:[#allocation25_spill] sm:$0xff] }
 0x24f   : > { %3007 = vxpose.xlu1.b32.cont [6/8] (short) (narrow) %v2989_v34, 8  ;;  %v1761_v47 = vsel %vm1701_vm4, %v1745_v51, %v4992_v13  ;;  %v1713_v49 = vsel %vm1701_vm4, %v1696_v18, %v4993_v37  ;;  %v688_v60 = vmul.f32 %v6733_v54, %v7798_v59  ;;  %v5023_v51 = vunpack.i.h.bf16 %v6824_v38 }
 0x250   : > { %2198 = vrot.lane.b32.xlu0 %v7781_v23, %s5281_s21  ;;  %1969 = vmatprep.mubr.f32.mxu1 %v1761_v47  ;;  %v5022_v18 = vunpack.i.l.bf16 %v6824_v38  ;;  %v689_v38 = vmul.f32 %v6773_v4, %v6237_v3 }
 0x251   : > { %1970 = vmatmul.mubr.f32.gmra.mrb[22].mxu1 %v1713_v49 }
 0x252   : > { %v2991_v2 = vpop.permute.xlu1 %2990 }
 0x253   : > { %3008 = vxpose.xlu1.b32.cont [7/8] (short) (narrow) %v2991_v2, 8  ;;  %v5033_v2 = vunpack.i.h.bf16 %v6830_v27 }
 0x254   : > { %2200 = vrot.lane.b32.xlu0 %v6057_v12, %s5281_s21 }
 0x255   : > { %v6855_v61 = vpop.permute.xlu0 %5060 }
 0x256   : > { %v4996_v24 = vpop.permute.xlu1 %4995 }
 0x257   : > { %v4998_v10 = vunpack.i.h.bf16 %v4996_v24  ;;  %v4997_v20 = vunpack.i.l.bf16 %v4996_v24  ;;  %v5032_v24 = vunpack.i.l.bf16 %v6830_v27  ;;  %v5043_v27 = vunpack.i.h.bf16 %v6839_v50 }
 0x258   : > { %2202 = vrot.lane.b32.xlu0 %v6144_v28, %s5281_s21 }
 0x259   : > { %v1730_v21 = vsel %vm350_vm0, %v7797_v5, %v4997_v20  ;;  %v1680_v8 = vsel %vm350_vm0, %v687_v45, %v4998_v10  ;;  %v6872_v14 = vpop.permute.xlu0 %5065  ;;  %v5042_v5 = vunpack.i.l.bf16 %v6839_v50  ;;  %v5053_v50 = vunpack.i.h.bf16 %v6850_v9 }
 0x25a   : > { %v2993_v40 = vpop.permute.xlu1 %2992  ;;  %v1746_v48 = vsel %vm1684_vm3, %v1730_v21, %v5002_v42  ;;  %v1697_v55 = vsel %vm1684_vm3, %v1680_v8, %v5003_v58  ;;  %v7800_v21 = vld [vmem:[#allocation32_spill] sm:$0xff] }
 0x25b   : > { %3009 = vxpose.xlu1.b32.end [8/8] (short) (narrow) %v2993_v40, 8  ;;  %v1762_v19 = vsel %vm1701_vm4, %v1746_v48, %v5007_v17  ;;  %v1714_v41 = vsel %vm1701_vm4, %v1697_v55, %v5008_v35  ;;  %v1732_v8 = vsel %vm350_vm0, %v7800_v21, %v5032_v24  ;;  %v1682_v40 = vsel %vm350_vm0, %v689_v38, %v5033_v2 }
 0x25c   : > { %2206 = vrot.lane.b32.xlu0 %v6440_v15, %s5281_s21  ;;  %1974 = vmatprep.mubr.f32.mxu1 %v1762_v19  ;;  %v5068_v24 = vunpack.i.h.bf16 %v6872_v14 }
 0x25d   : > { %1975 = vmatmul.mubr.f32.gmra.mrb[24].mxu1 %v1714_v41 }
 0x25e   : > { %v5011_v25 = vpop.permute.xlu1 %5010  ;;  %v6878_v37 = vpop.permute.xlu0 %2378 }
 0x25f   : > { %v5013_v7 = vunpack.i.h.bf16 %v5011_v25  ;;  %v5012_v33 = vunpack.i.l.bf16 %v5011_v25 }
 0x260   : > { %2210 = vrot.lane.b32.xlu0 %v6474_v1, %s5281_s21 }
 0x261   : > { %v4627_v31 = vpack.c.bf16 %v5013_v7, %v5012_v33  ;;  %v5052_v33 = vunpack.i.l.bf16 %v6850_v9 }
 0x262   : > { %v5016_v43 = vpop.permute.xlu1 %5015  ;;  %v6893_v10 = vpop.permute.xlu0 %2380 }
 0x263   : > { %v5018_v13 = vunpack.i.h.bf16 %v5016_v43  ;;  %v5017_v22 = vunpack.i.l.bf16 %v5016_v43  ;;  %4629 = vmatprep.subr.msk.bf16.mxu1 %vm6769_vm6, %v4627_v31  ;;  %v7801_v43 = vld [vmem:[#allocation29_spill] sm:$0xff] }
 0x264   : > { %4632 = vmatpush3.bf16.xpose.msk.msra.mxu1 %vm6769_vm6, %v4627_v31  ;;  %v690_v59 = vmul.f32 %v6807_v11, %v7801_v43 }
 0x265   : > { %v1731_v44 = vsel %vm350_vm0, %v7799_v63, %v5017_v22  ;;  %v1681_v34 = vsel %vm350_vm0, %v688_v60, %v5018_v13  ;;  %v5063_v63 = vunpack.i.h.bf16 %v6855_v61 }
 0x266   : > { %v5026_v54 = vpop.permute.xlu1 %5025  ;;  %v1747_v6 = vsel %vm1684_vm3, %v1731_v44, %v5022_v18  ;;  %v1698_v45 = vsel %vm1684_vm3, %v1681_v34, %v5023_v51  ;;  %v5076_v41 = vpop.permute.xlu0 %5075  ;;  %v5062_v44 = vunpack.i.l.bf16 %v6855_v61  ;;  %v7802_v34 = vld [vmem:[#allocation11_spill] sm:$0xff]  ;;  %v1683_v51 = vsel %vm350_vm0, %v690_v59, %v5053_v50  ;;  %v7807_v59 = vld [vmem:[#allocation12_spill] sm:$0xff] }
 0x267   : > { %v5028_v47 = vunpack.i.h.bf16 %v5026_v54  ;;  %v5027_v49 = vunpack.i.l.bf16 %v5026_v54  ;;  %v1733_v9 = vsel %vm350_vm0, %v7802_v34, %v5052_v33 }
 0x269   : > { %v1763_v20 = vsel %vm1701_vm4, %v1747_v6, %v5027_v49  ;;  %v1715_v58 = vsel %vm1701_vm4, %v1698_v45, %v5028_v47  ;;  %v7660_v47 = vmov 0.0|0.0   ;;  %v5067_v6 = vunpack.i.l.bf16 %v6872_v14 }
 0x26a   : > { %v5036_v42 = vpop.permute.xlu1 %5035  ;;  %1979 = vmatprep.mubr.f32.mxu1 %v1763_v20  ;;  %v2387_v18 = vpop.permute.xlu0 %2386  ;;  %v7803_v45 = vmov 8  }
 0x26b   : > { %v5038_v35 = vunpack.i.h.bf16 %v5036_v42  ;;  %v5037_v17 = vunpack.i.l.bf16 %v5036_v42  ;;  %1980 = vmatmul.mubr.f32.gmra.mrb[26].mxu1 %v1715_v58  ;;  %v5229_v58 = vld [vmem:[%s7586_s6 + $0x68] sm:$0xff]  ;;  %v4672_v38 = vpack.c.bf16 %v5068_v24, %v5067_v6  ;;  %v7810_v24 = vld [vmem:[#allocation28_spill] sm:$0xff] }
 0x26d   : > { %v1748_v48 = vsel %vm1684_vm3, %v1732_v8, %v5037_v17  ;;  %v1699_v55 = vsel %vm1684_vm3, %v1682_v40, %v5038_v35  ;;  %v5078_v40 = vunpack.i.h.bf16 %v5076_v41 }
 0x26e   : > { %v5046_v19 = vpop.permute.xlu1 %5045  ;;  %v1764_v3 = vsel %vm1701_vm4, %v1748_v48, %v5042_v5  ;;  %v1716_v4 = vsel %vm1701_vm4, %v1699_v55, %v5043_v27  ;;  %v2389_v42 = vpop.permute.xlu0 %2388  ;;  %v7804_v5 = vld [vmem:[#allocation8_spill] sm:$0xff]  ;;  %v5077_v48 = vunpack.i.l.bf16 %v5076_v41  ;;  %v7806_v41 = vld [vmem:[#allocation10_spill] sm:$0xff] }
 0x26f   : > { %v5048_v25 = vunpack.i.h.bf16 %v5046_v19  ;;  %v5047_v7 = vunpack.i.l.bf16 %v5046_v19  ;;  %1984 = vmatprep.mubr.f32.mxu1 %v1764_v3  ;;  %v7805_v19 = vld [vmem:[#allocation9_spill] sm:$0xff] }
 0x270   : > { %1985 = vmatmul.mubr.f32.gmra.mrb[28].mxu1 %v1716_v4  ;;  %v4678_v4 = vpack.c.bf16 %v5078_v40, %v5077_v48 }
 0x271   : > { %v4633_v31 = vpack.c.bf16 %v5048_v25, %v5047_v7 }
 0x272   : > { %v5056_v60 = vpop.permute.xlu1 %5055 }
 0x273   : > { %v5058_v13 = vunpack.i.h.bf16 %v5056_v60  ;;  %v5057_v22 = vunpack.i.l.bf16 %v5056_v60  ;;  %4635 = vmatprep.subr.msk.bf16.mxu1 %vm6769_vm6, %v4633_v31 }
 0x274   : > { %4638 = vmatpush3.bf16.xpose.msk.msra.mxu1 %vm6769_vm6, %v4633_v31 }
 0x275   : > { %v1749_v11 = vsel %vm1684_vm3, %v1733_v9, %v5057_v22  ;;  %v1700_v54 = vsel %vm1684_vm3, %v1683_v51, %v5058_v13  ;;  %4671 = vmatprep.subr.bf16.mxu1 %v7660_v47  ;;  %v7663_v13 = vmov 0.0  }
 0x276   : > { %v2375_v49 = vpop.permute.xlu1 %2374  ;;  %v1765_v2 = vsel %vm1701_vm4, %v1749_v11, %v5062_v44  ;;  %v1717_v61 = vsel %vm1701_vm4, %v1700_v54, %v5063_v63  ;;  %v7808_v44 = vld [vmem:[#allocation16_spill] sm:$0xff] }
 0x277   : > { %1989 = vmatprep.mubr.f32.mxu1 %v1765_v2 }
 0x278   : > { %1990 = vmatmul.mubr.f32.gmra.mrb[30].mxu1 %v1717_v61 }
 0x279   : > { %5100 = vset.pattern.permute.xlu1 %v7803_v45  ;;  %4399 = vmatprep.mubr.msk.f32.mxu1 %vm2228_vm5, %v2375_v49  ;;  %v7809_v49 = vld [vmem:[#allocation24_spill] sm:$0xff] }
 0x27a   : > { %v2377_v20 = vpop.permute.xlu1 %2376  ;;  %1257 = vperm.xlu1 %5100, %v5229_v58  }
 0x27c   : > { %4400 = vmatmul.mubr.msk.f32.vlgmr.msra.gmra.mrb[32].mxu1 %vm2228_vm5, %v2377_v20  ;;  %v7811_v20 = vld [vmem:[#allocation33_spill] sm:$0xff] }
 0x27d   : > { %4673 = vmatpush3.bf16.msra.mxu1 %v4672_v38  ;;  %4402 = vmatprep.mubr.msk.f32.mxu1 %vm2228_vm5, %v6878_v37 }
 0x27e   : > { %v5071_v14 = vpop.permute.xlu1 %5070  ;;  %2204 = vrot.lane.b32.xlu1 %v6413_v57, %s5281_s21  ;;  %4674 = vmatprep.subr.bf16.mxu1 %v7660_v47 }
 0x27f   : > { %v5073_v35 = vunpack.i.h.bf16 %v5071_v14  ;;  %v5072_v17 = vunpack.i.l.bf16 %v5071_v14  ;;  %v1206_v27 = vpop.permute.xlu0 %1205 }
 0x280   : > { %v1268_v21 = vmul.f32 %v1206_v27, %v7804_v5  ;;  %4403 = vmatmul.mubr.msk.f32.gmra.mrb[34].mxu1 %vm2228_vm5, %v6893_v10 }
 0x281   : > { %v4675_v8 = vpack.c.bf16 %v5073_v35, %v5072_v17 }
 0x282   : > { %v2383_v55 = vpop.permute.xlu1 %2382  ;;  %2208 = vrot.lane.b32.xlu1 %v6451_v0, %s5281_s21  ;;  %4331 = vmatprep.mubr.msk.f32.mxu0 %vm350_vm0, %v1268_v21 }
 0x283   : > { %v1210_v37 = vpop.permute.xlu0 %1209  ;;  %4405 = vmatprep.mubr.msk.f32.mxu1 %vm2228_vm5, %v2383_v55  ;;  %4676 = vmatpush3.bf16.msra.mxu1 %v4675_v8  ;;  %v7813_v8 = vld [vmem:[#allocation44_spill] sm:$0xff]  ;;  %v7814_v55 = vld [vmem:[#allocation26_spill] sm:$0xff] }
 0x284   : > { %v1269_v3 = vmul.f32 %v1210_v37, %v7805_v19  ;;  %4677 = vmatprep.subr.bf16.mxu1 %v7660_v47 }
 0x286   : > { %4332 = vmatmul.mubr.msk.f32.vlgmr.msra.gmra.mrb[16].mxu0 %vm350_vm0, %v1269_v3  ;;  %v2385_v10 = vpop.permute.xlu1 %2384  ;;  %v7815_v3 = vld [vmem:[#allocation6_spill] sm:$0xff] }
 0x287   : > { %v1214_v25 = vpop.permute.xlu0 %1213  ;;  %4406 = vmatmul.mubr.msk.f32.gmra.mrb[36].mxu1 %vm2228_vm5, %v2385_v10 }
 0x288   : > { %v1270_v7 = vmul.f32 %v1214_v25, %v7806_v41  ;;  %4679 = vmatpush3.bf16.msra.mxu1 %v4678_v4  ;;  %4408 = vmatprep.mubr.msk.f32.mxu1 %vm2228_vm5, %v2387_v18  ;;  %v7816_v25 = vld [vmem:[#allocation19_spill] sm:$0xff] }
 0x289   : > { %4680 = vmatprep.subr.bf16.mxu1 %v7660_v47 }
 0x28a   : > { %v5081_v50 = vpop.permute.xlu1 %5080  ;;  %4334 = vmatprep.mubr.msk.f32.mxu0 %vm350_vm0, %v1270_v7 }
 0x28b   : > { %v5083_v33 = vunpack.i.h.bf16 %v5081_v50  ;;  %v5082_v31 = vunpack.i.l.bf16 %v5081_v50  ;;  %v1218_v43 = vpop.permute.xlu0 %1217  ;;  %4409 = vmatmul.mubr.msk.f32.gmra.mrb[38].mxu1 %vm2228_vm5, %v2389_v42  ;;  %v7812_v42 = vld [vmem:[#allocation38_spill] sm:$0xff] }
 0x28c   : > { %v1271_v60 = vmul.f32 %v1218_v43, %v7807_v59  ;;  %4483 = vmatprep.mubr.msk.f32.mxu1 %vm5289_vm7, %v7663_v13 }
 0x28d   : > { %v4681_v22 = vpack.c.bf16 %v5083_v33, %v5082_v31 }
 0x28e   : > { %4335 = vmatmul.mubr.msk.f32.gmra.mrb[18].mxu0 %vm350_vm0, %v1271_v60 }
 0x28f   : > { %v1222_v63 = vpop.permute.xlu0 %1221  ;;  %4682 = vmatpush3.bf16.msra.mxu1 %v4681_v22 }
 0x290   : > { %v1272_v34 = vmul.f32 %v1222_v63, %v7808_v44  ;;  %4486 = vmatprep.subr.mxu1 %v7663_v13 }
 0x292   : > { %4337 = vmatprep.mubr.msk.f32.mxu0 %vm350_vm0, %v1272_v34 }
 0x293   : > { %v5087_v9 = vpop.permute.xlu0 %5086 }
 0x294   : > { %v5089_v51 = vunpack.i.h.bf16 %v5087_v9  ;;  %v5088_v18 = vunpack.i.l.bf16 %v5087_v9 }
 0x296   : > { %v4591_v11 = vpack.c.bf16 %v5089_v51, %v5088_v18 }
 0x297   : > { %v1226_v54 = vpop.permute.xlu0 %1225 }
 0x298   : > { %v1273_v2 = vmul.f32 %v1226_v54, %v7809_v49  ;;  %4593 = vmatprep.subr.msk.bf16.mxu0 %vm6769_vm6, %v4591_v11 }
 0x299   : > { %4596 = vmatpush3.bf16.xpose.msk.msra.mxu0 %vm6769_vm6, %v4591_v11 }
 0x29a   : > { %4338 = vmatmul.mubr.msk.f32.gmra.mrb[20].mxu0 %vm350_vm0, %v1273_v2  ;;  %v4639_v2 = vpack.c.bf16 %v7781_v23, %v7780_v53 }
 0x29b   : > { %v1230_v61 = vpop.permute.xlu0 %1229 }
 0x29c   : > { %v1274_v6 = vmul.f32 %v1230_v61, %v7810_v24 }
 0x29e   : > { %4340 = vmatprep.mubr.msk.f32.mxu0 %vm350_vm0, %v1274_v6 }
 0x29f   : > { %v1234_v45 = vpop.permute.xlu0 %1233 }
 0x2a0   : > { %v1275_v58 = vmul.f32 %v1234_v45, %v7811_v20 }
 0x2a2   : > { %4341 = vmatmul.mubr.msk.f32.gmra.mrb[22].mxu0 %vm350_vm0, %v1275_v58 }
 0x2a3   : > { %v1238_v38 = vpop.permute.xlu0 %1237 }
 0x2a4   : > { %v1276_v14 = vmul.f32 %v1238_v38, %v7812_v42 }
 0x2a6   : > { %4343 = vmatprep.mubr.msk.f32.mxu0 %vm350_vm0, %v1276_v14 }
 0x2a7   : > { %v5092_v35 = vpop.permute.xlu0 %5091 }
 0x2a8   : > { %v5094_v17 = vunpack.i.h.bf16 %v5092_v35  ;;  %v5093_v27 = vunpack.i.l.bf16 %v5092_v35 }
 0x2aa   : > { %v4597_v5 = vpack.c.bf16 %v5094_v17, %v5093_v27 }
 0x2ab   : > { %v1242_v21 = vpop.permute.xlu0 %1241 }
 0x2ac   : > { %v1277_v40 = vmul.f32 %v1242_v21, %v7813_v8  ;;  %4599 = vmatprep.subr.msk.bf16.mxu0 %vm6769_vm6, %v4597_v5 }
 0x2ad   : > { %4602 = vmatpush3.bf16.xpose.msk.msra.mxu0 %vm6769_vm6, %v4597_v5 }
 0x2ae   : > { %4344 = vmatmul.mubr.msk.f32.gmra.mrb[24].mxu0 %vm350_vm0, %v1277_v40 }
 0x2af   : > { %v1246_v48 = vpop.permute.xlu0 %1245 }
 0x2b0   : > { %v1278_v37 = vmul.f32 %v1246_v48, %v7814_v55 }
 0x2b2   : > { %4346 = vmatprep.mubr.msk.f32.mxu0 %vm350_vm0, %v1278_v37  ;;  %v7817_v37 = vld [vmem:[#allocation43_spill] sm:$0xff] }
 0x2b3   : > { %v1250_v19 = vpop.permute.xlu0 %1249 }
 0x2b4   : > { %v1279_v4 = vmul.f32 %v1250_v19, %v7815_v3 }
 0x2b6   : > { %4347 = vmatmul.mubr.msk.f32.gmra.mrb[26].mxu0 %vm350_vm0, %v1279_v4 }
 0x2b7   : > { %v1254_v10 = vpop.permute.xlu0 %1253 }
 0x2b8   : > { %v1280_v41 = vmul.f32 %v1254_v10, %v7816_v25  ;;  %v7818_v25 = vld [vmem:[#allocation42_spill] sm:$0xff] }
 0x2ba   : > { %4349 = vmatprep.mubr.msk.f32.mxu0 %vm350_vm0, %v1280_v41 }
 0x2bb   : > { %v5097_v7 = vpop.permute.xlu0 %5096 }
 0x2bc   : > { %v5099_v50 = vunpack.i.h.bf16 %v5097_v7  ;;  %v5098_v33 = vunpack.i.l.bf16 %v5097_v7 }
 0x2be   : > { %v4603_v31 = vpack.c.bf16 %v5099_v50, %v5098_v33 }
 0x2bf   : > { %v1262_v43 = vpop.permute.xlu0 %1261  ;;  %v4119_v59 = vpop.f32.mrb[0].mxu1 }
 0x2c0   : > { %v3018_v60 = vpop.trf.xlu1  ;;  %4605 = vmatprep.subr.msk.bf16.mxu0 %vm6769_vm6, %v4603_v31  ;;  %v4120_v22 = vpop.f32.mrb[1].mxu1  ;;  %v1282_v19 = vmul.f32 %v1262_v43, %v7817_v37 }
 0x2c1   : > { %v6988_v63 = vadd.f32 %v4120_v22, %v4119_v59  ;;  %4608 = vmatpush3.bf16.xpose.msk.msra.mxu0 %vm6769_vm6, %v4603_v31  ;;  %4484 = vmatmul.mubr.msk.f32.vlgmr.msra.gmra.mrb[40].mxu1 %vm1684_vm3, %v3018_v60  ;;  %v4647_v60 = vpack.c.bf16 %v6440_v15, %v6413_v57 }
 0x2c2   : > { %4488 = vmatprep.mubr.msk.f32.mxu1 %vm5289_vm7, %v7663_v13 }
 0x2c3   : > { %v1266_v44 = vpop.permute.xlu0 %1265 }
 0x2c4   : > { %v1283_v41 = vmul.f32 %v1266_v44, %v7818_v25 }
 0x2c7   : > { %v5103_v34 = vpop.permute.xlu0 %5102  ;;  %v4122_v9 = vpop.f32.mrb[2].mxu1 }
 0x2c8   : > { %v5105_v51 = vunpack.i.h.bf16 %v5103_v34  ;;  %v5104_v18 = vunpack.i.l.bf16 %v5103_v34  ;;  %v4123_v11 = vpop.f32.mrb[3].mxu1  ;;  %v4651_v34 = vpack.c.bf16 %v6474_v1, %v6451_v0 }
 0x2c9   : > { %v6995_v54 = vadd.f32 %v4123_v11, %v4122_v9 }
 0x2ca   : > { %v4609_v49 = vpack.c.bf16 %v5105_v51, %v5104_v18 }
 0x2cb   : > { %v2197_v21 = vpop.permute.xlu0 %2196 }
 0x2cc   : > { %4611 = vmatprep.subr.msk.bf16.mxu0 %vm6769_vm6, %v4609_v49 }
 0x2cd   : > { %4614 = vmatpush3.bf16.xpose.msk.msra.mxu0 %vm6769_vm6, %v4609_v49  ;;  %v7039_v49 = vpack.c.bf16 %v6297_v30, %v6301_v39 }
 0x2ce   : > { %4640 = vmatprep.subr.bf16.mxu0 %v4639_v2 }
 0x2cf   : > { %v4125_v61 = vpop.f32.mrb[4].mxu1  ;;  %v2199_v40 = vpop.permute.xlu0 %2198 }
 0x2d0   : > { %v4126_v24 = vpop.f32.mrb[5].mxu1 }
 0x2d1   : > { %v7003_v6 = vadd.f32 %v4126_v24, %v4125_v61 }
 0x2d3   : > { %v2201_v7 = vpop.permute.xlu0 %2200 }
 0x2d7   : > { %v4128_v45 = vpop.f32.mrb[6].mxu1  ;;  %v2203_v43 = vpop.permute.xlu0 %2202 }
 0x2d8   : > { %v4129_v20 = vpop.f32.mrb[7].mxu1 }
 0x2d9   : > { %v7005_v58 = vadd.f32 %v4129_v20, %v4128_v45 }
 0x2db   : > { %v2207_v22 = vpop.permute.xlu0 %2206 }
 0x2df   : > { %v4131_v38 = vpop.f32.mrb[8].mxu1  ;;  %v2211_v51 = vpop.permute.xlu0 %2210 }
 0x2e0   : > { %v4132_v42 = vpop.f32.mrb[9].mxu1 }
 0x2e1   : > { %v7007_v14 = vadd.f32 %v4132_v42, %v4131_v38 }
 0x2e7   : > { %v4134_v35 = vpop.f32.mrb[10].mxu1 }
 0x2e8   : > { %v4135_v17 = vpop.f32.mrb[11].mxu1 }
 0x2e9   : > { %v7009_v27 = vadd.f32 %v4135_v17, %v4134_v35 }
 0x2ef   : > { %v4137_v5 = vpop.f32.mrb[12].mxu1 }
 0x2f0   : > { %v4138_v46 = vpop.f32.mrb[13].mxu1 }
 0x2f1   : > { %v7011_v8 = vadd.f32 %v4138_v46, %v4137_v5 }
 0x2f7   : > { %v4140_v48 = vpop.f32.mrb[14].mxu1 }
 0x2f8   : > { %v4141_v55 = vpop.f32.mrb[15].mxu1 }
 0x2f9   : > { %v7014_v3 = vadd.f32 %v4141_v55, %v4140_v48  ;;  %v1258_v4 = vpop.permute.xlu1 %1257 }
 0x2fa   : > { %v1281_v10 = vmul.f32 %v1258_v4, %v6376_v26  ;;  %v4643_v26 = vpack.c.bf16 %v6144_v28, %v6057_v12 }
 0x2fc   : > { %4350 = vmatmul.mubr.msk.f32.gmra.mrb[28].mxu0 %vm350_vm0, %v1281_v10 }
 0x2fd   : > { %4352 = vmatprep.mubr.msk.f32.mxu0 %vm350_vm0, %v1282_v19  ;;  %v2205_v59 = vpop.permute.xlu1 %2204 }
 0x2ff   : > { %v4143_v50 = vpop.f32.mrb[16].mxu1 }
 0x300   : > { %v4144_v33 = vpop.f32.mrb[17].mxu1  ;;  %4353 = vmatmul.mubr.msk.f32.gmra.mrb[30].mxu0 %vm350_vm0, %v1283_v41 }
 0x301   : > { %v7021_v31 = vadd.f32 %v4144_v33, %v4143_v50  ;;  %4371 = vmatprep.mubr.msk.f32.mxu0 %vm2228_vm5, %v2197_v21  ;;  %v2209_v44 = vpop.permute.xlu1 %2208 }
 0x304   : > { %4372 = vmatmul.mubr.msk.f32.vlgmr.msra.gmra.mrb[32].mxu0 %vm2228_vm5, %v2199_v40 }
 0x305   : > { %4642 = vmatpush3.bf16.msra.mxu0 %v4639_v2  ;;  %4374 = vmatprep.mubr.msk.f32.mxu0 %vm2228_vm5, %v2201_v7 }
 0x306   : > { %4644 = vmatprep.subr.bf16.mxu0 %v4643_v26 }
 0x308   : > { %4375 = vmatmul.mubr.msk.f32.gmra.mrb[34].mxu0 %vm2228_vm5, %v2203_v43 }
 0x309   : > { %4646 = vmatpush3.bf16.msra.mxu0 %v4643_v26  ;;  %4377 = vmatprep.mubr.msk.f32.mxu0 %vm2228_vm5, %v2205_v59 }
 0x30a   : > { %4648 = vmatprep.subr.bf16.mxu0 %v4647_v60 }
 0x30c   : > { %4378 = vmatmul.mubr.msk.f32.gmra.mrb[36].mxu0 %vm2228_vm5, %v2207_v22 }
 0x30d   : > { %4650 = vmatpush3.bf16.msra.mxu0 %v4647_v60  ;;  %4380 = vmatprep.mubr.msk.f32.mxu0 %vm2228_vm5, %v2209_v44 }
 0x30e   : > { %4652 = vmatprep.subr.bf16.mxu0 %v4651_v34  ;;  %v4146_v9 = vpop.f32.mrb[18].mxu1 }
 0x30f   : > { %v4147_v18 = vpop.f32.mrb[19].mxu1 }
 0x310   : > { %v4148_v11 = vadd.f32 %v4147_v18, %v4146_v9  ;;  %4381 = vmatmul.mubr.msk.f32.gmra.mrb[38].mxu0 %vm2228_vm5, %v2211_v51 }
 0x311   : > { %4654 = vmatpush3.bf16.msra.mxu0 %v4651_v34 }
 0x312   : > { %4656 = vmatprep.subr.bf16.mxu0 %v7039_v49 }
 0x31a   : > { %v4149_v2 = vpop.f32.mrb[20].mxu1 }
 0x31b   : > { %v4150_v61 = vpop.f32.mrb[21].mxu1 }
 0x31c   : > { %v4151_v24 = vadd.f32 %v4150_v61, %v4149_v2 }
 0x324   : > { %v4152_v45 = vpop.f32.mrb[22].mxu1 }
 0x325   : > { %v4153_v20 = vpop.f32.mrb[23].mxu1 }
 0x326   : > { %v4154_v38 = vadd.f32 %v4153_v20, %v4152_v45 }
 0x330   : > { %v4155_v42 = vpop.f32.mrb[24].mxu1 }
 0x331   : > { %v4156_v35 = vpop.f32.mrb[25].mxu1 }
 0x332   : > { %v4157_v17 = vadd.f32 %v4156_v35, %v4155_v42 }
 0x33e   : > { %v4158_v5 = vpop.f32.mrb[26].mxu1 }
 0x33f   : > { %v4159_v46 = vpop.f32.mrb[27].mxu1 }
 0x340   : > { %v4160_v21 = vadd.f32 %v4159_v46, %v4158_v5 }
 0x343   : > { %v4161_v40 = vpop.f32.mrb[28].mxu1 }
 0x344   : > { %v4162_v48 = vpop.f32.mrb[29].mxu1 }
 0x345   : > { %v4163_v55 = vadd.f32 %v4162_v48, %v4161_v40 }
 0x34b   : > { %v4164_v37 = vpop.f32.mrb[30].mxu1 }
 0x34c   : > { %v4165_v19 = vpop.f32.mrb[31].mxu1 }
 0x34d   : > { %v4166_v4 = vadd.f32 %v4165_v19, %v4164_v37 }
 0x34f   : > { %v7042_v10 = vpop.f32.mrb[32].mxu1 }
 0x350   : > { %v7044_v25 = vpop.f32.mrb[33].mxu1 }
 0x353   : > { %v7046_v41 = vpop.f32.mrb[34].mxu1 }
 0x354   : > { %v7048_v7 = vpop.f32.mrb[35].mxu1 }
 0x359   : > { %v4333_v50 = vpop.f32.mrb[16].mxu0 }
 0x35a   : > { %v7051_v33 = vadd.f32 %v4333_v50, %v6995_v54  ;;  %v2061_v43 = vpop.f32.mrb[17].mxu0  ;;  %v7053_v26 = vpop.f32.mrb[36].mxu1 }
 0x35b   : > { %v7056_v59 = vadd.f32 %v6988_v63, %v2061_v43  ;;  %v7058_v60 = vpop.f32.mrb[37].mxu1 }
 0x35c   : > { %vm2141_vm10 = vcmp.gt.f32.partialorder %v7051_v33, 0.0 }
 0x35d   : > { %vm2140_vm11 = vcmp.gt.f32.partialorder %v7056_v59, 0.0 }
 0x35e   : > { %v7060_v22 = vpop.f32.mrb[38].mxu1 }
 0x35f   : > { %v7062_v44 = vpop.f32.mrb[39].mxu1 }
 0x361   : > { %v4336_v34 = vpop.f32.mrb[18].mxu0 }
 0x362   : > { %v7065_v9 = vadd.f32 %v4336_v34, %v7005_v58  ;;  %v2071_v51 = vpop.f32.mrb[19].mxu0 }
 0x363   : > { %v7068_v54 = vadd.f32 %v7003_v6, %v2071_v51 }
 0x364   : > { %vm2143_vm12 = vcmp.gt.f32.partialorder %v7065_v9, 0.0 }
 0x365   : > { %vm2142_vm13 = vcmp.gt.f32.partialorder %v7068_v54, 0.0 }
 0x36d   : > { %v4339_v18 = vpop.f32.mrb[20].mxu0 }
 0x36e   : > { %v7071_v2 = vadd.f32 %v4339_v18, %v7009_v27  ;;  %v2081_v63 = vpop.f32.mrb[21].mxu0 }
 0x36f   : > { %v7074_v61 = vadd.f32 %v7007_v14, %v2081_v63 }
 0x370   : > { %vm2145_vm14 = vcmp.gt.f32.partialorder %v7071_v2, 0.0 }
 0x371   : > { %vm2144_vm15 = vcmp.gt.f32.partialorder %v7074_v61, 0.0 }
 0x375   : > { %v4342_v45 = vpop.f32.mrb[22].mxu0 }
 0x376   : > { %v7077_v20 = vadd.f32 %v4342_v45, %v7014_v3  ;;  %v2091_v42 = vpop.f32.mrb[23].mxu0 }
 0x377   : > { %v7080_v58 = vadd.f32 %v7011_v8, %v2091_v42 }
 0x378   : > { %vm2147_vm1 = vcmp.gt.f32.partialorder %v7077_v20, 0.0 }
 0x379   : > { %vm2146_vm2 = vcmp.gt.f32.partialorder %v7080_v58, 0.0 }
 0x381   : > { %v4345_v35 = vpop.f32.mrb[24].mxu0 }
 0x382   : > { %v7082_v5 = vadd.f32 %v4345_v35, %v4148_v11  ;;  %v2101_v6 = vpop.f32.mrb[25].mxu0 }
 0x383   : > { %v7085_v46 = vadd.f32 %v7021_v31, %v2101_v6 }
 0x385   : > { %vm2148_vm4 = vcmp.gt.f32.partialorder %v7085_v46, 0.0 }
 0x389   : > { %v4348_v27 = vpop.f32.mrb[26].mxu0 }
 0x38a   : > { %v7087_v40 = vadd.f32 %v4348_v27, %v4154_v38  ;;  %v2111_v14 = vpop.f32.mrb[27].mxu0  ;;  %v2567_v27 = vsel %vm1684_vm3, %v7044_v25, -inf }
 0x38b   : > { %v7089_v48 = vadd.f32 %v4151_v24, %v2111_v14  ;;  %v2573_v14 = vsel %vm1684_vm3, %v7048_v7, -inf }
 0x38c   : > { %7819 = vst [vmem:[#allocation21_spill] sm:$0xff] %v7087_v40 }
 0x38d   : > { %7820 = vst [vmem:[#allocation41_spill] sm:$0xff] %v7089_v48 }
 0x394   : > { %v3127_v3 = vpop.f32.mrb[40].mxu1 }
 0x395   : > { %v4485_v37 = vpop.f32.mrb[41].mxu1  ;;  %v3132_v19 = vsel %vm3131_vm8, %v3127_v3, -inf }
 0x396   : > { %3133 = vmax.xlane.f32.xlu1 %v3132_v19  ;;  %v2579_v37 = vsel %vm1684_vm3, %v7058_v60, -inf  ;;  %v2585_v19 = vsel %vm1684_vm3, %v7062_v44, -inf }
 0x3cf   : > { %v4351_v8 = vpop.f32.mrb[28].mxu0 }
 0x3d0   : > { %v7092_v50 = vadd.f32 %v4351_v8, %v4160_v21  ;;  %v2121_v11 = vpop.f32.mrb[29].mxu0 }
 0x3d1   : > { %v7094_v43 = vadd.f32 %v4157_v17, %v2121_v11 }
 0x3d2   : > { %7821 = vst [vmem:[#allocation20_spill] sm:$0xff] %v7092_v50 }
 0x3d3   : > { %7822 = vst [vmem:[#allocation15_spill] sm:$0xff] %v7094_v43  ;;  %v4354_v31 = vpop.f32.mrb[30].mxu0 }
 0x3d4   : > { %v7096_v34 = vadd.f32 %v4354_v31, %v4166_v4  ;;  %v2131_v38 = vpop.f32.mrb[31].mxu0 }
 0x3d5   : > { %v7098_v51 = vadd.f32 %v4163_v55, %v2131_v38 }
 0x3d6   : > { %7823 = vst [vmem:[#allocation36_spill] sm:$0xff] %v7096_v34 }
 0x3d7   : > { %7824 = vst [vmem:[#allocation40_spill] sm:$0xff] %v7098_v51  ;;  %v7100_v24 = vpop.f32.mrb[32].mxu0 }
 0x3d8   : > { %v2327_v18 = vpop.f32.mrb[33].mxu0 }
 0x3db   : > { %v7102_v63 = vpop.f32.mrb[34].mxu0 }
 0x3dc   : > { %v2337_v45 = vpop.f32.mrb[35].mxu0 }
 0x3dd   : > { %v2549_v42 = vsel %vm1684_vm3, %v2337_v45, -inf }
 0x3de   : > { %2550 = vmax.xlane.f32.xlu1 %v2549_v42 }
 0x3df   : > { %v7105_v21 = vpop.f32.mrb[36].mxu0 }
 0x3e0   : > { %v2347_v35 = vpop.f32.mrb[37].mxu0 }
 0x3e1   : > { %v2555_v17 = vsel %vm1684_vm3, %v2347_v35, -inf }
 0x3e2   : > { %2556 = vmax.xlane.f32.xlu1 %v2555_v17  ;;  %v2543_v17 = vsel %vm1684_vm3, %v2327_v18, -inf }
 0x3e3   : > { %v7108_v4 = vpop.f32.mrb[38].mxu0 }
 0x3e4   : > { %v7110_v6 = vpop.f32.mrb[39].mxu0 }
 0x3e5   : > { %v2561_v55 = vsel %vm1684_vm3, %v7110_v6, -inf }
 0x3e6   : > { %2562 = vmax.xlane.f32.xlu1 %v2561_v55  ;;  %v2546_v55 = vsel %vm1684_vm3, %v7100_v24, -inf }
 0x3ea   : > { %2568 = vmax.xlane.f32.xlu1 %v2567_v27  ;;  %v2552_v27 = vsel %vm1684_vm3, %v7102_v63, -inf }
 0x3ee   : > { %2574 = vmax.xlane.f32.xlu1 %v2573_v14  ;;  %v2564_v14 = vsel %vm1684_vm3, %v7108_v4, -inf }
 0x3f2   : > { %2580 = vmax.xlane.f32.xlu1 %v2579_v37  ;;  %v2570_v37 = vsel %vm1684_vm3, %v7042_v10, -inf }
 0x3f6   : > { %2586 = vmax.xlane.f32.xlu1 %v2585_v19  ;;  %v2977_v19 = vld [vmem:[%s7583_s3] sm:$0xf] }
 0x3f7   : > { %4487 = vmatpush3.msk.msra.mxu1 %vm3146_vm9, %v2977_v19 }
 0x3f8   : > { %4524 = vmatprep.subr.mxu1 %v7663_v13 }
 0x423   : > { %v3134_v8 = vpop.xlane.xlu1 %3133 }
 0x424   : > { %v3135_v11 = vsub.f32 %v3127_v3, %v3134_v8  ;;  %v2558_v3 = vsel %vm1684_vm3, %v7105_v21, -inf  ;;  %v2576_v8 = vsel %vm1684_vm3, %v7046_v41, -inf }
 0x426   : > { %v3136_v31 = vmul.f32 1.442695, %v3135_v11  ;;  %v2582_v11 = vsel %vm1684_vm3, %v7053_v26, -inf }
 0x428   : > { %5126 = vpow2.f32 %v3136_v31  ;;  %v2588_v31 = vsel %vm1684_vm3, %v7060_v22, -inf }
 0x432   : > { %v5127_v38 = vpop.eup %5126 }
 0x433   : > { %v3138_v42 = vsel %vm3131_vm8, %v5127_v38, 0.0 }
 0x434   : > { %3139 = vadd.xlane.f32.xlu0 %v3138_v42 }
 0x438   : > { %2544 = vmax.xlane.f32.xlu0 %v2543_v17 }
 0x43c   : > { %2547 = vmax.xlane.f32.xlu0 %v2546_v55 }
 0x440   : > { %2553 = vmax.xlane.f32.xlu0 %v2552_v27 }
 0x444   : > { %2559 = vmax.xlane.f32.xlu0 %v2558_v3 }
 0x448   : > { %2565 = vmax.xlane.f32.xlu0 %v2564_v14 }
 0x44c   : > { %2571 = vmax.xlane.f32.xlu0 %v2570_v37 }
 0x450   : > { %2577 = vmax.xlane.f32.xlu0 %v2576_v8 }
 0x454   : > { %2583 = vmax.xlane.f32.xlu0 %v2582_v11 }
 0x458   : > { %2589 = vmax.xlane.f32.xlu0 %v2588_v31 }
 0x46b   : > { %v2551_v42 = vpop.xlane.xlu1 %2550 }
 0x46c   : > { %v2593_v3 = vsub.f32 %v2337_v45, %v2551_v42 }
 0x46e   : > { %v2611_v47 = vmul.f32 1.442695, %v2593_v3 }
 0x46f   : > { %v2557_v17 = vpop.xlane.xlu1 %2556 }
 0x470   : > { %v2595_v51 = vsub.f32 %v2347_v35, %v2557_v17 }
 0x472   : > { %v2615_v50 = vmul.f32 1.442695, %v2595_v51 }
 0x473   : > { %v2563_v27 = vpop.xlane.xlu1 %2562 }
 0x474   : > { %v2597_v31 = vsub.f32 %v7110_v6, %v2563_v27 }
 0x476   : > { %v2619_v35 = vmul.f32 1.442695, %v2597_v31 }
 0x477   : > { %v2569_v8 = vpop.xlane.xlu1 %2568 }
 0x4c1   : > { %v3140_v55 = vpop.xlane.xlu0 %3139 }
 0x4c2   : > { %5128 = vrcp.f32 %v3140_v55 }
 0x4c5   : > { %v2545_v14 = vpop.xlane.xlu0 %2544 }
 0x4c6   : > { %v2591_v37 = vsub.f32 %v2327_v18, %v2545_v14  ;;  %v2575_v18 = vpop.xlane.xlu1 %2574 }
 0x4c8   : > { %v2607_v13 = vmul.f32 1.442695, %v2591_v37 }
 0x4c9   : > { %v2548_v34 = vpop.xlane.xlu0 %2547 }
 0x4ca   : > { %5130 = vpow2.f32 %v2607_v13  ;;  %v2592_v11 = vsub.f32 %v7100_v24, %v2548_v34  ;;  %v2599_v13 = vsub.f32 %v7044_v25, %v2569_v8  ;;  %v2581_v24 = vpop.xlane.xlu1 %2580 }
 0x4cb   : > { %5132 = vpow2.f32 %v2611_v47  ;;  %v7825_v47 = vmov 0.0   ;;  %v2603_v17 = vsub.f32 %v7058_v60, %v2581_v24 }
 0x4cc   : > { %v5129_v43 = vpop.eup %5128  ;;  %v2609_v48 = vmul.f32 1.442695, %v2592_v11  ;;  %v2623_v51 = vmul.f32 1.442695, %v2599_v13 }
 0x4cd   : > { %v3142_v40 = vmul.f32 %v5129_v43, %v5127_v38  ;;  %v2554_v55 = vpop.xlane.xlu0 %2553  ;;  %v2631_v11 = vmul.f32 1.442695, %v2603_v17 }
 0x4ce   : > { %5134 = vpow2.f32 %v2609_v48  ;;  %v2594_v45 = vsub.f32 %v7102_v63, %v2554_v55  ;;  %v2587_v31 = vpop.xlane.xlu1 %2586 }
 0x4cf   : > { %4489 = vmatmul.mubr.msk.f32.vlgmr.msra.gmra.mrb[42].mxu1 %vm2228_vm5, %v3142_v40  ;;  %5136 = vpow2.f32 %v2615_v50  ;;  %v2601_v40 = vsub.f32 %v7048_v7, %v2575_v18 }
 0x4d0   : > { %v2613_v42 = vmul.f32 1.442695, %v2594_v45  ;;  %4525 = vmatpush3.msk.msra.mxu1 %vm3146_vm9, %v2977_v19  ;;  %4526 = vmatprep.mubr.msk.f32.mxu1 %vm5289_vm7, %v7825_v47 }
 0x4d1   : > { %v2560_v34 = vpop.xlane.xlu0 %2559 }
 0x4d2   : > { %5138 = vpow2.f32 %v2613_v42  ;;  %v2596_v43 = vsub.f32 %v7105_v21, %v2560_v34  ;;  %v2627_v21 = vmul.f32 1.442695, %v2601_v40  ;;  %v2605_v42 = vsub.f32 %v7062_v44, %v2587_v31 }
 0x4d3   : > { %5140 = vpow2.f32 %v2619_v35 }
 0x4d4   : > { %v7154_v48 = vpop.eup %5130  ;;  %v2617_v50 = vmul.f32 1.442695, %v2596_v43 }
 0x4d5   : > { %v2566_v63 = vpop.xlane.xlu0 %2565  ;;  %v2639_v25 = vsel %vm1684_vm3, %v7154_v48, 0.0  ;;  %v7159_v6 = vpop.eup %5132 }
 0x4d6   : > { %5142 = vpow2.f32 %v2617_v50  ;;  %v2598_v38 = vsub.f32 %v7108_v4, %v2566_v63  ;;  %2640 = vadd.xlane.f32.xlu1 %v2639_v25  ;;  %v2645_v14 = vsel %vm1684_vm3, %v7159_v6, 0.0  ;;  %v2635_v63 = vmul.f32 1.442695, %v2605_v42 }
 0x4d7   : > { %5144 = vpow2.f32 %v2623_v51 }
 0x4d8   : > { %v7162_v19 = vpop.eup %5134  ;;  %v2621_v27 = vmul.f32 1.442695, %v2598_v38 }
 0x4d9   : > { %v2572_v7 = vpop.xlane.xlu0 %2571  ;;  %v2642_v3 = vsel %vm1684_vm3, %v7162_v19, 0.0  ;;  %v7169_v37 = vpop.eup %5136 }
 0x4da   : > { %5146 = vpow2.f32 %v2621_v27  ;;  %v2600_v4 = vsub.f32 %v7042_v10, %v2572_v7  ;;  %2643 = vadd.xlane.f32.xlu0 %v2642_v3  ;;  %2646 = vadd.xlane.f32.xlu1 %v2645_v14  ;;  %v2651_v18 = vsel %vm1684_vm3, %v7169_v37, 0.0 }
 0x4db   : > { %5148 = vpow2.f32 %v2627_v21 }
 0x4dc   : > { %v7172_v8 = vpop.eup %5138  ;;  %v2625_v60 = vmul.f32 1.442695, %v2600_v4 }
 0x4dd   : > { %v2578_v55 = vpop.xlane.xlu0 %2577  ;;  %v2648_v45 = vsel %vm1684_vm3, %v7172_v8, 0.0  ;;  %v7178_v35 = vpop.eup %5140 }
 0x4de   : > { %5150 = vpow2.f32 %v2625_v60  ;;  %v2602_v10 = vsub.f32 %v7046_v41, %v2578_v55  ;;  %2649 = vadd.xlane.f32.xlu0 %v2648_v45  ;;  %2652 = vadd.xlane.f32.xlu1 %v2651_v18  ;;  %v2657_v40 = vsel %vm1684_vm3, %v7178_v35, 0.0 }
 0x4df   : > { %5152 = vpow2.f32 %v2631_v11 }
 0x4e0   : > { %v7181_v13 = vpop.eup %5142  ;;  %v2629_v34 = vmul.f32 1.442695, %v2602_v10 }
 0x4e1   : > { %v2584_v43 = vpop.xlane.xlu0 %2583  ;;  %v2654_v51 = vsel %vm1684_vm3, %v7181_v13, 0.0  ;;  %v7188_v50 = vpop.eup %5144 }
 0x4e2   : > { %5154 = vpow2.f32 %v2629_v34  ;;  %v2604_v41 = vsub.f32 %v7053_v26, %v2584_v43  ;;  %2655 = vadd.xlane.f32.xlu0 %v2654_v51  ;;  %2658 = vadd.xlane.f32.xlu1 %v2657_v40  ;;  %v2663_v21 = vsel %vm1684_vm3, %v7188_v50, 0.0  ;;  %v7826_v34 = vld [vmem:[#allocation34_spill] sm:$0xff]  ;;  %v7827_v43 = vld [vmem:[#allocation45_spill] sm:$0xff] }
 0x4e4   : > { %v7191_v24 = vpop.eup %5146  ;;  %v2633_v25 = vmul.f32 1.442695, %v2604_v41 }
 0x4e5   : > { %v2590_v44 = vpop.xlane.xlu0 %2589  ;;  %v2660_v38 = vsel %vm1684_vm3, %v7191_v24, 0.0  ;;  %v7197_v17 = vpop.eup %5148 }
 0x4e6   : > { %5156 = vpow2.f32 %v2633_v25  ;;  %v2606_v27 = vsub.f32 %v7060_v22, %v2590_v44  ;;  %2661 = vadd.xlane.f32.xlu0 %v2660_v38  ;;  %2664 = vadd.xlane.f32.xlu1 %v2663_v21  ;;  %v2669_v14 = vsel %vm1684_vm3, %v7197_v17, 0.0  ;;  %v4659_v21 = vpack.c.bf16 %v6152_v52, %v6156_v36 }
 0x4e7   : > { %5158 = vpow2.f32 %v2635_v63 }
 0x4e8   : > { %v7200_v26 = vpop.eup %5150  ;;  %v2637_v7 = vmul.f32 1.442695, %v2606_v27 }
 0x4e9   : > { %v2666_v3 = vsel %vm1684_vm3, %v7200_v26, 0.0  ;;  %v7206_v4 = vpop.eup %5152 }
 0x4ea   : > { %2667 = vadd.xlane.f32.xlu0 %v2666_v3  ;;  %2670 = vadd.xlane.f32.xlu1 %v2669_v14  ;;  %5160 = vpow2.f32 %v2637_v7  ;;  %v2675_v60 = vsel %vm1684_vm3, %v7206_v4, 0.0  ;;  %v4663_v14 = vpack.c.bf16 %v6466_v29, %v6470_v32 }
 0x4ec   : > { %v7208_v11 = vpop.eup %5154 }
 0x4ed   : > { %v2672_v22 = vsel %vm1684_vm3, %v7208_v11, 0.0 }
 0x4ee   : > { %2673 = vadd.xlane.f32.xlu0 %v2672_v22  ;;  %2676 = vadd.xlane.f32.xlu1 %v2675_v60 }
 0x4f0   : > { %v7214_v31 = vpop.eup %5156 }
 0x4f1   : > { %v2678_v55 = vsel %vm1684_vm3, %v7214_v31, 0.0  ;;  %v7218_v45 = vpop.eup %5158 }
 0x4f2   : > { %2679 = vadd.xlane.f32.xlu0 %v2678_v55  ;;  %v2681_v18 = vsel %vm1684_vm3, %v7218_v45, 0.0 }
 0x4f4   : > { %v7222_v10 = vpop.eup %5160 }
 0x4f5   : > { %v2684_v42 = vsel %vm1684_vm3, %v7222_v10, 0.0 }
 0x4f6   : > { %2682 = vadd.xlane.f32.xlu0 %v2681_v18 }
 0x4fa   : > { %2685 = vadd.xlane.f32.xlu0 %v2684_v42 }
 0x4ff   : > { %3360 = vrot.lane.b32.xlu1 %v6301_v39, %s5283_s26 }
 0x503   : > { %3364 = vrot.lane.b32.xlu1 %v6156_v36, %s5283_s26 }
 0x507   : > { %3366 = vrot.lane.b32.xlu1 %v6152_v52, %s5283_s26 }
 0x50b   : > { %3368 = vrot.lane.b32.xlu1 %v6470_v32, %s5283_s26 }
 0x50f   : > { %3370 = vrot.lane.b32.xlu1 %v6466_v29, %s5283_s26 }
 0x510   : > { %3362 = vrot.lane.b32.xlu0 %v6297_v30, %s5283_s26 }
 0x513   : > { %3372 = vrot.lane.b32.xlu1 %v6538_v56, %s5283_s26 }
 0x514   : > { %3374 = vrot.lane.b32.xlu0 %v6531_v62, %s5283_s26  ;;  %s3760_s26 = sld [smem:[#allocation2]] }
 0x517   : > { %3220 = vrot.lane.b32.xlu1 %v7780_v53, %s5291_s9  ;;  %v7828_v53 = vld [vmem:[#allocation13_spill] sm:$0xff] }
 0x518   : > { %5107 = vrot.lane.b32.xlu0 %v7826_v34, %s5287_s22 }
 0x51b   : > { %3222 = vrot.lane.b32.xlu1 %v7781_v23, %s5291_s9 }
 0x51c   : > { %3224 = vrot.lane.b32.xlu0 %v6057_v12, %s5291_s9 }
 0x51f   : > { %5112 = vrot.lane.b32.xlu1 %v7827_v43, %s5287_s22 }
 0x520   : > { %3226 = vrot.lane.b32.xlu0 %v6144_v28, %s5291_s9 }
 0x523   : > { %3228 = vrot.lane.b32.xlu1 %v6413_v57, %s5291_s9 }
 0x524   : > { %5117 = vrot.lane.b32.xlu0 %v7828_v53, %s5287_s22 }
 0x527   : > { %3230 = vrot.lane.b32.xlu1 %v6440_v15, %s5291_s9 }
 0x528   : > { %3232 = vrot.lane.b32.xlu0 %v6451_v0, %s5291_s9 }
 0x52b   : > { %5122 = vrot.lane.b32.xlu1 %v6553_v16, %s5287_s22  ;;  %s4064_s22 = sld [smem:[#allocation2 + $0x2]] }
 0x52c   : > { %3234 = vrot.lane.b32.xlu0 %v6474_v1, %s5291_s9 }
 0x563   : > { %v2641_v12 = vpop.xlane.xlu1 %2640 }
 0x564   : > { %5162 = vrcp.f32 %v2641_v12 }
 0x567   : > { %v2644_v28 = vpop.xlane.xlu0 %2643  ;;  %v2647_v23 = vpop.xlane.xlu1 %2646 }
 0x568   : > { %5164 = vrcp.f32 %v2644_v28 }
 0x569   : > { %5166 = vrcp.f32 %v2647_v23 }
 0x56b   : > { %v2650_v57 = vpop.xlane.xlu0 %2649  ;;  %v2653_v51 = vpop.xlane.xlu1 %2652 }
 0x56c   : > { %5168 = vrcp.f32 %v2650_v57 }
 0x56d   : > { %5170 = vrcp.f32 %v2653_v51 }
 0x56e   : > { %v5163_v15 = vpop.eup %5162 }
 0x56f   : > { %v2656_v40 = vpop.xlane.xlu0 %2655  ;;  %v2659_v41 = vpop.xlane.xlu1 %2658  ;;  %v2688_v0 = vmul.f32 %v5163_v15, %v7154_v48 }
 0x570   : > { %5172 = vrcp.f32 %v2656_v40 }
 0x571   : > { %5174 = vrcp.f32 %v2659_v41  ;;  %4427 = vmatprep.mubr.msk.f32.mxu0 %vm1684_vm3, %v2688_v0 }
 0x572   : > { %v5165_v1 = vpop.eup %5164 }
 0x573   : > { %v5167_v16 = vpop.eup %5166  ;;  %v2690_v63 = vmul.f32 %v5165_v1, %v7162_v19  ;;  %v2662_v25 = vpop.xlane.xlu0 %2661 }
 0x574   : > { %v2665_v44 = vpop.xlane.xlu1 %2664  ;;  %5176 = vrcp.f32 %v2662_v25  ;;  %v2692_v38 = vmul.f32 %v5167_v16, %v7159_v6 }
 0x575   : > { %5178 = vrcp.f32 %v2665_v44  ;;  %4428 = vmatmul.mubr.msk.f32.vlgmr.msra.gmra.mrb[40].mxu0 %vm1684_vm3, %v2690_v63 }
 0x576   : > { %v5169_v48 = vpop.eup %5168  ;;  %4658 = vmatpush3.bf16.msra.mxu0 %v7039_v49  ;;  %4430 = vmatprep.mubr.msk.f32.mxu0 %vm1684_vm3, %v2692_v38 }
 0x577   : > { %v5171_v27 = vpop.eup %5170  ;;  %4660 = vmatprep.subr.bf16.mxu0 %v4659_v21  ;;  %v2668_v7 = vpop.xlane.xlu0 %2667  ;;  %v2694_v3 = vmul.f32 %v5169_v48, %v7172_v8 }
 0x578   : > { %v2671_v19 = vpop.xlane.xlu1 %2670  ;;  %5180 = vrcp.f32 %v2668_v7  ;;  %v2696_v6 = vmul.f32 %v5171_v27, %v7169_v37  ;;  %v4667_v37 = vpack.c.bf16 %v6531_v62, %v6538_v56 }
 0x579   : > { %5182 = vrcp.f32 %v2671_v19  ;;  %4431 = vmatmul.mubr.msk.f32.gmra.mrb[42].mxu0 %vm1684_vm3, %v2694_v3 }
 0x57a   : > { %v5173_v22 = vpop.eup %5172  ;;  %4662 = vmatpush3.bf16.msra.mxu0 %v4659_v21  ;;  %4433 = vmatprep.mubr.msk.f32.mxu0 %vm1684_vm3, %v2696_v6 }
 0x57b   : > { %v5175_v49 = vpop.eup %5174  ;;  %4664 = vmatprep.subr.bf16.mxu0 %v4663_v14  ;;  %v2674_v60 = vpop.xlane.xlu0 %2673  ;;  %v2698_v18 = vmul.f32 %v5173_v22, %v7181_v13 }
 0x57c   : > { %v2677_v55 = vpop.xlane.xlu1 %2676  ;;  %5184 = vrcp.f32 %v2674_v60  ;;  %v2700_v8 = vmul.f32 %v5175_v49, %v7178_v35 }
 0x57d   : > { %5186 = vrcp.f32 %v2677_v55  ;;  %4434 = vmatmul.mubr.msk.f32.gmra.mrb[44].mxu0 %vm1684_vm3, %v2698_v18 }
 0x57e   : > { %v5177_v42 = vpop.eup %5176  ;;  %4666 = vmatpush3.bf16.msra.mxu0 %v4663_v14  ;;  %4436 = vmatprep.mubr.msk.f32.mxu0 %vm1684_vm3, %v2700_v8 }
 0x57f   : > { %v5179_v34 = vpop.eup %5178  ;;  %4668 = vmatprep.subr.bf16.mxu0 %v4667_v37  ;;  %v2680_v43 = vpop.xlane.xlu0 %2679  ;;  %v2702_v12 = vmul.f32 %v5177_v42, %v7191_v24 }
 0x580   : > { %v3361_v53 = vpop.permute.xlu1 %3360  ;;  %5188 = vrcp.f32 %v2680_v43  ;;  %v2704_v35 = vmul.f32 %v5179_v34, %v7188_v50 }
 0x581   : > { %3384 = vxpose.xlu1.b32.start [1/8] (short) (narrow) %v3361_v53, 8  ;;  %4437 = vmatmul.mubr.msk.f32.gmra.mrb[46].mxu0 %vm1684_vm3, %v2702_v12 }
 0x582   : > { %v5181_v13 = vpop.eup %5180  ;;  %4670 = vmatpush3.bf16.msra.mxu0 %v4667_v37  ;;  %4455 = vmatprep.mubr.msk.f32.mxu0 %vm1684_vm3, %v2704_v35  ;;  %v7829_v37 = vmov 0.0|0.0  }
 0x583   : > { %v5183_v28 = vpop.eup %5182  ;;  %v2706_v23 = vmul.f32 %v5181_v13, %v7200_v26  ;;  %v2683_v57 = vpop.xlane.xlu0 %2682 }
 0x584   : > { %v3365_v51 = vpop.permute.xlu1 %3364  ;;  %5190 = vrcp.f32 %v2683_v57  ;;  %v2708_v15 = vmul.f32 %v5183_v28, %v7197_v17 }
 0x585   : > { %4456 = vmatmul.mubr.msk.f32.vlgmr.msra.gmra.mrb[48].mxu0 %vm1684_vm3, %v2706_v23 }
 0x586   : > { %v5185_v24 = vpop.eup %5184  ;;  %4458 = vmatprep.mubr.msk.f32.mxu0 %vm1684_vm3, %v2708_v15 }
 0x587   : > { %v5187_v50 = vpop.eup %5186  ;;  %v2686_v40 = vpop.xlane.xlu0 %2685  ;;  %v2710_v0 = vmul.f32 %v5185_v24, %v7208_v11 }
 0x588   : > { %v3367_v41 = vpop.permute.xlu1 %3366  ;;  %5192 = vrcp.f32 %v2686_v40  ;;  %v2712_v1 = vmul.f32 %v5187_v50, %v7206_v4 }
 0x589   : > { %4459 = vmatmul.mubr.msk.f32.gmra.mrb[50].mxu0 %vm1684_vm3, %v2710_v0 }
 0x58a   : > { %v5189_v26 = vpop.eup %5188  ;;  %4461 = vmatprep.mubr.msk.f32.mxu0 %vm1684_vm3, %v2712_v1 }
 0x58b   : > { %v3363_v16 = vpop.permute.xlu0 %3362  ;;  %v2714_v63 = vmul.f32 %v5189_v26, %v7214_v31 }
 0x58c   : > { %v3369_v17 = vpop.permute.xlu1 %3368  ;;  %3385 = vxpose.xlu1.b32.cont [2/8] (short) (narrow) %v3363_v16, 8 }
 0x58d   : > { %4462 = vmatmul.mubr.msk.f32.gmra.mrb[52].mxu0 %vm1684_vm3, %v2714_v63 }
 0x58e   : > { %v5191_v25 = vpop.eup %5190 }
 0x58f   : > { %v3375_v44 = vpop.permute.xlu0 %3374  ;;  %v2716_v11 = vmul.f32 %v5191_v25, %v7218_v45 }
 0x590   : > { %v3371_v38 = vpop.permute.xlu1 %3370  ;;  %3386 = vxpose.xlu1.b32.cont [3/8] (short) (narrow) %v3365_v51, 8 }
 0x591   : > { %4464 = vmatprep.mubr.msk.f32.mxu0 %vm1684_vm3, %v2716_v11 }
 0x592   : > { %v5193_v4 = vpop.eup %5192 }
 0x593   : > { %v5108_v21 = vpop.permute.xlu0 %5107  ;;  %v2718_v27 = vmul.f32 %v5193_v4, %v7222_v10 }
 0x594   : > { %v3373_v48 = vpop.permute.xlu1 %3372  ;;  %3387 = vxpose.xlu1.b32.cont [4/8] (short) (narrow) %v3367_v41, 8  ;;  %v5110_v6 = vunpack.i.h.bf16 %v5108_v21  ;;  %v5109_v14 = vunpack.i.l.bf16 %v5108_v21 }
 0x595   : > { %4465 = vmatmul.mubr.msk.f32.gmra.mrb[54].mxu0 %vm1684_vm3, %v2718_v27 }
 0x596   : > { %v4684_v10 = vpack.c.bf16 %v5110_v6, %v5109_v14  ;;  %v2157_v6 = vmul.f32 0.2, %v7051_v33  ;;  %v7360_v14 = vstv %s4064_s22 }
 0x597   : > { %v3225_v7 = vpop.permute.xlu0 %3224 }
 0x598   : > { %v3221_v31 = vpop.permute.xlu1 %3220  ;;  %3388 = vxpose.xlu1.b32.cont [5/8] (short) (narrow) %v3369_v17, 8 }
 0x599   : > { %4493 = vmatprep.mubr.msk.f32.mxu0 %vm2228_vm5, %v3221_v31 }
 0x59b   : > { %v3227_v3 = vpop.permute.xlu0 %3226 }
 0x59c   : > { %v3223_v19 = vpop.permute.xlu1 %3222  ;;  %3389 = vxpose.xlu1.b32.cont [6/8] (short) (narrow) %v3371_v38, 8 }
 0x59f   : > { %v5118_v60 = vpop.permute.xlu0 %5117 }
 0x5a0   : > { %v5113_v45 = vpop.permute.xlu1 %5112  ;;  %3390 = vxpose.xlu1.b32.cont [7/8] (short) (narrow) %v3373_v48, 8  ;;  %v5120_v42 = vunpack.i.h.bf16 %v5118_v60  ;;  %v5119_v34 = vunpack.i.l.bf16 %v5118_v60  ;;  %v2158_v60 = vmul.f32 0.2, %v7068_v54 }
 0x5a1   : > { %v5115_v55 = vunpack.i.h.bf16 %v5113_v45  ;;  %v5114_v18 = vunpack.i.l.bf16 %v5113_v45 }
 0x5a2   : > { %v3216_v22 = vpop.f32.mrb[42].mxu1  ;;  %v4690_v35 = vpack.c.bf16 %v5120_v42, %v5119_v34  ;;  %v7377_v42 = vstv %s4063_s10 }
 0x5a3   : > { %v4490_v49 = vpop.f32.mrb[43].mxu1  ;;  %4491 = vmatprep.subr.msk.mxu0 %vm3146_vm9, %v3216_v22  ;;  %v4687_v43 = vpack.c.bf16 %v5115_v55, %v5114_v18  ;;  %v3233_v12 = vpop.permute.xlu0 %3232  ;;  %v7372_v55 = vld [vmem:[%s7584_s4] ss:$0 sm:$0xff] }
 0x5a4   : > { %v3229_v8 = vpop.permute.xlu1 %3228  ;;  %3391 = vxpose.xlu1.b32.end [8/8] (short) (narrow) %v3375_v44, 8  ;;  %4492 = vmatpush3.msk.msra.mxu0 %vm3146_vm9, %v3216_v22  ;;  %v2173_v22 = vsel %vm2141_vm10, %v7051_v33, %v2157_v6  ;;  %v2156_v49 = vmul.f32 0.2, %v7056_v59 }
 0x5a5   : > { %4494 = vmatmul.mubr.msk.f32.vlgmr.msra.gmra.mrb[56].mxu0 %vm2228_vm5, %v3223_v19  ;;  %4683 = vmatprep.subr.bf16.mxu0 %v7829_v37  ;;  %v3831_v18 = vmul.f32 %v7360_v14, %v2173_v22  ;;  %v5232_v22 = vld [vmem:[%s5399_s29 + $0x18] sm:$0xff] }
 0x5a6   : > { %4496 = vmatprep.mubr.msk.f32.mxu0 %vm2228_vm5, %v3225_v7  ;;  %4685 = vmatpush3.bf16.msra.mxu0 %v4684_v10  ;;  %v2159_v10 = vmul.f32 0.2, %v7065_v9  ;;  %v2172_v34 = vsel %vm2140_vm11, %v7056_v59, %v2156_v49 }
 0x5a7   : > { %4686 = vmatprep.subr.bf16.mxu0 %v7829_v37  ;;  %v3235_v57 = vpop.permute.xlu0 %3234 }
 0x5a8   : > { %v3231_v53 = vpop.permute.xlu1 %3230 }
 0x5a9   : > { %4497 = vmatmul.mubr.msk.f32.gmra.mrb[58].mxu0 %vm2228_vm5, %v3227_v3 }
 0x5aa   : > { %4499 = vmatprep.mubr.msk.f32.mxu0 %vm2228_vm5, %v3229_v8  ;;  %4688 = vmatpush3.bf16.msra.mxu0 %v4687_v43  ;;  %v2175_v43 = vsel %vm2143_vm12, %v7065_v9, %v2159_v10 }
 0x5ab   : > { %4689 = vmatprep.subr.bf16.mxu0 %v7829_v37 }
 0x5ac   : > { %v5123_v13 = vpop.permute.xlu1 %5122 }
 0x5ad   : > { %v5125_v28 = vunpack.i.h.bf16 %v5123_v13  ;;  %v5124_v23 = vunpack.i.l.bf16 %v5123_v13  ;;  %4500 = vmatmul.mubr.msk.f32.gmra.mrb[60].mxu0 %vm2228_vm5, %v3231_v53  ;;  %v2174_v53 = vsel %vm2142_vm13, %v7068_v54, %v2158_v60  ;;  %v2161_v13 = vmul.f32 0.2, %v7071_v2 }
 0x5ae   : > { %4502 = vmatprep.mubr.msk.f32.mxu0 %vm2228_vm5, %v3233_v12  ;;  %4691 = vmatpush3.bf16.msra.mxu0 %v4690_v35  ;;  %v3830_v54 = vmul.f32 %v7360_v14, %v2172_v34 }
 0x5af   : > { %4692 = vmatprep.subr.bf16.mxu0 %v7829_v37  ;;  %v4693_v51 = vpack.c.bf16 %v5125_v28, %v5124_v23  ;;  %v2160_v28 = vmul.f32 0.2, %v7074_v61 }
 0x5b1   : > { %4503 = vmatmul.mubr.msk.f32.gmra.mrb[62].mxu0 %vm2228_vm5, %v3235_v57  ;;  %v5230_v57 = vld [vmem:[%s5399_s29 + $0x8] sm:$0xff] }
 0x5b2   : > { %4694 = vmatpush3.bf16.msra.mxu0 %v4693_v51  ;;  %4521 = vmatprep.mubr.msk.f32.mxu0 %vm5289_vm7, %v7825_v47  ;;  %v7332_v47 = vstv %s3760_s26 }
 0x5c2   : > { %3605 = vrot.lane.b32.xlu1 %v6470_v32, %s5291_s9 }
 0x608   : > { %v3400_v15 = vpop.trf.xlu1 }
 0x609   : > { %4522 = vmatmul.mubr.msk.f32.vlgmr.msra.gmra.mrb[64].mxu0 %vm1684_vm3, %v3400_v15  ;;  %v5231_v15 = vld [vmem:[%s5399_s29] sm:$0xff]  ;;  %vm2149_vm3 = vcmp.gt.f32.partialorder %v7082_v5, 0.0 }
 0x648   : > { %v4429_v24 = vpop.f32.mrb[40].mxu0 }
 0x649   : > { %v2809_v50 = vpop.f32.mrb[41].mxu0  ;;  %v3765_v33 = vmul.f32 %v4429_v24, %v7332_v47 }
 0x64a   : > { %v3764_v8 = vmul.f32 %v7332_v47, %v2809_v50 }
 0x64b   : > { %v3781_v51 = vadd.f32 %v5230_v57, %v3765_v33 }
 0x64c   : > { %v4432_v40 = vpop.f32.mrb[42].mxu0  ;;  %v3780_v24 = vadd.f32 %v5231_v15, %v3764_v8 }
 0x64d   : > { %v2819_v41 = vpop.f32.mrb[43].mxu0  ;;  %v3767_v59 = vmul.f32 %v4432_v40, %v7332_v47 }
 0x64e   : > { %v3766_v50 = vmul.f32 %v7332_v47, %v2819_v41  ;;  %v2176_v41 = vsel %vm2144_vm15, %v7074_v61, %v2160_v28  ;;  %v5233_v61 = vld [vmem:[%s5399_s29 + $0x10] sm:$0xff]  ;;  %v5234_v28 = vld [vmem:[%s5399_s29 + $0x28] sm:$0xff] }
 0x64f   : > { %v3783_v49 = vadd.f32 %v5232_v22, %v3767_v59  ;;  %v5237_v22 = vld [vmem:[%s5399_s29 + $0x30] sm:$0xff] }
 0x650   : > { %v7324_v0 = vpop.f32.mrb[44].mxu0  ;;  %v3782_v33 = vadd.f32 %v5233_v61, %v3766_v50 }
 0x651   : > { %v7326_v1 = vpop.f32.mrb[45].mxu0  ;;  %v3769_v10 = vmul.f32 %v7324_v0, %v7332_v47 }
 0x652   : > { %v3768_v8 = vmul.f32 %v7332_v47, %v7326_v1 }
 0x654   : > { %v7328_v26 = vpop.f32.mrb[46].mxu0 }
 0x655   : > { %v7330_v16 = vpop.f32.mrb[47].mxu0  ;;  %v3771_v57 = vmul.f32 %v7328_v26, %v7332_v47 }
 0x656   : > { %v3770_v15 = vmul.f32 %v7332_v47, %v7330_v16 }
 0x658   : > { %v4457_v17 = vpop.f32.mrb[48].mxu0 }
 0x659   : > { %v7335_v32 = vmul.f32 %v4457_v17, %v7332_v47  ;;  %v2938_v63 = vpop.f32.mrb[49].mxu0 }
 0x65a   : > { %v7338_v25 = vmul.f32 %v7332_v47, %v2938_v63 }
 0x65c   : > { %v4460_v44 = vpop.f32.mrb[50].mxu0 }
 0x65d   : > { %v7341_v38 = vmul.f32 %v4460_v44, %v7332_v47  ;;  %v2948_v11 = vpop.f32.mrb[51].mxu0  ;;  %v3833_v44 = vmul.f32 %v7360_v14, %v2175_v43 }
 0x65e   : > { %v7344_v4 = vmul.f32 %v7332_v47, %v2948_v11  ;;  %v3832_v11 = vmul.f32 %v7360_v14, %v2174_v53  ;;  %v2163_v53 = vmul.f32 0.2, %v7077_v20 }
 0x660   : > { %v4463_v21 = vpop.f32.mrb[52].mxu0  ;;  %v2179_v16 = vsel %vm2147_vm1, %v7077_v20, %v2163_v53 }
 0x661   : > { %v7347_v48 = vmul.f32 %v4463_v21, %v7332_v47  ;;  %v2958_v27 = vpop.f32.mrb[53].mxu0 }
 0x662   : > { %v7350_v31 = vmul.f32 %v7332_v47, %v2958_v27 }
 0x668   : > { %v4466_v7 = vpop.f32.mrb[54].mxu0 }
 0x669   : > { %v7353_v19 = vmul.f32 %v4466_v7, %v7332_v47  ;;  %v2968_v3 = vpop.f32.mrb[55].mxu0  ;;  %v2177_v7 = vsel %vm2145_vm14, %v7071_v2, %v2161_v13 }
 0x66a   : > { %v7356_v45 = vmul.f32 %v7332_v47, %v2968_v3 }
 0x678   : > { %v4495_v37 = vpop.f32.mrb[56].mxu0 }
 0x679   : > { %v3745_v12 = vadd.f32 %v4495_v37, %v7372_v55  ;;  %v3321_v35 = vpop.f32.mrb[57].mxu0 }
 0x67a   : > { %v3744_v23 = vadd.f32 %v7372_v55, %v3321_v35  ;;  %v2162_v35 = vmul.f32 0.2, %v7080_v58 }
 0x67b   : > { %v3798_v9 = vmul.f32 %v7377_v42, %v3745_v12 }
 0x67c   : > { %v3797_v17 = vmul.f32 %v7377_v42, %v3744_v23  ;;  %v4498_v63 = vpop.f32.mrb[58].mxu0  ;;  %v3785_v23 = vadd.f32 %v5234_v28, %v3769_v10 }
 0x67d   : > { %v3814_v21 = vadd.f32 %v3798_v9, %v3781_v51  ;;  %v3747_v40 = vadd.f32 %v4498_v63, %v7372_v55  ;;  %v3331_v27 = vpop.f32.mrb[59].mxu0  ;;  %v5235_v9 = vld [vmem:[%s5399_s29 + $0x20] sm:$0xff]  ;;  %v3835_v63 = vmul.f32 %v7360_v14, %v2177_v7  ;;  %v5236_v7 = vld [vmem:[%s5399_s29 + $0x38] sm:$0xff] }
 0x67e   : > { %v3813_v3 = vadd.f32 %v3797_v17, %v3780_v24  ;;  %v3746_v6 = vadd.f32 %v7372_v55, %v3331_v27  ;;  %v2178_v27 = vsel %vm2146_vm2, %v7080_v58, %v2162_v35 }
 0x67f   : > { %v3847_v2 = vadd.f32 %v3831_v18, %v3814_v21  ;;  %v3800_v60 = vmul.f32 %v7377_v42, %v3747_v40  ;;  %v3834_v40 = vmul.f32 %v7360_v14, %v2176_v41  ;;  %v3836_v61 = vmul.f32 %v7360_v14, %v2178_v27 }
 0x680   : > { %v3846_v37 = vadd.f32 %v3830_v54, %v3813_v3  ;;  %v3799_v34 = vmul.f32 %v7377_v42, %v3746_v6  ;;  %v4501_v43 = vpop.f32.mrb[60].mxu0  ;;  %v3784_v54 = vadd.f32 %v5235_v9, %v3768_v8  ;;  %v3787_v3 = vadd.f32 %v5236_v7, %v3771_v57 }
 0x681   : > { %3863 = vst.msk [vmem:[%s7409_s17 + $0x8] sm:$0xff] %vm350_vm0, %v3847_v2  ;;  %v3816_v0 = vadd.f32 %v3800_v60, %v3783_v49  ;;  %v3749_v18 = vadd.f32 %v4501_v43, %v7372_v55  ;;  %v3341_v12 = vpop.f32.mrb[61].mxu0  ;;  %v3786_v49 = vadd.f32 %v5237_v22, %v3770_v15  ;;  %v3837_v2 = vmul.f32 %v7360_v14, %v2179_v16 }
 0x682   : > { %3862 = vst.msk [vmem:[%s7409_s17] sm:$0xff] %vm350_vm0, %v3846_v37  ;;  %v3815_v1 = vadd.f32 %v3799_v34, %v3782_v33  ;;  %v3748_v13 = vadd.f32 %v7372_v55, %v3341_v12  ;;  %v2164_v9 = vmul.f32 0.2, %v7085_v46 }
 0x683   : > { %v3849_v51 = vadd.f32 %v3833_v44, %v3816_v0  ;;  %v3802_v59 = vmul.f32 %v7377_v42, %v3749_v18 }
 0x684   : > { %v3848_v24 = vadd.f32 %v3832_v11, %v3815_v1  ;;  %v3801_v50 = vmul.f32 %v7377_v42, %v3748_v13  ;;  %v4504_v17 = vpop.f32.mrb[62].mxu0  ;;  %v2180_v15 = vsel %vm2148_vm4, %v7085_v46, %v2164_v9  ;;  %v5238_v46 = vld [vmem:[%s5399_s29 + $0x48] sm:$0xff]  ;;  %v5243_v9 = vld [vmem:[%s5399_s29 + $0x60] sm:$0xff] }
 0x685   : > { %3865 = vst.msk [vmem:[%s7409_s17 + $0x18] sm:$0xff] %vm350_vm0, %v3849_v51  ;;  %v3818_v26 = vadd.f32 %v3802_v59, %v3785_v23  ;;  %v3751_v44 = vadd.f32 %v4504_v17, %v7372_v55  ;;  %v3351_v21 = vpop.f32.mrb[63].mxu0  ;;  %v2165_v59 = vmul.f32 0.2, %v7082_v5  ;;  %v7831_v17 = vld [vmem:[#allocation41_spill] sm:$0xff] }
 0x686   : > { %3864 = vst.msk [vmem:[%s7409_s17 + $0x10] sm:$0xff] %vm350_vm0, %v3848_v24  ;;  %v3817_v47 = vadd.f32 %v3801_v50, %v3784_v54  ;;  %v3750_v11 = vadd.f32 %v7372_v55, %v3351_v21  ;;  %v7830_v24 = vld [vmem:[#allocation21_spill] sm:$0xff]  ;;  %vm2150_vm6 = vcmp.gt.f32.partialorder %v7831_v17, 0.0 }
 0x687   : > { %v3851_v6 = vadd.f32 %v3835_v63, %v3818_v26  ;;  %v3804_v41 = vmul.f32 %v7377_v42, %v3751_v44  ;;  %v2181_v54 = vsel %vm2149_vm3, %v7082_v5, %v2165_v59  ;;  %v2167_v50 = vmul.f32 0.2, %v7830_v24 }
 0x688   : > { %v3850_v20 = vadd.f32 %v3834_v40, %v3817_v47  ;;  %v3803_v10 = vmul.f32 %v7377_v42, %v3750_v11  ;;  %v2166_v63 = vmul.f32 0.2, %v7831_v17  ;;  %v3839_v16 = vmul.f32 %v7360_v14, %v2181_v54 }
 0x689   : > { %3867 = vst.msk [vmem:[%s7409_s17 + $0x28] sm:$0xff] %vm350_vm0, %v3851_v6  ;;  %v3820_v60 = vadd.f32 %v3804_v41, %v3787_v3  ;;  %v3838_v5 = vmul.f32 %v7360_v14, %v2180_v15  ;;  %v3789_v47 = vadd.f32 %v5238_v46, %v7335_v32  ;;  %v5239_v3 = vld [vmem:[%s5399_s29 + $0x40] sm:$0xff]  ;;  %v3792_v54 = vadd.f32 %v5243_v9, %v7350_v31 }
 0x68a   : > { %3866 = vst.msk [vmem:[%s7409_s17 + $0x20] sm:$0xff] %vm350_vm0, %v3850_v20  ;;  %v3819_v58 = vadd.f32 %v3803_v10, %v3786_v49  ;;  %v2182_v7 = vsel %vm2150_vm6, %v7831_v17, %v2166_v63  ;;  %v3788_v6 = vadd.f32 %v5239_v3, %v7338_v25  ;;  %v7832_v49 = vld [vmem:[#allocation20_spill] sm:$0xff]  ;;  %v7833_v10 = vld [vmem:[#allocation15_spill] sm:$0xff] }
 0x68b   : > { %v3853_v33 = vadd.f32 %v3837_v2, %v3820_v60  ;;  %v2169_v20 = vmul.f32 0.2, %v7832_v49  ;;  %v2168_v2 = vmul.f32 0.2, %v7833_v10  ;;  %vm2153_vm7 = vcmp.gt.f32.partialorder %v7832_v49, 0.0 }
 0x68c   : > { %v3852_v8 = vadd.f32 %v3836_v61, %v3819_v58 }
 0x68d   : > { %3869 = vst.msk [vmem:[%s7409_s17 + $0x38] sm:$0xff] %vm350_vm0, %v3853_v33 }
 0x68e   : > { %3868 = vst.msk [vmem:[%s7409_s17 + $0x30] sm:$0xff] %vm350_vm0, %v3852_v8  ;;  %v5240_v8 = vld [vmem:[%s5399_s29 + $0x58] sm:$0xff] }
 0x6dc   : > { %v3509_v37 = vpop.f32.mrb[64].mxu0 }
 0x6dd   : > { %v4523_v34 = vpop.f32.mrb[65].mxu0  ;;  %v3513_v43 = vsel %vm3131_vm8, %v3509_v37, -inf }
 0x6de   : > { %3514 = vmax.xlane.f32.xlu0 %v3513_v43 }
 0x76b   : > { %v3515_v53 = vpop.xlane.xlu0 %3514 }
 0x76c   : > { %v3516_v0 = vsub.f32 %v3509_v37, %v3515_v53  ;;  %v3791_v37 = vadd.f32 %v5240_v8, %v7341_v38  ;;  %v3840_v53 = vmul.f32 %v7360_v14, %v2182_v7 }
 0x76e   : > { %v3517_v18 = vmul.f32 1.442695, %v3516_v0  ;;  %v5241_v0 = vld [vmem:[%s5399_s29 + $0x50] sm:$0xff] }
 0x770   : > { %5194 = vpow2.f32 %v3517_v18  ;;  %v3790_v18 = vadd.f32 %v5241_v0, %v7344_v4 }
 0x77a   : > { %v5195_v12 = vpop.eup %5194 }
 0x77b   : > { %v3519_v35 = vsel %vm3131_vm8, %v5195_v12, 0.0  ;;  %vm2152_vm8 = vcmp.gt.f32.partialorder %v7833_v10, 0.0 }
 0x77c   : > { %3520 = vadd.xlane.f32.xlu0 %v3519_v35 }
 0x792   : > { %3597 = vrot.lane.b32.xlu0 %v6301_v39, %s5291_s9 }
 0x796   : > { %3599 = vrot.lane.b32.xlu0 %v6297_v30, %s5291_s9 }
 0x79a   : > { %3601 = vrot.lane.b32.xlu0 %v6156_v36, %s5291_s9 }
 0x79e   : > { %3603 = vrot.lane.b32.xlu0 %v6152_v52, %s5291_s9 }
 0x7a2   : > { %3607 = vrot.lane.b32.xlu0 %v6466_v29, %s5291_s9 }
 0x7a6   : > { %3609 = vrot.lane.b32.xlu0 %v6538_v56, %s5291_s9 }
 0x7aa   : > { %3611 = vrot.lane.b32.xlu0 %v6531_v62, %s5291_s9  ;;  %v3606_v62 = vpop.permute.xlu1 %3605 }
 0x809   : > { %v3521_v1 = vpop.xlane.xlu0 %3520 }
 0x80a   : > { %5196 = vrcp.f32 %v3521_v1 }
 0x80d   : > { %v3598_v30 = vpop.permute.xlu0 %3597 }
 0x811   : > { %v3600_v36 = vpop.permute.xlu0 %3599 }
 0x814   : > { %v5197_v39 = vpop.eup %5196 }
 0x815   : > { %v3523_v13 = vmul.f32 %v5197_v39, %v5195_v12  ;;  %v3602_v52 = vpop.permute.xlu0 %3601  ;;  %v2185_v39 = vsel %vm2153_vm7, %v7832_v49, %v2169_v20 }
 0x816   : > { %v3843_v17 = vmul.f32 %v7360_v14, %v2185_v39 }
 0x817   : > { %4527 = vmatmul.mubr.msk.f32.vlgmr.msra.gmra.mrb[44].mxu1 %vm2228_vm5, %v3523_v13  ;;  %v2184_v13 = vsel %vm2152_vm8, %v7833_v10, %v2168_v2 }
 0x818   : > { %4531 = vmatprep.mubr.msk.f32.mxu1 %vm2228_vm5, %v3598_v30 }
 0x819   : > { %v3604_v28 = vpop.permute.xlu0 %3603 }
 0x81d   : > { %v3608_v56 = vpop.permute.xlu0 %3607 }
 0x821   : > { %v3610_v57 = vpop.permute.xlu0 %3609 }
 0x825   : > { %v3612_v51 = vpop.permute.xlu0 %3611 }
 0x8ea   : > { %v3593_v23 = vpop.f32.mrb[44].mxu1 }
 0x8eb   : > { %v4528_v29 = vpop.f32.mrb[45].mxu1  ;;  %4529 = vmatprep.subr.msk.mxu1 %vm3146_vm9, %v3593_v23 }
 0x8ec   : > { %4530 = vmatpush3.msk.msra.mxu1 %vm3146_vm9, %v3593_v23  ;;  %v7835_v29 = vld [vmem:[#allocation40_spill] sm:$0xff] }
 0x8ed   : > { %4532 = vmatmul.mubr.msk.f32.vlgmr.msra.gmra.mrb[46].mxu1 %vm2228_vm5, %v3600_v36  ;;  %vm2154_vm10 = vcmp.gt.f32.partialorder %v7835_v29, 0.0 }
 0x8ee   : > { %4534 = vmatprep.mubr.msk.f32.mxu1 %vm2228_vm5, %v3602_v52  ;;  %v7834_v52 = vld [vmem:[#allocation36_spill] sm:$0xff] }
 0x8ef   : > { %vm2155_vm9 = vcmp.gt.f32.partialorder %v7834_v52, 0.0  ;;  %v2171_v4 = vmul.f32 0.2, %v7834_v52 }
 0x8f1   : > { %4535 = vmatmul.mubr.msk.f32.gmra.mrb[48].mxu1 %vm2228_vm5, %v3604_v28  ;;  %v2187_v31 = vsel %vm2155_vm9, %v7834_v52, %v2171_v4 }
 0x8f2   : > { %4537 = vmatprep.mubr.msk.f32.mxu1 %vm2228_vm5, %v3606_v62  ;;  %v5242_v62 = vld [vmem:[%s5399_s29 + $0x68] sm:$0xff] }
 0x8f5   : > { %4538 = vmatmul.mubr.msk.f32.gmra.mrb[50].mxu1 %vm2228_vm5, %v3608_v56  ;;  %v2170_v56 = vmul.f32 0.2, %v7835_v29 }
 0x8f6   : > { %4540 = vmatprep.mubr.msk.f32.mxu1 %vm2228_vm5, %v3610_v57  ;;  %v3793_v57 = vadd.f32 %v5242_v62, %v7347_v48 }
 0x8f9   : > { %4541 = vmatmul.mubr.msk.f32.gmra.mrb[52].mxu1 %vm2228_vm5, %v3612_v51  ;;  %vm2151_vm5 = vcmp.gt.f32.partialorder %v7830_v24, 0.0 }
 0x8fa   : > { %v2183_v27 = vsel %vm2151_vm5, %v7830_v24, %v2167_v50 }
 0x8fb   : > { %v3841_v33 = vmul.f32 %v7360_v14, %v2183_v27  ;;  %v5245_v27 = vld [vmem:[%s5399_s29 + $0x70] sm:$0xff] }
 0x8fc   : > { %v3794_v7 = vadd.f32 %v5245_v27, %v7356_v45 }
 0x9c0   : > { %v4533_v26 = vpop.f32.mrb[46].mxu1 }
 0x9c1   : > { %v3753_v44 = vadd.f32 %v4533_v26, %v7372_v55  ;;  %v3698_v21 = vpop.f32.mrb[47].mxu1 }
 0x9c2   : > { %v3752_v40 = vadd.f32 %v7372_v55, %v3698_v21 }
 0x9c3   : > { %v3806_v11 = vmul.f32 %v7377_v42, %v3753_v44  ;;  %v3842_v44 = vmul.f32 %v7360_v14, %v2184_v13 }
 0x9c4   : > { %v3805_v41 = vmul.f32 %v7377_v42, %v3752_v40  ;;  %v4536_v22 = vpop.f32.mrb[48].mxu1 }
 0x9c5   : > { %v3822_v60 = vadd.f32 %v3806_v11, %v3789_v47  ;;  %v3755_v32 = vadd.f32 %v4536_v22, %v7372_v55  ;;  %v3708_v61 = vpop.f32.mrb[49].mxu1 }
 0x9c6   : > { %v3821_v58 = vadd.f32 %v3805_v41, %v3788_v6  ;;  %v3754_v25 = vadd.f32 %v7372_v55, %v3708_v61 }
 0x9c7   : > { %v3855_v34 = vadd.f32 %v3839_v16, %v3822_v60  ;;  %v3808_v43 = vmul.f32 %v7377_v42, %v3755_v32  ;;  %v2186_v16 = vsel %vm2154_vm10, %v7835_v29, %v2170_v56 }
 0x9c8   : > { %v3854_v12 = vadd.f32 %v3838_v5, %v3821_v58  ;;  %v3807_v35 = vmul.f32 %v7377_v42, %v3754_v25  ;;  %v4539_v1 = vpop.f32.mrb[50].mxu1  ;;  %v5244_v5 = vld [vmem:[%s5399_s29 + $0x78] sm:$0xff]  ;;  %v3844_v22 = vmul.f32 %v7360_v14, %v2186_v16 }
 0x9c9   : > { %3871 = vst.msk [vmem:[%s7409_s17 + $0x48] sm:$0xff] %vm350_vm0, %v3855_v34  ;;  %v3824_v38 = vadd.f32 %v3808_v43, %v3791_v37  ;;  %v3757_v30 = vadd.f32 %v4539_v1, %v7372_v55  ;;  %v3718_v36 = vpop.f32.mrb[51].mxu1  ;;  %v3795_v46 = vadd.f32 %v5244_v5, %v7353_v19 }
 0x9ca   : > { %3870 = vst.msk [vmem:[%s7409_s17 + $0x40] sm:$0xff] %vm350_vm0, %v3854_v12  ;;  %v3823_v28 = vadd.f32 %v3807_v35, %v3790_v18  ;;  %v3756_v23 = vadd.f32 %v7372_v55, %v3718_v36 }
 0x9cb   : > { %v3857_v51 = vadd.f32 %v3841_v33, %v3824_v38  ;;  %v3810_v59 = vmul.f32 %v7377_v42, %v3757_v30 }
 0x9cc   : > { %v3856_v15 = vadd.f32 %v3840_v53, %v3823_v28  ;;  %v3809_v24 = vmul.f32 %v7377_v42, %v3756_v23  ;;  %v4542_v50 = vpop.f32.mrb[52].mxu1 }
 0x9cd   : > { %3873 = vst.msk [vmem:[%s7409_s17 + $0x58] sm:$0xff] %vm350_vm0, %v3857_v51  ;;  %v3826_v48 = vadd.f32 %v3810_v59, %v3793_v57  ;;  %v3759_v63 = vadd.f32 %v4542_v50, %v7372_v55  ;;  %v3728_v26 = vpop.f32.mrb[53].mxu1 }
 0x9ce   : > { %3872 = vst.msk [vmem:[%s7409_s17 + $0x50] sm:$0xff] %vm350_vm0, %v3856_v15  ;;  %v3825_v21 = vadd.f32 %v3809_v24, %v3792_v54  ;;  %v3758_v40 = vadd.f32 %v7372_v55, %v3728_v26  ;;  %v3845_v55 = vmul.f32 %v7360_v14, %v2187_v31 }
 0x9cf   : > { %v3859_v47 = vadd.f32 %v3843_v17, %v3826_v48  ;;  %v3812_v11 = vmul.f32 %v7377_v42, %v3759_v63 }
 0x9d0   : > { %v3858_v3 = vadd.f32 %v3842_v44, %v3825_v21  ;;  %v3811_v6 = vmul.f32 %v7377_v42, %v3758_v40 }
 0x9d1   : > { %3875 = vst.msk [vmem:[%s7409_s17 + $0x68] sm:$0xff] %vm350_vm0, %v3859_v47  ;;  %v3828_v41 = vadd.f32 %v3812_v11, %v3795_v46 }
 0x9d2   : > { %3874 = vst.msk [vmem:[%s7409_s17 + $0x60] sm:$0xff] %vm350_vm0, %v3858_v3  ;;  %v3827_v19 = vadd.f32 %v3811_v6, %v3794_v7 }
 0x9d3   : > { %v3861_v49 = vadd.f32 %v3845_v55, %v3828_v41 }
 0x9d4   : > { %v3860_v20 = vadd.f32 %v3844_v22, %v3827_v19 }
 0x9d5   : > { %3877 = vst.msk [vmem:[%s7409_s17 + $0x78] sm:$0xff] %vm350_vm0, %v3861_v49 }
 0x9d6   : > { %3876 = vst.msk [vmem:[%s7409_s17 + $0x70] sm:$0xff] %vm350_vm0, %v3860_v20 }
 0x9d7 PF: > { %s19_s27 = sadd.s32 1, %s5271_s27  }
 0x9d8   : > { %p16_p1 = scmp.ge.s32.totalorder %s19_s27, 4  }
 0x9da   :  { %18 = sbr.rel (!%p16_p1) target bundleno = 1 (0x1), region = 87 }
 0x9e1   :  { %3900 = vsyncpa [#allocation3], 1 }
 0x9e2   :  { %3902 = vsyncpa [#allocation3 + $0x1], 1 }

</bundles_post_ra>
